<compile_context>
chip_gen: v6e
topology: v6e:2x2x1
jax: 0.10.0
libtpu: 0.0.40
codegen_flags: <defaults>
</compile_context>

<pallas_src>
import math
import numpy as np
import jax
import jax.numpy as jnp
from jax.experimental import pallas as pl
from jax.experimental.pallas import tpu as pltpu


def _round_up(x: int, m: int) -> int:
    return ((x + m - 1) // m) * m


# ---------------------------------------------------------------------------
# Kernel: one (TM, g) tile of packed distances -> one (TM, g*R) output tile
# ---------------------------------------------------------------------------
def _bernstein_kernel(gamma_ref, d_ref, pref_ref, exp1_ref, exp2_ref, o_ref):
    tm, g = d_ref.shape          # rows per tile, distances packed per row
    w = o_ref.shape[1]           # g * num_radial (lane-dense, usually 128)
    r = w // g                   # num_radial

    gamma = gamma_ref[0, 0]      # scalar from SMEM
    d = d_ref[...]               # (tm, g)

    # rep[t, k*r + j] = d[t, k]  — repeat each distance across its r lanes.
    lane = jax.lax.broadcasted_iota(jnp.int32, (tm, w), 1)
    rep = jnp.zeros((tm, w), jnp.float32)
    for k in range(g):           # g is small and static (e.g. 4)
        in_group = (lane >= k * r) & (lane < (k + 1) * r)
        rep = jnp.where(in_group, d[:, k:k + 1], rep)

    x = -gamma * rep             # == log(exp_d), exactly
    exp_d = jnp.exp(x)
    one_minus = 1.0 - exp_d      # in [0, 1) for d >= 0

    e1 = exp1_ref[...]           # (1, w) resident constants
    e2 = exp2_ref[...]
    pref = pref_ref[...]

    t1 = e1 * x
    # Guard the e2 == 0 lanes so we never form 0 * log(0).
    t2 = jnp.where(e2 == 0.0, 0.0, e2 * jnp.log(one_minus))
    o_ref[...] = (pref * jnp.exp(t1 + t2)).astype(o_ref.dtype)


# ---------------------------------------------------------------------------
# Module wrapper (mirrors the PyTorch BernsteinBasis)
# ---------------------------------------------------------------------------
class BernsteinBasisPallas:
    def __init__(self, num_radial: int, pregamma_initial: float = 0.45264,
                 block_rows: int = 512):
        assert num_radial >= 1
        self.num_radial = num_radial
        self.block_rows = block_rows
        # Trainable parameter (kept as a runtime value, not baked into the kernel).
        self.pregamma = jnp.asarray(pregamma_initial, dtype=jnp.float32)

        pref = np.asarray([math.comb(num_radial - 1, k) for k in range(num_radial)],
                          dtype=np.float32)
        e1 = np.arange(num_radial, dtype=np.float32)
        e2 = (num_radial - 1) - e1

        # Lane packing factor: fold g distances per row so the output block is
        # 128 lanes wide (dense stores).  Fall back to g=1 when R doesn't divide 128.
        if 128 % num_radial == 0 and (128 // num_radial) <= 16:
            self.g = 128 // num_radial
        else:
            self.g = 1
        g = self.g
        self.w = g * num_radial

        # Constants tiled to the packed lane layout, shape (1, w).
        self.pref_p = jnp.asarray(np.tile(pref, g)[None, :])
        self.exp1_p = jnp.asarray(np.tile(e1, g)[None, :])
        self.exp2_p = jnp.asarray(np.tile(e2, g)[None, :])

    def __call__(self, d_scaled: jax.Array) -> jax.Array:
        assert d_scaled.ndim == 1, "d_scaled must be 1-D (a batch of scaled distances)"
        d_scaled = d_scaled.astype(jnp.float32)
        n = d_scaled.shape[0]
        g, r, w = self.g, self.num_radial, self.w

        gamma = jax.nn.softplus(self.pregamma).reshape(1, 1).astype(jnp.float32)

        # Pack g distances per row; pad so every grid block is full (pad rows are
        # zeros -> well-defined math, sliced off afterwards).
        m = _round_up(n, g) // g
        tm = min(self.block_rows, _round_up(m, 8))
        tm = _round_up(tm, 8)
        m_pad = _round_up(m, tm)
        n_pad = m_pad * g

        d2 = jnp.pad(d_scaled, (0, n_pad - n)).reshape(m_pad, g)
        grid = (m_pad // tm,)

        out2 = pl.pallas_call(
            _bernstein_kernel,
            out_shape=jax.ShapeDtypeStruct((m_pad, w), jnp.float32),
            grid_spec=pltpu.PrefetchScalarGridSpec(
                num_scalar_prefetch=0,
                grid=grid,
                in_specs=[
                    # gamma: tiny scalar, whole array in SMEM
                    pl.BlockSpec(memory_space=pltpu.MemorySpace.SMEM),
                    # packed distances: tiled over the batch axis
                    pl.BlockSpec((tm, g), lambda i: (i, 0)),
                    # per-radial constants: resident (same block every step)
                    pl.BlockSpec((1, w), lambda i: (0, 0)),
                    pl.BlockSpec((1, w), lambda i: (0, 0)),
                    pl.BlockSpec((1, w), lambda i: (0, 0)),
                ],
                out_specs=pl.BlockSpec((tm, w), lambda i: (i, 0)),
            ),
            compiler_params=pltpu.CompilerParams(
                dimension_semantics=("parallel",),
                vmem_limit_bytes=32 * 1024 * 1024,   # safe on v5e/v6e/v7x
            ),
            cost_estimate=pl.CostEstimate(
                flops=int(8 * m_pad * w),
                transcendentals=int(3 * m_pad * w),
                bytes_accessed=int(4 * (m_pad * g + m_pad * w + 3 * w + 1)),
            ),
        )(gamma, d2, self.pref_p, self.exp1_p, self.exp2_p)

        # (m_pad, g*R) -> (m_pad*g, R) is a pure row-major metadata reshape.
        return out2.reshape(m_pad * g, r)[:n]


# ---------------------------------------------------------------------------
# Pure-JAX reference of the PyTorch forward (for the correctness check)
# ---------------------------------------------------------------------------
def bernstein_reference(d, pregamma, num_radial):
    pref = jnp.asarray([math.comb(num_radial - 1, k) for k in range(num_radial)],
                       dtype=jnp.float32)
    gamma = jax.nn.softplus(jnp.asarray(pregamma, dtype=jnp.float32))
    exp_d = jnp.exp(-gamma * d)[:, None]
    e1 = jnp.arange(num_radial, dtype=jnp.float32)[None, :]
    e2 = (num_radial - 1) - e1
    return pref * exp_d ** e1 * (1.0 - exp_d) ** e2


# ---------------------------------------------------------------------------
# Demo / correctness check
# ---------------------------------------------------------------------------
if __name__ == "__main__":
    key = jax.random.PRNGKey(0)
    num_radial = 32          # small radial basis size
    n_edges = 4096           # batch of scaled distances

    # Scaled distances are non-negative by construction in the model.
    d = jax.random.uniform(key, (n_edges,), dtype=jnp.float32,
                           minval=0.0, maxval=5.0)

    mod = BernsteinBasisPallas(num_radial)
    y = jax.block_until_ready(mod(d))

    y_ref = bernstein_reference(d, 0.45264, num_radial)
    assert y.shape == (n_edges, num_radial)

    if jnp.allclose(y, y_ref, rtol=1e-4, atol=1e-6):
        print("KERNEL_OK")
    else:
        print("KERNEL_MISMATCH max_abs_err=",
              float(jnp.max(jnp.abs(y - y_ref))))
</pallas_src>

<mosaic_0001>
module attributes {stable_mosaic.version = 11 : i64} {
  func.func @_bernstein_kernel(%arg0: i32, %arg1: memref<1x1xf32, #tpu.memory_space<smem>>, %arg2: memref<512x4xf32, #tpu.memory_space<vmem>>, %arg3: memref<1x128xf32, #tpu.memory_space<vmem>>, %arg4: memref<1x128xf32, #tpu.memory_space<vmem>>, %arg5: memref<1x128xf32, #tpu.memory_space<vmem>>, %arg6: memref<512x128xf32, #tpu.memory_space<vmem>>) attributes {dimension_semantics = [#tpu.dimension_semantics<parallel>], iteration_bounds = array<i64: 2>, scalar_prefetch = 0 : i64, scratch_operands = 0 : i64, tpu.core_type = #tpu.core_type<tc>, window_params = [{transform_indices = @transform_0, window_bounds = array<i64: 1, 1>}, {transform_indices = @transform_1, window_bounds = array<i64: 512, 4>}, {pipeline_mode = #tpu.pipeline_mode<synchronous>, transform_indices = @transform_2, window_bounds = array<i64: 1, 128>}, {pipeline_mode = #tpu.pipeline_mode<synchronous>, transform_indices = @transform_3, window_bounds = array<i64: 1, 128>}, {pipeline_mode = #tpu.pipeline_mode<synchronous>, transform_indices = @transform_4, window_bounds = array<i64: 1, 128>}, {transform_indices = @transform_5, window_bounds = array<i64: 512, 128>}]} {
    %c0 = arith.constant 0 : index
    %c0_0 = arith.constant 0 : index
    %0 = memref.load %arg1[%c0, %c0_0] : memref<1x1xf32, #tpu.memory_space<smem>>
    %c0_1 = arith.constant 0 : index
    %c0_2 = arith.constant 0 : index
    %1 = vector.load %arg2[%c0_1, %c0_2] : memref<512x4xf32, #tpu.memory_space<vmem>>, vector<512x4xf32>
    %2 = tpu.iota {dimensions = array<i32: 1>} : vector<512x128xi32>
    %cst = arith.constant 0.000000e+00 : f32
    %3 = vector.broadcast %cst : f32 to vector<512x128xf32>
    %c0_i32 = arith.constant 0 : i32
    %4 = vector.broadcast %c0_i32 : i32 to vector<512x128xi32>
    %5 = arith.cmpi sge, %2, %4 : vector<512x128xi32>
    %c32_i32 = arith.constant 32 : i32
    %6 = vector.broadcast %c32_i32 : i32 to vector<512x128xi32>
    %7 = arith.cmpi slt, %2, %6 : vector<512x128xi32>
    %8 = arith.andi %5, %7 : vector<512x128xi1>
    %9 = vector.extract_strided_slice %1 {offsets = [0, 0], sizes = [512, 1], strides = [1, 1]} : vector<512x4xf32> to vector<512x1xf32>
    %10 = vector.shape_cast %9 : vector<512x1xf32> to vector<512x1xf32>
    %11 = vector.broadcast %10 : vector<512x1xf32> to vector<512x128xf32>
    %12 = arith.select %8, %11, %3 : vector<512x128xi1>, vector<512x128xf32>
    %c32_i32_3 = arith.constant 32 : i32
    %13 = vector.broadcast %c32_i32_3 : i32 to vector<512x128xi32>
    %14 = arith.cmpi sge, %2, %13 : vector<512x128xi32>
    %c64_i32 = arith.constant 64 : i32
    %15 = vector.broadcast %c64_i32 : i32 to vector<512x128xi32>
    %16 = arith.cmpi slt, %2, %15 : vector<512x128xi32>
    %17 = arith.andi %14, %16 : vector<512x128xi1>
    %18 = vector.extract_strided_slice %1 {offsets = [0, 1], sizes = [512, 1], strides = [1, 1]} : vector<512x4xf32> to vector<512x1xf32>
    %19 = vector.shape_cast %18 : vector<512x1xf32> to vector<512x1xf32>
    %20 = vector.broadcast %19 : vector<512x1xf32> to vector<512x128xf32>
    %21 = arith.select %17, %20, %12 : vector<512x128xi1>, vector<512x128xf32>
    %c64_i32_4 = arith.constant 64 : i32
    %22 = vector.broadcast %c64_i32_4 : i32 to vector<512x128xi32>
    %23 = arith.cmpi sge, %2, %22 : vector<512x128xi32>
    %c96_i32 = arith.constant 96 : i32
    %24 = vector.broadcast %c96_i32 : i32 to vector<512x128xi32>
    %25 = arith.cmpi slt, %2, %24 : vector<512x128xi32>
    %26 = arith.andi %23, %25 : vector<512x128xi1>
    %27 = vector.extract_strided_slice %1 {offsets = [0, 2], sizes = [512, 1], strides = [1, 1]} : vector<512x4xf32> to vector<512x1xf32>
    %28 = vector.shape_cast %27 : vector<512x1xf32> to vector<512x1xf32>
    %29 = vector.broadcast %28 : vector<512x1xf32> to vector<512x128xf32>
    %30 = arith.select %26, %29, %21 : vector<512x128xi1>, vector<512x128xf32>
    %c96_i32_5 = arith.constant 96 : i32
    %31 = vector.broadcast %c96_i32_5 : i32 to vector<512x128xi32>
    %32 = arith.cmpi sge, %2, %31 : vector<512x128xi32>
    %c128_i32 = arith.constant 128 : i32
    %33 = vector.broadcast %c128_i32 : i32 to vector<512x128xi32>
    %34 = arith.cmpi slt, %2, %33 : vector<512x128xi32>
    %35 = arith.andi %32, %34 : vector<512x128xi1>
    %36 = vector.extract_strided_slice %1 {offsets = [0, 3], sizes = [512, 1], strides = [1, 1]} : vector<512x4xf32> to vector<512x1xf32>
    %37 = vector.shape_cast %36 : vector<512x1xf32> to vector<512x1xf32>
    %38 = vector.broadcast %37 : vector<512x1xf32> to vector<512x128xf32>
    %39 = arith.select %35, %38, %30 : vector<512x128xi1>, vector<512x128xf32>
    %cst_6 = arith.constant 0.000000e+00 : f32
    %40 = arith.subf %cst_6, %0 : f32
    %41 = vector.broadcast %40 : f32 to vector<512x128xf32>
    %42 = arith.mulf %41, %39 : vector<512x128xf32>
    %43 = math.exp %42 : vector<512x128xf32>
    %cst_7 = arith.constant 1.000000e+00 : f32
    %44 = vector.broadcast %cst_7 : f32 to vector<512x128xf32>
    %45 = arith.subf %44, %43 : vector<512x128xf32>
    %c0_8 = arith.constant 0 : index
    %c0_9 = arith.constant 0 : index
    %46 = vector.load %arg4[%c0_8, %c0_9] : memref<1x128xf32, #tpu.memory_space<vmem>>, vector<1x128xf32>
    %c0_10 = arith.constant 0 : index
    %c0_11 = arith.constant 0 : index
    %47 = vector.load %arg5[%c0_10, %c0_11] : memref<1x128xf32, #tpu.memory_space<vmem>>, vector<1x128xf32>
    %c0_12 = arith.constant 0 : index
    %c0_13 = arith.constant 0 : index
    %48 = vector.load %arg3[%c0_12, %c0_13] : memref<1x128xf32, #tpu.memory_space<vmem>>, vector<1x128xf32>
    %49 = vector.broadcast %46 : vector<1x128xf32> to vector<512x128xf32>
    %50 = arith.mulf %49, %42 : vector<512x128xf32>
    %cst_14 = arith.constant 0.000000e+00 : f32
    %51 = vector.broadcast %cst_14 : f32 to vector<1x128xf32>
    %52 = arith.cmpf oeq, %47, %51 : vector<1x128xf32>
    %53 = math.log %45 : vector<512x128xf32>
    %54 = vector.broadcast %47 : vector<1x128xf32> to vector<512x128xf32>
    %55 = arith.mulf %54, %53 : vector<512x128xf32>
    %cst_15 = arith.constant 0.000000e+00 : f32
    %56 = vector.shape_cast %52 : vector<1x128xi1> to vector<1x128xi1>
    %57 = vector.broadcast %56 : vector<1x128xi1> to vector<512x128xi1>
    %58 = vector.broadcast %cst_15 : f32 to vector<512x128xf32>
    %59 = arith.select %57, %58, %55 : vector<512x128xi1>, vector<512x128xf32>
    %60 = arith.addf %50, %59 : vector<512x128xf32>
    %61 = math.exp %60 : vector<512x128xf32>
    %62 = vector.broadcast %48 : vector<1x128xf32> to vector<512x128xf32>
    %63 = arith.mulf %62, %61 : vector<512x128xf32>
    %c0_16 = arith.constant 0 : index
    %c0_17 = arith.constant 0 : index
    %64 = vector.load %arg6[%c0_16, %c0_17] : memref<512x128xf32, #tpu.memory_space<vmem>>, vector<512x128xf32>
    tpu.vector_store %arg6[%c0_16, %c0_17], %63 {strides = array<i32>} : memref<512x128xf32, #tpu.memory_space<vmem>>, vector<512x128xf32>,
    return
  }
  func.func @transform_0(%arg0: i32) -> (i32, i32) {
    %c0_i32 = arith.constant 0 : i32
    %c0_i32_0 = arith.constant 0 : i32
    %c0_i32_1 = arith.constant 0 : i32
    return %c0_i32, %c0_i32_0 : i32, i32
  }
  func.func @transform_1(%arg0: i32) -> (i32, i32) {
    %c0_i32 = arith.constant 0 : i32
    %c0_i32_0 = arith.constant 0 : i32
    return %arg0, %c0_i32 : i32, i32
  }
  func.func @transform_2(%arg0: i32) -> (i32, i32) {
    %c0_i32 = arith.constant 0 : i32
    %c0_i32_0 = arith.constant 0 : i32
    %c0_i32_1 = arith.constant 0 : i32
    return %c0_i32, %c0_i32_0 : i32, i32
  }
  func.func @transform_3(%arg0: i32) -> (i32, i32) {
    %c0_i32 = arith.constant 0 : i32
    %c0_i32_0 = arith.constant 0 : i32
    %c0_i32_1 = arith.constant 0 : i32
    return %c0_i32, %c0_i32_0 : i32, i32
  }
  func.func @transform_4(%arg0: i32) -> (i32, i32) {
    %c0_i32 = arith.constant 0 : i32
    %c0_i32_0 = arith.constant 0 : i32
    %c0_i32_1 = arith.constant 0 : i32
    return %c0_i32, %c0_i32_0 : i32, i32
  }
  func.func @transform_5(%arg0: i32) -> (i32, i32) {
    %c0_i32 = arith.constant 0 : i32
    %c0_i32_0 = arith.constant 0 : i32
    return %arg0, %c0_i32 : i32, i32
  }
}

</mosaic_0001>

<bundles_post_ra>
// kernel: tpu_custom_call.1
= control target key start
LH: loop header
LB: loop body
LE: loop exit
PB: predicated region body
PF: predicated region fallthrough
CT: control target
= control target key end

     0   :  { %s6397_s0 = inlined_call_operand.<no memory space> [shape: f32[1,1], index: 0, kind: input, shape index: {}]   ;;  %s6398_s1 = inlined_call_operand.vmem [shape: f32[1024,4], index: 1, kind: input, shape index: {}]   ;;  %s6399_s2 = inlined_call_operand.vmem [shape: f32[1,128], index: 2, kind: input, shape index: {}]   ;;  %s6400_s3 = inlined_call_operand.vmem [shape: f32[1,128], index: 3, kind: input, shape index: {}]   ;;  %s6401_s4 = inlined_call_operand.vmem [shape: f32[1,128], index: 4, kind: input, shape index: {}]   ;;  %s6402_s5 = inlined_call_operand.hbm [shape: f32[1024,128], index: 5, kind: output, shape index: {}]  }
   0x1   :  { %10 = sst [smem:[#allocation2]] %s6397_s0 }
   0x2   :  { %11 = vsyncpa [#allocation4], 0 }
   0x3   :  { %13 = vsyncpa [#allocation4 + $0x1], 0  ;;  %s3216_s20 = smov 0   ;;  %s3218_s21 = smov 0  }
   0x4   :  { %s3220_s22 = smov 0   ;;  %s3222_s23 = smov 0  }
   0x5 LB: > { %s3237_s0 = sadd.s32 4294967295, %s3174_s23   ;;  %s2652_s24 = sadd.s32 4294967294, %s3174_s23   ;;  %s3174_s23 = sphi %s3222_s23, %s7200_s23   ;;  %s3170_s22 = sphi %s3220_s22, %s7199_s22   ;;  %s3166_s21 = sphi %s3218_s21, %s7198_s21   ;;  %s3162_s20 = sphi %s3216_s20, %s7197_s20  }
   0x6   : > { %s3241_s25 = sadd.s32 1, %s3174_s23   ;;  %s136_s26 = sadd.s32 1, %s3170_s22 }
   0x7   : > { %s133_s27 = ssub.s32 %s3174_s23, %s3241_s25  ;;  %p146_p0 = scmp.ne.s32.totalorder %s3170_s22, %s3166_s21 }
   0x8   : > { %p134_p1 = scmp.eq.s32.totalorder %s133_s27, 0  ;;  %p147_p2 = scmp.eq.s32.totalorder %s3237_s0, 1 }
   0x9   : > { %p152_p3 = scmp.ne.s32.totalorder %s3166_s21, %s3162_s20  ;;  %p153_p4 = scmp.eq.s32.totalorder %s2652_s24, 1 }
   0xa   : > { %s3252_s28 = scalar_select %p134_p1, %s3170_s22, %s136_s26  }
   0xb   : > { %p3254_p5 = por %p147_p2, %p146_p0  ;;  %p3258_p6 = por %p153_p4, %p152_p3 }
   0xc   : > { %p2655_p7 = scmp.ge.s32.totalorder %s3174_s23, 1  ;;  %p192_p8 = scmp.lt.s32.totalorder %s3174_s23, 3 }
   0xe   : > { %p193_p9 = pnand %p2655_p7, %p192_p8 }
  0x10   : > { %196 = sbr.rel (%p193_p9) target bundleno = 848 (0x350), region = 40 }
  0x15   : > { %s2657_s6 = sshll.u32 %s3237_s0, 6  ;;  %v6403_v0 = vmov 0   ;;  %s4413_s13 = sld [smem:[#allocation2]] }
  0x16   : > { %2713 = vset.pattern.permute.xlu1 %v6403_v0  ;;  %2712 = vset.pattern.permute.xlu0 %v6403_v0  ;;  %p221_p10 = scmp.lt.s32.totalorder %s2657_s6, 127  ;;  %s217_s17 = sand.u32 1, %s3166_s21  }
  0x17   : > { %s5402_s18 = sshll.u32 %s217_s17, 9  ;;  %s2666_s11 = sshll.u32 %s3237_s0, 13 }
  0x18   : > { %s7202_s6 = smov (!%p221_p10, %s2657_s6), 127  ;;  %s5428_s26 = scalar_lea.vmem [#allocation3], %s5402_s18 }
  0x19   : > { %s2658_s7 = sshll.u32 %s7202_s6, 3  ;;  %s2590_s12 = sshll.u32 %s5428_s26, 4  ;;  %s6350_s12 = int_to_ptr.vmem [resolvable:$true] %s2590_s12 }
  0x1a   : > { %s3270_s10 = scalar_lea.vmem %s6398_s1, %s2658_s7  ;;  %s6348_s16 = scalar_lea.hbm %s6402_s5, %s2666_s11 }
  0x1b   : > { %v3273_v1 = vld [vmem:[%s3270_s10 + $0x10] sm:$0xff]  ;;  %v3276_v2 = vld [vmem:[%s3270_s10] sm:$0xff]  ;;  %v3281_v3 = vld [vmem:[%s3270_s10 + $0x18] sm:$0xff]  ;;  %s1650_s14 = ssub.f32 0.0, %s4413_s13  ;;  %s6357_s18 = scalar_lea.sflag [#allocation4], %s217_s17 }
  0x1c   : > { %309 = vperm.xlu1 %2713, %v3273_v1   ;;  %299 = vperm.xlu0 %2712, %v3276_v2   ;;  %v3284_v4 = vld [vmem:[%s3270_s10 + $0x8] sm:$0xff]  ;;  %v3292_v6 = vld [vmem:[%s3270_s10 + $0x20] sm:$0xff]  ;;  %v3297_v7 = vld [vmem:[%s3270_s10 + $0x38] sm:$0xff]  ;;  %s3114_s19 = scalar_lea.vmem %s6350_s12, 8192  ;;  %s3180_s24 = smov [#allocation3]  }
  0x1d   : > { %v3289_v5 = vld [vmem:[%s3270_s10 + $0x28] sm:$0xff]  ;;  %v3300_v8 = vld [vmem:[%s3270_s10 + $0x30] sm:$0xff]  ;;  %v3308_v10 = vld [vmem:[%s3270_s10 + $0x40] sm:$0xff]  ;;  %p3115_p11 = scmp.ne.s32.totalorder %s6350_s12, %s3114_s19  ;;  %s3118_s27 = sshll.u32 %s3180_s24, 4  ;;  %s3119_s27 = int_to_ptr.vmem [resolvable:$false] %s3118_s27 }
  0x1e   : > { %v3305_v9 = vld [vmem:[%s3270_s10 + $0x48] sm:$0xff]  ;;  %v3313_v11 = vld [vmem:[%s3270_s10 + $0x58] sm:$0xff]  ;;  %v3316_v12 = vld [vmem:[%s3270_s10 + $0x50] sm:$0xff]  ;;  %s3120_s6 = scalar_lea.vmem %s3119_s27, 16384  ;;  %p3121_p0 = scmp.lt.s32.totalorder %s6350_s12, %s3119_s27 }
  0x1f   : > { %v3321_v13 = vld [vmem:[%s3270_s10 + $0x68] sm:$0xff]  ;;  %v3324_v14 = vld [vmem:[%s3270_s10 + $0x60] sm:$0xff]  ;;  %v3329_v15 = vld [vmem:[%s3270_s10 + $0x78] sm:$0xff]  ;;  %p3116_p12 = pnand %p3115_p11, %p3254_p5  ;;  %p3122_p1 = scmp.lt.s32.totalorder %s3120_s6, %s3114_s19 }
  0x20   : > { %314 = vperm.xlu1 %2713, %v3281_v3   ;;  %304 = vperm.xlu0 %2712, %v3284_v4   ;;  %v3332_v16 = vld [vmem:[%s3270_s10 + $0x70] sm:$0xff]  ;;  %v3337_v17 = vld [vmem:[%s3270_s10 + $0x88] sm:$0xff]  ;;  %v3340_v18 = vld [vmem:[%s3270_s10 + $0x80] sm:$0xff] }
  0x21   : > { %v3345_v19 = vld [vmem:[%s3270_s10 + $0x98] sm:$0xff]  ;;  %v3348_v20 = vld [vmem:[%s3270_s10 + $0x90] sm:$0xff]  ;;  %v3353_v21 = vld [vmem:[%s3270_s10 + $0xa8] sm:$0xff]  ;;  %p3117_p13 = pneg %p3116_p12  ;;  %p3123_p2 = por %p3122_p1, %p3121_p0 }
  0x22   : > { %v3356_v22 = vld [vmem:[%s3270_s10 + $0xa0] sm:$0xff]  ;;  %v3361_v23 = vld [vmem:[%s3270_s10 + $0xb8] sm:$0xff]  ;;  %v3364_v24 = vld [vmem:[%s3270_s10 + $0xb0] sm:$0xff] }
  0x23   : > { %v3369_v25 = vld [vmem:[%s3270_s10 + $0xc8] sm:$0xff]  ;;  %v3372_v26 = vld [vmem:[%s3270_s10 + $0xc0] sm:$0xff]  ;;  %v3377_v27 = vld [vmem:[%s3270_s10 + $0xd8] sm:$0xff]  ;;  %p3124_p3 = pnand %p3123_p2, %p3117_p13 }
  0x24   : > { %324 = vperm.xlu1 %2713, %v3289_v5   ;;  %319 = vperm.xlu0 %2712, %v3292_v6   ;;  %v3380_v28 = vld [vmem:[%s3270_s10 + $0xd0] sm:$0xff]  ;;  %v3385_v29 = vld [vmem:[%s3270_s10 + $0xe8] sm:$0xff]  ;;  %v3388_v30 = vld [vmem:[%s3270_s10 + $0xe0] sm:$0xff] }
  0x25   : > { %v3393_v31 = vld [vmem:[%s3270_s10 + $0xf8] sm:$0xff]  ;;  %v3396_v32 = vld [vmem:[%s3270_s10 + $0xf0] sm:$0xff]  ;;  %v3401_v33 = vld [vmem:[%s3270_s10 + $0x108] sm:$0xff] }
  0x26   : > { %v3404_v34 = vld [vmem:[%s3270_s10 + $0x100] sm:$0xff]  ;;  %v3409_v35 = vld [vmem:[%s3270_s10 + $0x118] sm:$0xff]  ;;  %v3412_v36 = vld [vmem:[%s3270_s10 + $0x110] sm:$0xff] }
  0x27   : > { %v3417_v37 = vld [vmem:[%s3270_s10 + $0x128] sm:$0xff]  ;;  %v3420_v38 = vld [vmem:[%s3270_s10 + $0x120] sm:$0xff]  ;;  %v3425_v39 = vld [vmem:[%s3270_s10 + $0x138] sm:$0xff] }
  0x28   : > { %334 = vperm.xlu1 %2713, %v3297_v7   ;;  %329 = vperm.xlu0 %2712, %v3300_v8   ;;  %v3428_v40 = vld [vmem:[%s3270_s10 + $0x130] sm:$0xff]  ;;  %v3433_v41 = vld [vmem:[%s3270_s10 + $0x148] sm:$0xff]  ;;  %v3436_v42 = vld [vmem:[%s3270_s10 + $0x140] sm:$0xff] }
  0x29   : > { %v3441_v43 = vld [vmem:[%s3270_s10 + $0x158] sm:$0xff]  ;;  %v3444_v44 = vld [vmem:[%s3270_s10 + $0x150] sm:$0xff]  ;;  %v3449_v45 = vld [vmem:[%s3270_s10 + $0x168] sm:$0xff] }
  0x2a   : > { %v3452_v46 = vld [vmem:[%s3270_s10 + $0x160] sm:$0xff]  ;;  %v3457_v47 = vld [vmem:[%s3270_s10 + $0x178] sm:$0xff]  ;;  %v3460_v48 = vld [vmem:[%s3270_s10 + $0x170] sm:$0xff] }
  0x2b   : > { %6545 = vst [vmem:[#allocation6_spill] sm:$0xff] %v3452_v46  ;;  %6546 = vst [vmem:[#allocation7_spill] sm:$0xff] %v3460_v48  ;;  %v3465_v49 = vld [vmem:[%s3270_s10 + $0x188] sm:$0xff]  ;;  %v3468_v50 = vld [vmem:[%s3270_s10 + $0x180] sm:$0xff] }
  0x2c   : > { %344 = vperm.xlu1 %2713, %v3305_v9   ;;  %339 = vperm.xlu0 %2712, %v3308_v10   ;;  %6547 = vst [vmem:[#allocation8_spill] sm:$0xff] %v3465_v49  ;;  %6548 = vst [vmem:[#allocation9_spill] sm:$0xff] %v3468_v50  ;;  %v3473_v51 = vld [vmem:[%s3270_s10 + $0x198] sm:$0xff]  ;;  %v3476_v52 = vld [vmem:[%s3270_s10 + $0x190] sm:$0xff] }
  0x2d   : > { %6549 = vst [vmem:[#allocation10_spill] sm:$0xff] %v3473_v51  ;;  %6550 = vst [vmem:[#allocation11_spill] sm:$0xff] %v3476_v52  ;;  %v3481_v53 = vld [vmem:[%s3270_s10 + $0x1a8] sm:$0xff]  ;;  %v3484_v54 = vld [vmem:[%s3270_s10 + $0x1a0] sm:$0xff] }
  0x2e   : > { %6551 = vst [vmem:[#allocation12_spill] sm:$0xff] %v3481_v53  ;;  %6552 = vst [vmem:[#allocation13_spill] sm:$0xff] %v3484_v54  ;;  %v3489_v55 = vld [vmem:[%s3270_s10 + $0x1b8] sm:$0xff]  ;;  %v3492_v56 = vld [vmem:[%s3270_s10 + $0x1b0] sm:$0xff] }
  0x2f   : > { %6553 = vst [vmem:[#allocation14_spill] sm:$0xff] %v3489_v55  ;;  %6554 = vst [vmem:[#allocation15_spill] sm:$0xff] %v3492_v56  ;;  %v3497_v57 = vld [vmem:[%s3270_s10 + $0x1c8] sm:$0xff]  ;;  %v3500_v58 = vld [vmem:[%s3270_s10 + $0x1c0] sm:$0xff] }
  0x30   : > { %354 = vperm.xlu1 %2713, %v3313_v11   ;;  %349 = vperm.xlu0 %2712, %v3316_v12   ;;  %6555 = vst [vmem:[#allocation16_spill] sm:$0xff] %v3497_v57  ;;  %6556 = vst [vmem:[#allocation17_spill] sm:$0xff] %v3500_v58  ;;  %v3505_v59 = vld [vmem:[%s3270_s10 + $0x1d8] sm:$0xff]  ;;  %v3508_v60 = vld [vmem:[%s3270_s10 + $0x1d0] sm:$0xff] }
  0x31   : > { %6557 = vst [vmem:[#allocation18_spill] sm:$0xff] %v3505_v59  ;;  %6558 = vst [vmem:[#allocation19_spill] sm:$0xff] %v3508_v60  ;;  %v3513_v61 = vld [vmem:[%s3270_s10 + $0x1e8] sm:$0xff]  ;;  %v3516_v62 = vld [vmem:[%s3270_s10 + $0x1e0] sm:$0xff] }
  0x32   : > { %6559 = vst [vmem:[#allocation20_spill] sm:$0xff] %v3513_v61  ;;  %v3521_v63 = vld [vmem:[%s3270_s10 + $0x1f8] sm:$0xff]  ;;  %v3524_v0 = vld [vmem:[%s3270_s10 + $0x1f0] sm:$0xff] }
  0x34   : > { %364 = vperm.xlu1 %2713, %v3321_v13   ;;  %359 = vperm.xlu0 %2712, %v3324_v14  }
  0x38   : > { %374 = vperm.xlu1 %2713, %v3329_v15   ;;  %369 = vperm.xlu0 %2712, %v3332_v16  }
  0x3c   : > { %384 = vperm.xlu1 %2713, %v3337_v17   ;;  %379 = vperm.xlu0 %2712, %v3340_v18  }
  0x40   : > { %394 = vperm.xlu1 %2713, %v3345_v19   ;;  %389 = vperm.xlu0 %2712, %v3348_v20  }
  0x44   : > { %404 = vperm.xlu1 %2713, %v3353_v21   ;;  %399 = vperm.xlu0 %2712, %v3356_v22  }
  0x48   : > { %414 = vperm.xlu1 %2713, %v3361_v23   ;;  %409 = vperm.xlu0 %2712, %v3364_v24  }
  0x4c   : > { %424 = vperm.xlu1 %2713, %v3369_v25   ;;  %419 = vperm.xlu0 %2712, %v3372_v26  }
  0x50   : > { %434 = vperm.xlu1 %2713, %v3377_v27   ;;  %429 = vperm.xlu0 %2712, %v3380_v28  }
  0x54   : > { %444 = vperm.xlu1 %2713, %v3385_v29   ;;  %439 = vperm.xlu0 %2712, %v3388_v30  }
  0x58   : > { %454 = vperm.xlu1 %2713, %v3393_v31   ;;  %449 = vperm.xlu0 %2712, %v3396_v32  }
  0x5c   : > { %464 = vperm.xlu1 %2713, %v3401_v33   ;;  %459 = vperm.xlu0 %2712, %v3404_v34  }
  0x60   : > { %474 = vperm.xlu1 %2713, %v3409_v35   ;;  %469 = vperm.xlu0 %2712, %v3412_v36  }
  0x64   : > { %484 = vperm.xlu1 %2713, %v3417_v37   ;;  %479 = vperm.xlu0 %2712, %v3420_v38  }
  0x68   : > { %494 = vperm.xlu1 %2713, %v3425_v39   ;;  %489 = vperm.xlu0 %2712, %v3428_v40  }
  0x6c   : > { %504 = vperm.xlu1 %2713, %v3433_v41   ;;  %499 = vperm.xlu0 %2712, %v3436_v42  }
  0x70   : > { %514 = vperm.xlu1 %2713, %v3441_v43   ;;  %509 = vperm.xlu0 %2712, %v3444_v44  }
  0x74   : > { %524 = vperm.xlu1 %2713, %v3449_v45   ;;  %519 = vperm.xlu0 %2712, %v3452_v46  }
  0x78   : > { %534 = vperm.xlu1 %2713, %v3457_v47   ;;  %529 = vperm.xlu0 %2712, %v3460_v48  }
  0x7c   : > { %544 = vperm.xlu1 %2713, %v3465_v49   ;;  %539 = vperm.xlu0 %2712, %v3468_v50  }
  0x80   : > { %554 = vperm.xlu1 %2713, %v3473_v51   ;;  %549 = vperm.xlu0 %2712, %v3476_v52  }
  0x84   : > { %564 = vperm.xlu1 %2713, %v3481_v53   ;;  %559 = vperm.xlu0 %2712, %v3484_v54  }
  0x88   : > { %574 = vperm.xlu1 %2713, %v3489_v55   ;;  %569 = vperm.xlu0 %2712, %v3492_v56   ;;  %v3177_v55 = vmov 1  }
  0x8c   : > { %584 = vperm.xlu1 %2713, %v3497_v57   ;;  %579 = vperm.xlu0 %2712, %v3500_v58  }
  0x90   : > { %594 = vperm.xlu1 %2713, %v3505_v59   ;;  %589 = vperm.xlu0 %2712, %v3508_v60  }
  0x94   : > { %604 = vperm.xlu1 %2713, %v3513_v61   ;;  %599 = vperm.xlu0 %2712, %v3516_v62  }
  0x97   : > { %v3526_v57 = vpop.permute.xlu1 %309  ;;  %v3528_v58 = vpop.permute.xlu0 %299 }
  0x98   : > { %6560 = vst [vmem:[#allocation21_spill] sm:$0xff] %v3526_v57  ;;  %6561 = vst [vmem:[#allocation22_spill] sm:$0xff] %v3528_v58  ;;  %614 = vperm.xlu1 %2713, %v3521_v63   ;;  %609 = vperm.xlu0 %2712, %v3524_v0  }
  0x9b   : > { %v3532_v59 = vpop.permute.xlu1 %314  ;;  %v3534_v60 = vpop.permute.xlu0 %304 }
  0x9c   : > { %6562 = vst [vmem:[#allocation23_spill] sm:$0xff] %v3532_v59  ;;  %6563 = vst [vmem:[#allocation24_spill] sm:$0xff] %v3534_v60  ;;  %2715 = vset.pattern.permute.xlu1 %v3177_v55  ;;  %2714 = vset.pattern.permute.xlu0 %v3177_v55 }
  0x9d   : > { %689 = vperm.xlu1 %2715, %v3284_v4   ;;  %685 = vperm.xlu0 %2714, %v3276_v2  }
  0x9f   : > { %v3538_v61 = vpop.permute.xlu1 %324  ;;  %v3540_v57 = vpop.permute.xlu0 %319 }
  0xa0   : > { %6564 = vst [vmem:[#allocation25_spill] sm:$0xff] %v3538_v61  ;;  %6565 = vst [vmem:[#allocation26_spill] sm:$0xff] %v3540_v57 }
  0xa1   : > { %693 = vperm.xlu1 %2715, %v3273_v1   ;;  %697 = vperm.xlu0 %2714, %v3281_v3  }
  0xa3   : > { %v3544_v58 = vpop.permute.xlu1 %334  ;;  %v3546_v59 = vpop.permute.xlu0 %329 }
  0xa4   : > { %6566 = vst [vmem:[#allocation27_spill] sm:$0xff] %v3544_v58  ;;  %6567 = vst [vmem:[#allocation28_spill] sm:$0xff] %v3546_v59 }
  0xa5   : > { %701 = vperm.xlu1 %2715, %v3292_v6   ;;  %705 = vperm.xlu0 %2714, %v3289_v5  }
  0xa7   : > { %v3550_v55 = vpop.permute.xlu1 %344  ;;  %v3552_v60 = vpop.permute.xlu0 %339 }
  0xa8   : > { %6568 = vst [vmem:[#allocation29_spill] sm:$0xff] %v3550_v55  ;;  %6569 = vst [vmem:[#allocation30_spill] sm:$0xff] %v3552_v60 }
  0xa9   : > { %709 = vperm.xlu1 %2715, %v3300_v8   ;;  %713 = vperm.xlu0 %2714, %v3297_v7  }
  0xab   : > { %v3556_v57 = vpop.permute.xlu1 %354  ;;  %v3558_v61 = vpop.permute.xlu0 %349 }
  0xac   : > { %6570 = vst [vmem:[#allocation31_spill] sm:$0xff] %v3556_v57  ;;  %6571 = vst [vmem:[#allocation32_spill] sm:$0xff] %v3558_v61 }
  0xad   : > { %717 = vperm.xlu1 %2715, %v3308_v10   ;;  %721 = vperm.xlu0 %2714, %v3305_v9  }
  0xaf   : > { %v3562_v59 = vpop.permute.xlu1 %364  ;;  %v3564_v58 = vpop.permute.xlu0 %359 }
  0xb0   : > { %6572 = vst [vmem:[#allocation33_spill] sm:$0xff] %v3562_v59  ;;  %6573 = vst [vmem:[#allocation34_spill] sm:$0xff] %v3564_v58 }
  0xb1   : > { %725 = vperm.xlu1 %2715, %v3316_v12   ;;  %729 = vperm.xlu0 %2714, %v3313_v11  }
  0xb3   : > { %v3568_v60 = vpop.permute.xlu1 %374  ;;  %v3570_v55 = vpop.permute.xlu0 %369 }
  0xb4   : > { %6574 = vst [vmem:[#allocation35_spill] sm:$0xff] %v3568_v60  ;;  %6575 = vst [vmem:[#allocation36_spill] sm:$0xff] %v3570_v55 }
  0xb5   : > { %733 = vperm.xlu1 %2715, %v3324_v14   ;;  %737 = vperm.xlu0 %2714, %v3321_v13  }
  0xb7   : > { %v3574_v61 = vpop.permute.xlu1 %384  ;;  %v3576_v57 = vpop.permute.xlu0 %379 }
  0xb8   : > { %6576 = vst [vmem:[#allocation37_spill] sm:$0xff] %v3574_v61  ;;  %6577 = vst [vmem:[#allocation38_spill] sm:$0xff] %v3576_v57 }
  0xb9   : > { %741 = vperm.xlu1 %2715, %v3332_v16   ;;  %745 = vperm.xlu0 %2714, %v3329_v15  }
  0xbb   : > { %v3580_v58 = vpop.permute.xlu1 %394  ;;  %v3582_v59 = vpop.permute.xlu0 %389 }
  0xbc   : > { %6578 = vst [vmem:[#allocation39_spill] sm:$0xff] %v3580_v58  ;;  %6579 = vst [vmem:[#allocation40_spill] sm:$0xff] %v3582_v59 }
  0xbd   : > { %749 = vperm.xlu1 %2715, %v3340_v18   ;;  %753 = vperm.xlu0 %2714, %v3337_v17  }
  0xbf   : > { %v3586_v55 = vpop.permute.xlu1 %404  ;;  %v3588_v60 = vpop.permute.xlu0 %399 }
  0xc0   : > { %6580 = vst [vmem:[#allocation41_spill] sm:$0xff] %v3586_v55  ;;  %6581 = vst [vmem:[#allocation42_spill] sm:$0xff] %v3588_v60 }
  0xc1   : > { %757 = vperm.xlu1 %2715, %v3348_v20   ;;  %761 = vperm.xlu0 %2714, %v3345_v19  }
  0xc3   : > { %v3592_v57 = vpop.permute.xlu1 %414  ;;  %v3594_v61 = vpop.permute.xlu0 %409 }
  0xc4   : > { %6582 = vst [vmem:[#allocation43_spill] sm:$0xff] %v3592_v57  ;;  %6583 = vst [vmem:[#allocation44_spill] sm:$0xff] %v3594_v61 }
  0xc5   : > { %765 = vperm.xlu1 %2715, %v3356_v22   ;;  %769 = vperm.xlu0 %2714, %v3353_v21  }
  0xc7   : > { %v3598_v59 = vpop.permute.xlu1 %424  ;;  %v3600_v58 = vpop.permute.xlu0 %419 }
  0xc8   : > { %6584 = vst [vmem:[#allocation45_spill] sm:$0xff] %v3598_v59  ;;  %6585 = vst [vmem:[#allocation46_spill] sm:$0xff] %v3600_v58 }
  0xc9   : > { %773 = vperm.xlu1 %2715, %v3364_v24   ;;  %777 = vperm.xlu0 %2714, %v3361_v23  }
  0xcb   : > { %v3604_v60 = vpop.permute.xlu1 %434  ;;  %v3606_v55 = vpop.permute.xlu0 %429 }
  0xcc   : > { %6586 = vst [vmem:[#allocation47_spill] sm:$0xff] %v3604_v60  ;;  %6587 = vst [vmem:[#allocation48_spill] sm:$0xff] %v3606_v55 }
  0xcd   : > { %781 = vperm.xlu1 %2715, %v3372_v26   ;;  %785 = vperm.xlu0 %2714, %v3369_v25  }
  0xcf   : > { %v3610_v61 = vpop.permute.xlu1 %444  ;;  %v3612_v57 = vpop.permute.xlu0 %439 }
  0xd0   : > { %6588 = vst [vmem:[#allocation49_spill] sm:$0xff] %v3610_v61  ;;  %6589 = vst [vmem:[#allocation50_spill] sm:$0xff] %v3612_v57 }
  0xd1   : > { %789 = vperm.xlu1 %2715, %v3380_v28   ;;  %793 = vperm.xlu0 %2714, %v3377_v27  }
  0xd3   : > { %v3616_v58 = vpop.permute.xlu1 %454  ;;  %v3618_v59 = vpop.permute.xlu0 %449 }
  0xd4   : > { %6590 = vst [vmem:[#allocation51_spill] sm:$0xff] %v3616_v58  ;;  %6591 = vst [vmem:[#allocation52_spill] sm:$0xff] %v3618_v59 }
  0xd5   : > { %797 = vperm.xlu1 %2715, %v3388_v30   ;;  %801 = vperm.xlu0 %2714, %v3385_v29  }
  0xd7   : > { %v3622_v55 = vpop.permute.xlu1 %464  ;;  %v3624_v60 = vpop.permute.xlu0 %459 }
  0xd8   : > { %6592 = vst [vmem:[#allocation53_spill] sm:$0xff] %v3622_v55  ;;  %6593 = vst [vmem:[#allocation54_spill] sm:$0xff] %v3624_v60 }
  0xd9   : > { %805 = vperm.xlu1 %2715, %v3396_v32   ;;  %809 = vperm.xlu0 %2714, %v3393_v31  }
  0xdb   : > { %v3628_v57 = vpop.permute.xlu1 %474  ;;  %v3630_v61 = vpop.permute.xlu0 %469 }
  0xdc   : > { %6594 = vst [vmem:[#allocation55_spill] sm:$0xff] %v3628_v57  ;;  %6595 = vst [vmem:[#allocation56_spill] sm:$0xff] %v3630_v61 }
  0xdd   : > { %813 = vperm.xlu1 %2715, %v3404_v34   ;;  %817 = vperm.xlu0 %2714, %v3401_v33  }
  0xdf   : > { %v3634_v59 = vpop.permute.xlu1 %484  ;;  %v3636_v58 = vpop.permute.xlu0 %479 }
  0xe0   : > { %6596 = vst [vmem:[#allocation57_spill] sm:$0xff] %v3634_v59  ;;  %6597 = vst [vmem:[#allocation58_spill] sm:$0xff] %v3636_v58 }
  0xe1   : > { %821 = vperm.xlu1 %2715, %v3412_v36   ;;  %825 = vperm.xlu0 %2714, %v3409_v35  }
  0xe3   : > { %v3640_v60 = vpop.permute.xlu1 %494  ;;  %v3642_v55 = vpop.permute.xlu0 %489 }
  0xe4   : > { %6598 = vst [vmem:[#allocation59_spill] sm:$0xff] %v3640_v60  ;;  %6599 = vst [vmem:[#allocation60_spill] sm:$0xff] %v3642_v55 }
  0xe5   : > { %829 = vperm.xlu1 %2715, %v3420_v38   ;;  %833 = vperm.xlu0 %2714, %v3417_v37  }
  0xe7   : > { %v3646_v61 = vpop.permute.xlu1 %504  ;;  %v3648_v57 = vpop.permute.xlu0 %499 }
  0xe8   : > { %6600 = vst [vmem:[#allocation61_spill] sm:$0xff] %v3646_v61  ;;  %6601 = vst [vmem:[#allocation62_spill] sm:$0xff] %v3648_v57 }
  0xe9   : > { %837 = vperm.xlu1 %2715, %v3428_v40   ;;  %841 = vperm.xlu0 %2714, %v3425_v39  }
  0xeb   : > { %v3652_v58 = vpop.permute.xlu1 %514  ;;  %v3654_v59 = vpop.permute.xlu0 %509 }
  0xec   : > { %6602 = vst [vmem:[#allocation63_spill] sm:$0xff] %v3652_v58  ;;  %6603 = vst [vmem:[#allocation64_spill] sm:$0xff] %v3654_v59 }
  0xed   : > { %845 = vperm.xlu1 %2715, %v3436_v42   ;;  %849 = vperm.xlu0 %2714, %v3433_v41  }
  0xef   : > { %v3658_v55 = vpop.permute.xlu1 %524  ;;  %v3660_v60 = vpop.permute.xlu0 %519 }
  0xf0   : > { %6604 = vst [vmem:[#allocation65_spill] sm:$0xff] %v3658_v55  ;;  %6605 = vst [vmem:[#allocation66_spill] sm:$0xff] %v3660_v60 }
  0xf1   : > { %853 = vperm.xlu1 %2715, %v3444_v44   ;;  %857 = vperm.xlu0 %2714, %v3441_v43  }
  0xf3   : > { %v3664_v57 = vpop.permute.xlu1 %534  ;;  %v3666_v61 = vpop.permute.xlu0 %529 }
  0xf4   : > { %6606 = vst [vmem:[#allocation67_spill] sm:$0xff] %v3664_v57  ;;  %6607 = vst [vmem:[#allocation68_spill] sm:$0xff] %v3666_v61 }
  0xf5   : > { %861 = vperm.xlu1 %2715, %v3452_v46   ;;  %865 = vperm.xlu0 %2714, %v3449_v45  }
  0xf7   : > { %v3670_v59 = vpop.permute.xlu1 %544  ;;  %v3672_v58 = vpop.permute.xlu0 %539 }
  0xf8   : > { %6608 = vst [vmem:[#allocation69_spill] sm:$0xff] %v3670_v59  ;;  %6609 = vst [vmem:[#allocation70_spill] sm:$0xff] %v3672_v58 }
  0xf9   : > { %869 = vperm.xlu1 %2715, %v3460_v48   ;;  %873 = vperm.xlu0 %2714, %v3457_v47  }
  0xfb   : > { %v3676_v60 = vpop.permute.xlu1 %554  ;;  %v3678_v55 = vpop.permute.xlu0 %549 }
  0xfc   : > { %6610 = vst [vmem:[#allocation71_spill] sm:$0xff] %v3676_v60  ;;  %6611 = vst [vmem:[#allocation72_spill] sm:$0xff] %v3678_v55 }
  0xfd   : > { %877 = vperm.xlu1 %2715, %v3468_v50   ;;  %881 = vperm.xlu0 %2714, %v3465_v49  }
  0xff   : > { %v3682_v61 = vpop.permute.xlu1 %564  ;;  %v3684_v57 = vpop.permute.xlu0 %559 }
 0x100   : > { %6612 = vst [vmem:[#allocation73_spill] sm:$0xff] %v3682_v61  ;;  %6613 = vst [vmem:[#allocation74_spill] sm:$0xff] %v3684_v57  ;;  %v6618_v61 = vld [vmem:[#allocation14_spill] sm:$0xff] }
 0x101   : > { %885 = vperm.xlu1 %2715, %v3476_v52   ;;  %889 = vperm.xlu0 %2714, %v3473_v51   ;;  %v6621_v51 = vld [vmem:[#allocation17_spill] sm:$0xff] }
 0x103   : > { %v3688_v58 = vpop.permute.xlu1 %574  ;;  %v3690_v59 = vpop.permute.xlu0 %569 }
 0x104   : > { %6614 = vst [vmem:[#allocation75_spill] sm:$0xff] %v3688_v58  ;;  %6615 = vst [vmem:[#allocation76_spill] sm:$0xff] %v3690_v59  ;;  %v6622_v58 = vld [vmem:[#allocation16_spill] sm:$0xff] }
 0x105   : > { %893 = vperm.xlu1 %2715, %v3484_v54   ;;  %897 = vperm.xlu0 %2714, %v3481_v53   ;;  %v6625_v53 = vld [vmem:[#allocation19_spill] sm:$0xff] }
 0x107   : > { %v3694_v55 = vpop.permute.xlu1 %584  ;;  %v3696_v60 = vpop.permute.xlu0 %579 }
 0x108   : > { %6616 = vst [vmem:[#allocation77_spill] sm:$0xff] %v3694_v55  ;;  %6617 = vst [vmem:[#allocation78_spill] sm:$0xff] %v3696_v60  ;;  %v6626_v55 = vld [vmem:[#allocation18_spill] sm:$0xff] }
 0x109   : > { %901 = vperm.xlu1 %2715, %v3492_v56   ;;  %905 = vperm.xlu0 %2714, %v6618_v61  }
 0x10b   : > { %v3700_v57 = vpop.permute.xlu1 %594  ;;  %v3702_v49 = vpop.permute.xlu0 %589 }
 0x10c   : > { %6619 = vst [vmem:[#allocation79_spill] sm:$0xff] %v3700_v57  ;;  %6620 = vst [vmem:[#allocation80_spill] sm:$0xff] %v3702_v49  ;;  %v6629_v57 = vld [vmem:[#allocation20_spill] sm:$0xff] }
 0x10d   : > { %909 = vperm.xlu1 %2715, %v6621_v51   ;;  %913 = vperm.xlu0 %2714, %v6622_v58  }
 0x10f   : > { %v3706_v59 = vpop.permute.xlu1 %604  ;;  %v3708_v54 = vpop.permute.xlu0 %599 }
 0x110   : > { %6623 = vst [vmem:[#allocation17_spill] sm:$0xff] %v3706_v59  ;;  %6624 = vst [vmem:[#allocation16_spill] sm:$0xff] %v3708_v54 }
 0x111   : > { %917 = vperm.xlu1 %2715, %v6625_v53   ;;  %921 = vperm.xlu0 %2714, %v6626_v55   ;;  %v3178_v55 = vmov 2  }
 0x113   : > { %v3712_v60 = vpop.permute.xlu1 %614  ;;  %v3714_v56 = vpop.permute.xlu0 %609 }
 0x114   : > { %6627 = vst [vmem:[#allocation19_spill] sm:$0xff] %v3712_v60  ;;  %6628 = vst [vmem:[#allocation81_spill] sm:$0xff] %v3714_v56 }
 0x115   : > { %925 = vperm.xlu1 %2715, %v3516_v62   ;;  %929 = vperm.xlu0 %2714, %v6629_v57  }
 0x118   : > { %v3718_v49 = vpop.permute.xlu1 %689  ;;  %v3720_v61 = vpop.permute.xlu0 %685 }
 0x119   : > { %6630 = vst [vmem:[#allocation20_spill] sm:$0xff] %v3718_v49  ;;  %6631 = vst [vmem:[#allocation82_spill] sm:$0xff] %v3720_v61  ;;  %933 = vperm.xlu1 %2715, %v3524_v0   ;;  %937 = vperm.xlu0 %2714, %v3521_v63   ;;  %v6684_v49 = vld [vmem:[#allocation8_spill] sm:$0xff] }
 0x11c   : > { %v3724_v54 = vpop.permute.xlu1 %693  ;;  %v3726_v59 = vpop.permute.xlu0 %697 }
 0x11d   : > { %6632 = vst [vmem:[#allocation83_spill] sm:$0xff] %v3724_v54  ;;  %6633 = vst [vmem:[#allocation84_spill] sm:$0xff] %v3726_v59  ;;  %2716 = vset.pattern.permute.xlu1 %v3178_v55  ;;  %2717 = vset.pattern.permute.xlu0 %v3178_v55 }
 0x11e   : > { %1008 = vperm.xlu1 %2716, %v3276_v2   ;;  %1012 = vperm.xlu0 %2717, %v3284_v4  }
 0x120   : > { %v3730_v56 = vpop.permute.xlu1 %701  ;;  %v3732_v60 = vpop.permute.xlu0 %705 }
 0x121   : > { %6634 = vst [vmem:[#allocation85_spill] sm:$0xff] %v3730_v56  ;;  %6635 = vst [vmem:[#allocation86_spill] sm:$0xff] %v3732_v60 }
 0x122   : > { %1016 = vperm.xlu1 %2716, %v3273_v1   ;;  %1024 = vperm.xlu0 %2717, %v3292_v6  }
 0x124   : > { %v3736_v61 = vpop.permute.xlu1 %709  ;;  %v3738_v54 = vpop.permute.xlu0 %713 }
 0x125   : > { %6636 = vst [vmem:[#allocation87_spill] sm:$0xff] %v3736_v61  ;;  %6637 = vst [vmem:[#allocation88_spill] sm:$0xff] %v3738_v54 }
 0x126   : > { %1020 = vperm.xlu1 %2716, %v3281_v3   ;;  %1032 = vperm.xlu0 %2717, %v3300_v8  }
 0x128   : > { %v3742_v55 = vpop.permute.xlu1 %717  ;;  %v3744_v59 = vpop.permute.xlu0 %721 }
 0x129   : > { %6638 = vst [vmem:[#allocation89_spill] sm:$0xff] %v3742_v55  ;;  %6639 = vst [vmem:[#allocation90_spill] sm:$0xff] %v3744_v59 }
 0x12a   : > { %1028 = vperm.xlu1 %2716, %v3289_v5   ;;  %1040 = vperm.xlu0 %2717, %v3308_v10  }
 0x12c   : > { %v3748_v60 = vpop.permute.xlu1 %725  ;;  %v3750_v56 = vpop.permute.xlu0 %729 }
 0x12d   : > { %6640 = vst [vmem:[#allocation91_spill] sm:$0xff] %v3748_v60  ;;  %6641 = vst [vmem:[#allocation92_spill] sm:$0xff] %v3750_v56 }
 0x12e   : > { %1036 = vperm.xlu1 %2716, %v3297_v7   ;;  %1048 = vperm.xlu0 %2717, %v3316_v12  }
 0x130   : > { %v3754_v54 = vpop.permute.xlu1 %733  ;;  %v3756_v61 = vpop.permute.xlu0 %737 }
 0x131   : > { %6642 = vst [vmem:[#allocation93_spill] sm:$0xff] %v3754_v54  ;;  %6643 = vst [vmem:[#allocation94_spill] sm:$0xff] %v3756_v61 }
 0x132   : > { %1044 = vperm.xlu1 %2716, %v3305_v9   ;;  %1056 = vperm.xlu0 %2717, %v3324_v14  }
 0x134   : > { %v3760_v59 = vpop.permute.xlu1 %741  ;;  %v3762_v55 = vpop.permute.xlu0 %745 }
 0x135   : > { %6644 = vst [vmem:[#allocation95_spill] sm:$0xff] %v3760_v59  ;;  %6645 = vst [vmem:[#allocation96_spill] sm:$0xff] %v3762_v55 }
 0x136   : > { %1052 = vperm.xlu1 %2716, %v3313_v11   ;;  %1064 = vperm.xlu0 %2717, %v3332_v16  }
 0x138   : > { %v3766_v56 = vpop.permute.xlu1 %749  ;;  %v3768_v60 = vpop.permute.xlu0 %753 }
 0x139   : > { %6646 = vst [vmem:[#allocation97_spill] sm:$0xff] %v3766_v56  ;;  %6647 = vst [vmem:[#allocation98_spill] sm:$0xff] %v3768_v60 }
 0x13a   : > { %1060 = vperm.xlu1 %2716, %v3321_v13   ;;  %1072 = vperm.xlu0 %2717, %v3340_v18  }
 0x13c   : > { %v3772_v61 = vpop.permute.xlu1 %757  ;;  %v3774_v54 = vpop.permute.xlu0 %761 }
 0x13d   : > { %6648 = vst [vmem:[#allocation99_spill] sm:$0xff] %v3772_v61  ;;  %6649 = vst [vmem:[#allocation100_spill] sm:$0xff] %v3774_v54 }
 0x13e   : > { %1068 = vperm.xlu1 %2716, %v3329_v15   ;;  %1080 = vperm.xlu0 %2717, %v3348_v20  }
 0x140   : > { %v3778_v55 = vpop.permute.xlu1 %765  ;;  %v3780_v59 = vpop.permute.xlu0 %769 }
 0x141   : > { %6650 = vst [vmem:[#allocation101_spill] sm:$0xff] %v3778_v55  ;;  %6651 = vst [vmem:[#allocation102_spill] sm:$0xff] %v3780_v59 }
 0x142   : > { %1076 = vperm.xlu1 %2716, %v3337_v17   ;;  %1088 = vperm.xlu0 %2717, %v3356_v22  }
 0x144   : > { %v3784_v60 = vpop.permute.xlu1 %773  ;;  %v3786_v56 = vpop.permute.xlu0 %777 }
 0x145   : > { %6652 = vst [vmem:[#allocation103_spill] sm:$0xff] %v3784_v60  ;;  %6653 = vst [vmem:[#allocation104_spill] sm:$0xff] %v3786_v56 }
 0x146   : > { %1084 = vperm.xlu1 %2716, %v3345_v19   ;;  %1096 = vperm.xlu0 %2717, %v3364_v24  }
 0x148   : > { %v3790_v54 = vpop.permute.xlu1 %781  ;;  %v3792_v61 = vpop.permute.xlu0 %785 }
 0x149   : > { %6654 = vst [vmem:[#allocation105_spill] sm:$0xff] %v3790_v54  ;;  %6655 = vst [vmem:[#allocation106_spill] sm:$0xff] %v3792_v61 }
 0x14a   : > { %1092 = vperm.xlu1 %2716, %v3353_v21   ;;  %1104 = vperm.xlu0 %2717, %v3372_v26  }
 0x14c   : > { %v3796_v59 = vpop.permute.xlu1 %789  ;;  %v3798_v55 = vpop.permute.xlu0 %793 }
 0x14d   : > { %6656 = vst [vmem:[#allocation107_spill] sm:$0xff] %v3796_v59  ;;  %6657 = vst [vmem:[#allocation108_spill] sm:$0xff] %v3798_v55 }
 0x14e   : > { %1100 = vperm.xlu1 %2716, %v3361_v23   ;;  %1112 = vperm.xlu0 %2717, %v3380_v28  }
 0x150   : > { %v3802_v56 = vpop.permute.xlu1 %797  ;;  %v3804_v60 = vpop.permute.xlu0 %801 }
 0x151   : > { %6658 = vst [vmem:[#allocation109_spill] sm:$0xff] %v3802_v56  ;;  %6659 = vst [vmem:[#allocation110_spill] sm:$0xff] %v3804_v60 }
 0x152   : > { %1108 = vperm.xlu1 %2716, %v3369_v25   ;;  %1120 = vperm.xlu0 %2717, %v3388_v30  }
 0x154   : > { %v3808_v61 = vpop.permute.xlu1 %805  ;;  %v3810_v54 = vpop.permute.xlu0 %809 }
 0x155   : > { %6660 = vst [vmem:[#allocation111_spill] sm:$0xff] %v3808_v61  ;;  %6661 = vst [vmem:[#allocation112_spill] sm:$0xff] %v3810_v54 }
 0x156   : > { %1116 = vperm.xlu1 %2716, %v3377_v27   ;;  %1128 = vperm.xlu0 %2717, %v3396_v32  }
 0x158   : > { %v3814_v55 = vpop.permute.xlu1 %813  ;;  %v3816_v59 = vpop.permute.xlu0 %817 }
 0x159   : > { %6662 = vst [vmem:[#allocation113_spill] sm:$0xff] %v3814_v55  ;;  %6663 = vst [vmem:[#allocation114_spill] sm:$0xff] %v3816_v59 }
 0x15a   : > { %1124 = vperm.xlu1 %2716, %v3385_v29   ;;  %1136 = vperm.xlu0 %2717, %v3404_v34  }
 0x15c   : > { %v3820_v60 = vpop.permute.xlu1 %821  ;;  %v3822_v56 = vpop.permute.xlu0 %825 }
 0x15d   : > { %6664 = vst [vmem:[#allocation115_spill] sm:$0xff] %v3820_v60  ;;  %6665 = vst [vmem:[#allocation116_spill] sm:$0xff] %v3822_v56 }
 0x15e   : > { %1132 = vperm.xlu1 %2716, %v3393_v31   ;;  %1144 = vperm.xlu0 %2717, %v3412_v36  }
 0x160   : > { %v3826_v54 = vpop.permute.xlu1 %829  ;;  %v3828_v61 = vpop.permute.xlu0 %833 }
 0x161   : > { %6666 = vst [vmem:[#allocation117_spill] sm:$0xff] %v3826_v54  ;;  %6667 = vst [vmem:[#allocation118_spill] sm:$0xff] %v3828_v61 }
 0x162   : > { %1140 = vperm.xlu1 %2716, %v3401_v33   ;;  %1152 = vperm.xlu0 %2717, %v3420_v38  }
 0x164   : > { %v3832_v59 = vpop.permute.xlu1 %837  ;;  %v3834_v55 = vpop.permute.xlu0 %841 }
 0x165   : > { %6668 = vst [vmem:[#allocation119_spill] sm:$0xff] %v3832_v59  ;;  %6669 = vst [vmem:[#allocation120_spill] sm:$0xff] %v3834_v55 }
 0x166   : > { %1148 = vperm.xlu1 %2716, %v3409_v35   ;;  %1160 = vperm.xlu0 %2717, %v3428_v40  }
 0x168   : > { %v3838_v56 = vpop.permute.xlu1 %845  ;;  %v3840_v60 = vpop.permute.xlu0 %849 }
 0x169   : > { %6670 = vst [vmem:[#allocation121_spill] sm:$0xff] %v3838_v56  ;;  %6671 = vst [vmem:[#allocation122_spill] sm:$0xff] %v3840_v60 }
 0x16a   : > { %1156 = vperm.xlu1 %2716, %v3417_v37   ;;  %1168 = vperm.xlu0 %2717, %v3436_v42  }
 0x16c   : > { %v3844_v61 = vpop.permute.xlu1 %853  ;;  %v3846_v54 = vpop.permute.xlu0 %857 }
 0x16d   : > { %6672 = vst [vmem:[#allocation123_spill] sm:$0xff] %v3844_v61  ;;  %6673 = vst [vmem:[#allocation124_spill] sm:$0xff] %v3846_v54 }
 0x16e   : > { %1164 = vperm.xlu1 %2716, %v3425_v39   ;;  %1176 = vperm.xlu0 %2717, %v3444_v44  }
 0x170   : > { %v3850_v55 = vpop.permute.xlu1 %861  ;;  %v3852_v59 = vpop.permute.xlu0 %865 }
 0x171   : > { %6674 = vst [vmem:[#allocation125_spill] sm:$0xff] %v3850_v55  ;;  %6675 = vst [vmem:[#allocation126_spill] sm:$0xff] %v3852_v59 }
 0x172   : > { %1172 = vperm.xlu1 %2716, %v3433_v41   ;;  %1184 = vperm.xlu0 %2717, %v3452_v46  }
 0x174   : > { %v3856_v60 = vpop.permute.xlu1 %869  ;;  %v3858_v56 = vpop.permute.xlu0 %873 }
 0x175   : > { %6676 = vst [vmem:[#allocation127_spill] sm:$0xff] %v3856_v60  ;;  %6677 = vst [vmem:[#allocation128_spill] sm:$0xff] %v3858_v56 }
 0x176   : > { %1180 = vperm.xlu1 %2716, %v3441_v43   ;;  %1192 = vperm.xlu0 %2717, %v3460_v48  }
 0x178   : > { %v3862_v54 = vpop.permute.xlu1 %877  ;;  %v3864_v61 = vpop.permute.xlu0 %881 }
 0x179   : > { %6678 = vst [vmem:[#allocation129_spill] sm:$0xff] %v3862_v54  ;;  %6679 = vst [vmem:[#allocation130_spill] sm:$0xff] %v3864_v61  ;;  %v6685_v54 = vld [vmem:[#allocation13_spill] sm:$0xff] }
 0x17a   : > { %1188 = vperm.xlu1 %2716, %v3449_v45   ;;  %1200 = vperm.xlu0 %2717, %v3468_v50   ;;  %v6688_v50 = vld [vmem:[#allocation10_spill] sm:$0xff] }
 0x17c   : > { %v3868_v59 = vpop.permute.xlu1 %885  ;;  %v3870_v55 = vpop.permute.xlu0 %889 }
 0x17d   : > { %6680 = vst [vmem:[#allocation131_spill] sm:$0xff] %v3868_v59  ;;  %6681 = vst [vmem:[#allocation132_spill] sm:$0xff] %v3870_v55  ;;  %v6689_v59 = vld [vmem:[#allocation15_spill] sm:$0xff] }
 0x17e   : > { %1196 = vperm.xlu1 %2716, %v3457_v47   ;;  %1208 = vperm.xlu0 %2717, %v3476_v52   ;;  %v6692_v52 = vld [vmem:[#allocation12_spill] sm:$0xff] }
 0x180   : > { %v3874_v56 = vpop.permute.xlu1 %893  ;;  %v3876_v60 = vpop.permute.xlu0 %897 }
 0x181   : > { %6682 = vst [vmem:[#allocation133_spill] sm:$0xff] %v3874_v56  ;;  %6683 = vst [vmem:[#allocation134_spill] sm:$0xff] %v3876_v60 }
 0x182   : > { %1204 = vperm.xlu1 %2716, %v6684_v49   ;;  %1216 = vperm.xlu0 %2717, %v6685_v54   ;;  %v6695_v54 = vld [vmem:[#allocation14_spill] sm:$0xff] }
 0x184   : > { %v3880_v61 = vpop.permute.xlu1 %901  ;;  %v3882_v48 = vpop.permute.xlu0 %905 }
 0x185   : > { %6686 = vst [vmem:[#allocation8_spill] sm:$0xff] %v3880_v61  ;;  %6687 = vst [vmem:[#allocation135_spill] sm:$0xff] %v3882_v48 }
 0x186   : > { %1212 = vperm.xlu1 %2716, %v6688_v50   ;;  %1224 = vperm.xlu0 %2717, %v6689_v59  }
 0x188   : > { %v3886_v55 = vpop.permute.xlu1 %909  ;;  %v3888_v46 = vpop.permute.xlu0 %913 }
 0x189   : > { %6690 = vst [vmem:[#allocation10_spill] sm:$0xff] %v3886_v55  ;;  %6691 = vst [vmem:[#allocation15_spill] sm:$0xff] %v3888_v46 }
 0x18a   : > { %1220 = vperm.xlu1 %2716, %v6692_v52   ;;  %1232 = vperm.xlu0 %2717, %v6621_v51   ;;  %v6700_v51 = vld [vmem:[#allocation18_spill] sm:$0xff] }
 0x18c   : > { %v3892_v60 = vpop.permute.xlu1 %917  ;;  %v3894_v56 = vpop.permute.xlu0 %921 }
 0x18d   : > { %6693 = vst [vmem:[#allocation12_spill] sm:$0xff] %v3892_v60  ;;  %6694 = vst [vmem:[#allocation136_spill] sm:$0xff] %v3894_v56 }
 0x18e   : > { %1228 = vperm.xlu1 %2716, %v6695_v54   ;;  %1240 = vperm.xlu0 %2717, %v6625_v53   ;;  %v3179_v53 = vmov 3  }
 0x190   : > { %v3898_v48 = vpop.permute.xlu1 %925  ;;  %v3900_v61 = vpop.permute.xlu0 %929 }
 0x191   : > { %6696 = vst [vmem:[#allocation14_spill] sm:$0xff] %v3898_v48  ;;  %6697 = vst [vmem:[#allocation137_spill] sm:$0xff] %v3900_v61  ;;  %v6850_v48 = vld [vmem:[#allocation72_spill] sm:$0xff] }
 0x192   : > { %1236 = vperm.xlu1 %2716, %v6622_v58   ;;  %1248 = vperm.xlu0 %2717, %v3516_v62  }
 0x194   : > { %v3904_v46 = vpop.permute.xlu1 %933  ;;  %v3906_v55 = vpop.permute.xlu0 %937 }
 0x195   : > { %6698 = vst [vmem:[#allocation138_spill] sm:$0xff] %v3904_v46  ;;  %6699 = vst [vmem:[#allocation139_spill] sm:$0xff] %v3906_v55  ;;  %v6848_v46 = vld [vmem:[#allocation71_spill] sm:$0xff] }
 0x196   : > { %1244 = vperm.xlu1 %2716, %v6700_v51   ;;  %1256 = vperm.xlu0 %2717, %v3524_v0  }
 0x199   : > { %v3910_v56 = vpop.permute.xlu1 %1008  ;;  %v3912_v60 = vpop.permute.xlu0 %1012 }
 0x19a   : > { %6701 = vst [vmem:[#allocation18_spill] sm:$0xff] %v3910_v56  ;;  %6702 = vst [vmem:[#allocation140_spill] sm:$0xff] %v3912_v60  ;;  %1252 = vperm.xlu1 %2716, %v6629_v57   ;;  %2718 = vset.pattern.permute.xlu0 %v3179_v53  ;;  %v6856_v56 = vld [vmem:[#allocation11_spill] sm:$0xff] }
 0x19b   : > { %1331 = vperm.xlu0 %2718, %v3276_v2  }
 0x19d   : > { %v3916_v61 = vpop.permute.xlu1 %1016  ;;  %v3918_v62 = vpop.permute.xlu0 %1024 }
 0x19e   : > { %6703 = vst [vmem:[#allocation141_spill] sm:$0xff] %v3916_v61  ;;  %6704 = vst [vmem:[#allocation142_spill] sm:$0xff] %v3918_v62  ;;  %1260 = vperm.xlu1 %2716, %v3521_v63   ;;  %v6842_v62 = vld [vmem:[#allocation68_spill] sm:$0xff]  ;;  %v6846_v61 = vld [vmem:[#allocation70_spill] sm:$0xff] }
 0x19f   : > { %1343 = vperm.xlu0 %2718, %v3281_v3  }
 0x1a1   : > { %v3922_v55 = vpop.permute.xlu1 %1020  ;;  %v3924_v0 = vpop.permute.xlu0 %1032 }
 0x1a2   : > { %6705 = vst [vmem:[#allocation143_spill] sm:$0xff] %v3922_v55  ;;  %6706 = vst [vmem:[#allocation144_spill] sm:$0xff] %v3924_v0  ;;  %2719 = vset.pattern.permute.xlu1 %v3179_v53  ;;  %v6852_v55 = vld [vmem:[#allocation73_spill] sm:$0xff] }
 0x1a3   : > { %1335 = vperm.xlu1 %2719, %v3284_v4   ;;  %1351 = vperm.xlu0 %2718, %v3289_v5  }
 0x1a5   : > { %v3928_v57 = vpop.permute.xlu1 %1028  ;;  %v3930_v2 = vpop.permute.xlu0 %1040 }
 0x1a6   : > { %6707 = vst [vmem:[#allocation145_spill] sm:$0xff] %v3928_v57  ;;  %6708 = vst [vmem:[#allocation146_spill] sm:$0xff] %v3930_v2  ;;  %v6834_v2 = vld [vmem:[#allocation66_spill] sm:$0xff] }
 0x1a7   : > { %1339 = vperm.xlu1 %2719, %v3273_v1   ;;  %1359 = vperm.xlu0 %2718, %v3297_v7  }
 0x1a9   : > { %v3934_v63 = vpop.permute.xlu1 %1036  ;;  %v3936_v3 = vpop.permute.xlu0 %1048 }
 0x1aa   : > { %6709 = vst [vmem:[#allocation147_spill] sm:$0xff] %v3934_v63  ;;  %6710 = vst [vmem:[#allocation148_spill] sm:$0xff] %v3936_v3  ;;  %v6830_v3 = vld [vmem:[#allocation64_spill] sm:$0xff]  ;;  %v6832_v63 = vld [vmem:[#allocation65_spill] sm:$0xff] }
 0x1ab   : > { %1347 = vperm.xlu1 %2719, %v3292_v6   ;;  %1367 = vperm.xlu0 %2718, %v3305_v9  }
 0x1ad   : > { %v3940_v53 = vpop.permute.xlu1 %1044  ;;  %v3942_v4 = vpop.permute.xlu0 %1056 }
 0x1ae   : > { %6711 = vst [vmem:[#allocation149_spill] sm:$0xff] %v3940_v53  ;;  %6712 = vst [vmem:[#allocation150_spill] sm:$0xff] %v3942_v4 }
 0x1af   : > { %1355 = vperm.xlu1 %2719, %v3300_v8   ;;  %1375 = vperm.xlu0 %2718, %v3313_v11  }
 0x1b1   : > { %v3946_v5 = vpop.permute.xlu1 %1052  ;;  %v3948_v1 = vpop.permute.xlu0 %1064 }
 0x1b2   : > { %6713 = vst [vmem:[#allocation151_spill] sm:$0xff] %v3946_v5  ;;  %6714 = vst [vmem:[#allocation152_spill] sm:$0xff] %v3948_v1  ;;  %v6821_v1 = vld [vmem:[#allocation9_spill] sm:$0xff] }
 0x1b3   : > { %1363 = vperm.xlu1 %2719, %v3308_v10   ;;  %1383 = vperm.xlu0 %2718, %v3321_v13  }
 0x1b5   : > { %v3952_v7 = vpop.permute.xlu1 %1060  ;;  %v3954_v6 = vpop.permute.xlu0 %1072 }
 0x1b6   : > { %6715 = vst [vmem:[#allocation153_spill] sm:$0xff] %v3952_v7  ;;  %6716 = vst [vmem:[#allocation154_spill] sm:$0xff] %v3954_v6  ;;  %v6817_v6 = vld [vmem:[#allocation57_spill] sm:$0xff]  ;;  %v6819_v7 = vld [vmem:[#allocation58_spill] sm:$0xff] }
 0x1b7   : > { %1371 = vperm.xlu1 %2719, %v3316_v12   ;;  %1391 = vperm.xlu0 %2718, %v3329_v15  }
 0x1b9   : > { %v3958_v9 = vpop.permute.xlu1 %1068  ;;  %v3960_v8 = vpop.permute.xlu0 %1080 }
 0x1ba   : > { %6717 = vst [vmem:[#allocation155_spill] sm:$0xff] %v3958_v9  ;;  %6718 = vst [vmem:[#allocation156_spill] sm:$0xff] %v3960_v8  ;;  %v6815_v9 = vld [vmem:[#allocation56_spill] sm:$0xff] }
 0x1bb   : > { %1379 = vperm.xlu1 %2719, %v3324_v14   ;;  %1399 = vperm.xlu0 %2718, %v3337_v17  }
 0x1bd   : > { %v3964_v11 = vpop.permute.xlu1 %1076  ;;  %v3966_v10 = vpop.permute.xlu0 %1088 }
 0x1be   : > { %6719 = vst [vmem:[#allocation157_spill] sm:$0xff] %v3964_v11  ;;  %6720 = vst [vmem:[#allocation158_spill] sm:$0xff] %v3966_v10 }
 0x1bf   : > { %1387 = vperm.xlu1 %2719, %v3332_v16   ;;  %1407 = vperm.xlu0 %2718, %v3345_v19  }
 0x1c1   : > { %v3970_v13 = vpop.permute.xlu1 %1084  ;;  %v3972_v12 = vpop.permute.xlu0 %1096 }
 0x1c2   : > { %6721 = vst [vmem:[#allocation159_spill] sm:$0xff] %v3970_v13  ;;  %6722 = vst [vmem:[#allocation160_spill] sm:$0xff] %v3972_v12 }
 0x1c3   : > { %1395 = vperm.xlu1 %2719, %v3340_v18   ;;  %1415 = vperm.xlu0 %2718, %v3353_v21  }
 0x1c5   : > { %v3976_v15 = vpop.permute.xlu1 %1092  ;;  %v3978_v14 = vpop.permute.xlu0 %1104 }
 0x1c6   : > { %6723 = vst [vmem:[#allocation161_spill] sm:$0xff] %v3976_v15  ;;  %6724 = vst [vmem:[#allocation162_spill] sm:$0xff] %v3978_v14  ;;  %v6802_v14 = vld [vmem:[#allocation49_spill] sm:$0xff]  ;;  %v6804_v15 = vld [vmem:[#allocation50_spill] sm:$0xff] }
 0x1c7   : > { %1403 = vperm.xlu1 %2719, %v3348_v20   ;;  %1423 = vperm.xlu0 %2718, %v3361_v23  }
 0x1c9   : > { %v3982_v17 = vpop.permute.xlu1 %1100  ;;  %v3984_v16 = vpop.permute.xlu0 %1112 }
 0x1ca   : > { %6725 = vst [vmem:[#allocation163_spill] sm:$0xff] %v3982_v17  ;;  %6726 = vst [vmem:[#allocation164_spill] sm:$0xff] %v3984_v16  ;;  %v6801_v17 = vld [vmem:[#allocation48_spill] sm:$0xff] }
 0x1cb   : > { %1411 = vperm.xlu1 %2719, %v3356_v22   ;;  %1431 = vperm.xlu0 %2718, %v3369_v25  }
 0x1cd   : > { %v3988_v19 = vpop.permute.xlu1 %1108  ;;  %v3990_v18 = vpop.permute.xlu0 %1120 }
 0x1ce   : > { %6727 = vst [vmem:[#allocation165_spill] sm:$0xff] %v3988_v19  ;;  %6728 = vst [vmem:[#allocation166_spill] sm:$0xff] %v3990_v18 }
 0x1cf   : > { %1419 = vperm.xlu1 %2719, %v3364_v24   ;;  %1439 = vperm.xlu0 %2718, %v3377_v27  }
 0x1d1   : > { %v3994_v21 = vpop.permute.xlu1 %1116  ;;  %v3996_v20 = vpop.permute.xlu0 %1128 }
 0x1d2   : > { %6729 = vst [vmem:[#allocation167_spill] sm:$0xff] %v3994_v21  ;;  %6730 = vst [vmem:[#allocation168_spill] sm:$0xff] %v3996_v20  ;;  %v6791_v20 = vld [vmem:[#allocation42_spill] sm:$0xff]  ;;  %v6792_v21 = vld [vmem:[#allocation7_spill] sm:$0xff] }
 0x1d3   : > { %1427 = vperm.xlu1 %2719, %v3372_v26   ;;  %1447 = vperm.xlu0 %2718, %v3385_v29  }
 0x1d5   : > { %v4000_v23 = vpop.permute.xlu1 %1124  ;;  %v4002_v22 = vpop.permute.xlu0 %1136 }
 0x1d6   : > { %6731 = vst [vmem:[#allocation169_spill] sm:$0xff] %v4000_v23  ;;  %6732 = vst [vmem:[#allocation170_spill] sm:$0xff] %v4002_v22  ;;  %v6788_v22 = vld [vmem:[#allocation40_spill] sm:$0xff]  ;;  %v6789_v23 = vld [vmem:[#allocation41_spill] sm:$0xff] }
 0x1d7   : > { %1435 = vperm.xlu1 %2719, %v3380_v28   ;;  %1455 = vperm.xlu0 %2718, %v3393_v31  }
 0x1d9   : > { %v4006_v25 = vpop.permute.xlu1 %1132  ;;  %v4008_v24 = vpop.permute.xlu0 %1144 }
 0x1da   : > { %6733 = vst [vmem:[#allocation171_spill] sm:$0xff] %v4006_v25  ;;  %6734 = vst [vmem:[#allocation172_spill] sm:$0xff] %v4008_v24 }
 0x1db   : > { %1443 = vperm.xlu1 %2719, %v3388_v30   ;;  %1463 = vperm.xlu0 %2718, %v3401_v33  }
 0x1dd   : > { %v4012_v27 = vpop.permute.xlu1 %1140  ;;  %v4014_v26 = vpop.permute.xlu0 %1152 }
 0x1de   : > { %6735 = vst [vmem:[#allocation173_spill] sm:$0xff] %v4012_v27  ;;  %6736 = vst [vmem:[#allocation174_spill] sm:$0xff] %v4014_v26 }
 0x1df   : > { %1451 = vperm.xlu1 %2719, %v3396_v32   ;;  %1471 = vperm.xlu0 %2718, %v3409_v35  }
 0x1e1   : > { %v4018_v29 = vpop.permute.xlu1 %1148  ;;  %v4020_v28 = vpop.permute.xlu0 %1160 }
 0x1e2   : > { %6737 = vst [vmem:[#allocation175_spill] sm:$0xff] %v4018_v29  ;;  %6738 = vst [vmem:[#allocation176_spill] sm:$0xff] %v4020_v28  ;;  %v6776_v28 = vld [vmem:[#allocation34_spill] sm:$0xff] }
 0x1e3   : > { %1459 = vperm.xlu1 %2719, %v3404_v34   ;;  %1479 = vperm.xlu0 %2718, %v3417_v37   ;;  %v292_v37 = vlaneseq }
 0x1e5   : > { %v4024_v31 = vpop.permute.xlu1 %1156  ;;  %v4026_v30 = vpop.permute.xlu0 %1168 }
 0x1e6   : > { %6739 = vst [vmem:[#allocation177_spill] sm:$0xff] %v4024_v31  ;;  %6740 = vst [vmem:[#allocation178_spill] sm:$0xff] %v4026_v30  ;;  %v6773_v30 = vld [vmem:[#allocation32_spill] sm:$0xff]  ;;  %v6774_v31 = vld [vmem:[#allocation33_spill] sm:$0xff] }
 0x1e7   : > { %1467 = vperm.xlu1 %2719, %v3412_v36   ;;  %1487 = vperm.xlu0 %2718, %v3425_v39   ;;  %v1909_v36 = vld [vmem:[%s6401_s4] sm:$0x1] }
 0x1e8   : > { %vm1981_vm0 = vcmp.eq.f32.partialorder %v1909_v36, 0.0 }
 0x1e9   : > { %v4030_v33 = vpop.permute.xlu1 %1164  ;;  %v4032_v32 = vpop.permute.xlu0 %1176 }
 0x1ea   : > { %6741 = vst [vmem:[#allocation179_spill] sm:$0xff] %v4030_v33  ;;  %6742 = vst [vmem:[#allocation180_spill] sm:$0xff] %v4032_v32  ;;  %v4049_v33 = vand.u32 127, %v292_v37 }
 0x1eb   : > { %1475 = vperm.xlu1 %2719, %v3420_v38   ;;  %1495 = vperm.xlu0 %2718, %v3433_v41   ;;  %v2112_v38 = vshrl.u32 %v292_v37, 7 }
 0x1ec   : > { %vm295_vm1 = vcmp.lt.s32.totalorder %v4049_v33, 32  ;;  %vm681_vm2 = vcmp.ge.s32.totalorder %v4049_v33, 32  ;;  %vm682_vm3 = vcmp.lt.s32.totalorder %v4049_v33, 64  ;;  %vm1004_vm5 = vcmp.ge.s32.totalorder %v4049_v33, 64 }
 0x1ed   : > { %v4036_v35 = vpop.permute.xlu1 %1172  ;;  %v4038_v34 = vpop.permute.xlu0 %1184  ;;  %vm4323_vm4 = vmand %vm681_vm2, %vm682_vm3  ;;  %v4345_v60 = vsel %vm295_vm1, %v6846_v61, 0.0  ;;  %vm1005_vm6 = vcmp.lt.s32.totalorder %v4049_v33, 96  ;;  %vm1327_vm7 = vcmp.ge.s32.totalorder %v4049_v33, 96 }
 0x1ee   : > { %6743 = vst [vmem:[#allocation181_spill] sm:$0xff] %v4036_v35  ;;  %6744 = vst [vmem:[#allocation182_spill] sm:$0xff] %v4038_v34  ;;  %v6749_v34 = vmov 0  }
 0x1ef   : > { %1483 = vperm.xlu1 %2719, %v3428_v40   ;;  %1503 = vperm.xlu0 %2718, %v3441_v43   ;;  %v2113_v43 = vsub.s32 0, %v2112_v38  ;;  %v2180_v35 = vsel %vm1981_vm0, 1, %v6749_v34  ;;  %6847 = vst [vmem:[#allocation57_spill] sm:$0xff] %v4345_v60  ;;  %vm4579_vm8 = vmand %vm1004_vm5, %vm1005_vm6  ;;  %v7001_v60 = vld [vmem:[#allocation151_spill] sm:$0xff] }
 0x1f1   : > { %v4045_v39 = vpop.permute.xlu1 %1180  ;;  %v4047_v32 = vpop.permute.xlu0 %1192 }
 0x1f2   : > { %6745 = vst [vmem:[#allocation183_spill] sm:$0xff] %v4045_v39  ;;  %6746 = vst [vmem:[#allocation184_spill] sm:$0xff] %v4047_v32 }
 0x1f3   : > { %1491 = vperm.xlu1 %2719, %v3436_v42   ;;  %1511 = vperm.xlu0 %2718, %v3449_v45   ;;  %v4065_v42 = vrot.slane %v1909_v36, %v2113_v43  ;;  %v4067_v45 = vrot.slane %v2180_v35, %v2113_v43  ;;  %v6758_v35 = vld [vmem:[#allocation24_spill] sm:$0xff] }
 0x1f4   : > { %v4089_v36 = vsel %vm295_vm1, %v6758_v35, 0.0  ;;  %v6767_v35 = vld [vmem:[#allocation28_spill] sm:$0xff] }
 0x1f5   : > { %v4053_v41 = vpop.permute.xlu1 %1188  ;;  %v4055_v40 = vpop.permute.xlu0 %1200  ;;  %6752 = vst [vmem:[#allocation189_spill] sm:$0xff] %v4065_v42  ;;  %6753 = vst [vmem:[#allocation190_spill] sm:$0xff] %v4067_v45  ;;  %v6764_v42 = vld [vmem:[#allocation6_spill] sm:$0xff]  ;;  %v4111_v45 = vsel %vm295_vm1, %v6767_v35, 0.0  ;;  %v4131_v35 = vsel %vm295_vm1, %v6773_v30, 0.0  ;;  %v6782_v30 = vld [vmem:[#allocation36_spill] sm:$0xff] }
 0x1f6   : > { %6747 = vst [vmem:[#allocation185_spill] sm:$0xff] %v4053_v41  ;;  %6748 = vst [vmem:[#allocation186_spill] sm:$0xff] %v4055_v40  ;;  %v6754_v41 = vld [vmem:[#allocation21_spill] sm:$0xff]  ;;  %v6756_v40 = vld [vmem:[#allocation22_spill] sm:$0xff]  ;;  %v4155_v24 = vsel %vm295_vm1, %v6782_v30, 0.0  ;;  %v4175_v30 = vsel %vm295_vm1, %v6788_v22, 0.0 }
 0x1f7   : > { %1499 = vperm.xlu1 %2719, %v3444_v44   ;;  %1519 = vperm.xlu0 %2718, %v3457_v47   ;;  %v4072_v38 = vsel %vm295_vm1, %v6754_v41, 0.0  ;;  %v4077_v34 = vsel %vm295_vm1, %v6756_v40, 0.0  ;;  %v6757_v44 = vld [vmem:[#allocation23_spill] sm:$0xff]  ;;  %6759 = vst [vmem:[#allocation22_spill] sm:$0xff] %v4089_v36  ;;  %v6760_v41 = vld [vmem:[#allocation25_spill] sm:$0xff]  ;;  %v6762_v40 = vld [vmem:[#allocation26_spill] sm:$0xff] }
 0x1f8   : > { %6755 = vst [vmem:[#allocation21_spill] sm:$0xff] %v4072_v38  ;;  %v4084_v47 = vsel %vm295_vm1, %v6757_v44, 0.0  ;;  %v4094_v43 = vsel %vm295_vm1, %v6760_v41, 0.0  ;;  %v6765_v44 = vld [vmem:[#allocation27_spill] sm:$0xff]  ;;  %v6768_v41 = vld [vmem:[#allocation29_spill] sm:$0xff]  ;;  %v6795_v22 = vld [vmem:[#allocation44_spill] sm:$0xff] }
 0x1f9   : > { %v4061_v37 = vpop.permute.xlu1 %1196  ;;  %v4063_v32 = vpop.permute.xlu0 %1208  ;;  %6761 = vst [vmem:[#allocation23_spill] sm:$0xff] %v4094_v43  ;;  %v4116_v39 = vsel %vm295_vm1, %v6768_v41, 0.0  ;;  %v4136_v41 = vsel %vm295_vm1, %v6774_v31, 0.0  ;;  %v6783_v31 = vld [vmem:[#allocation37_spill] sm:$0xff]  ;;  %v4197_v19 = vsel %vm295_vm1, %v6795_v22, 0.0  ;;  %v4217_v22 = vsel %vm295_vm1, %v6801_v17, 0.0 }
 0x1fa   : > { %6750 = vst [vmem:[#allocation187_spill] sm:$0xff] %v4061_v37  ;;  %6751 = vst [vmem:[#allocation188_spill] sm:$0xff] %v4063_v32  ;;  %v4099_v32 = vsel %vm295_vm1, %v6762_v40, 0.0  ;;  %v4106_v37 = vsel %vm295_vm1, %v6765_v44, 0.0  ;;  %v6770_v40 = vld [vmem:[#allocation30_spill] sm:$0xff]  ;;  %v4160_v25 = vsel %vm295_vm1, %v6783_v31, 0.0 }
 0x1fb   : > { %6763 = vst [vmem:[#allocation24_spill] sm:$0xff] %v4099_v32  ;;  %1507 = vperm.xlu1 %2719, %v6764_v42   ;;  %1527 = vperm.xlu0 %2718, %v6684_v49   ;;  %6766 = vst [vmem:[#allocation25_spill] sm:$0xff] %v4106_v37  ;;  %v4121_v42 = vsel %vm295_vm1, %v6770_v40, 0.0  ;;  %v6771_v49 = vld [vmem:[#allocation31_spill] sm:$0xff]  ;;  %v4141_v40 = vsel %vm295_vm1, %v6776_v28, 0.0  ;;  %v6785_v28 = vld [vmem:[#allocation38_spill] sm:$0xff] }
 0x1fc   : > { %6769 = vst [vmem:[#allocation26_spill] sm:$0xff] %v4116_v39  ;;  %v4126_v44 = vsel %vm295_vm1, %v6771_v49, 0.0  ;;  %6775 = vst [vmem:[#allocation27_spill] sm:$0xff] %v4136_v41  ;;  %v6780_v49 = vld [vmem:[#allocation35_spill] sm:$0xff]  ;;  %v4180_v31 = vsel %vm295_vm1, %v6789_v23, 0.0  ;;  %v6796_v23 = vld [vmem:[#allocation45_spill] sm:$0xff] }
 0x1fd   : > { %6772 = vst [vmem:[#allocation6_spill] sm:$0xff] %v4126_v44  ;;  %6777 = vst [vmem:[#allocation28_spill] sm:$0xff] %v4141_v40  ;;  %v4143_v29 = vpop.permute.xlu1 %1204  ;;  %v4145_v26 = vpop.permute.xlu0 %1216  ;;  %v4150_v27 = vsel %vm295_vm1, %v6780_v49, 0.0  ;;  %v4202_v16 = vsel %vm295_vm1, %v6796_v23, 0.0  ;;  %v4222_v23 = vsel %vm295_vm1, %v6802_v14, 0.0  ;;  %v6809_v17 = vld [vmem:[#allocation52_spill] sm:$0xff] }
 0x1fe   : > { %6778 = vst [vmem:[#allocation29_spill] sm:$0xff] %v4143_v29  ;;  %6779 = vst [vmem:[#allocation30_spill] sm:$0xff] %v4145_v26  ;;  %v4165_v29 = vsel %vm295_vm1, %v6785_v28, 0.0  ;;  %v6786_v26 = vld [vmem:[#allocation39_spill] sm:$0xff]  ;;  %v4185_v28 = vsel %vm295_vm1, %v6791_v20, 0.0  ;;  %v6798_v20 = vld [vmem:[#allocation46_spill] sm:$0xff] }
 0x1ff   : > { %6781 = vst [vmem:[#allocation31_spill] sm:$0xff] %v4150_v27  ;;  %6784 = vst [vmem:[#allocation32_spill] sm:$0xff] %v4160_v25  ;;  %v4170_v49 = vsel %vm295_vm1, %v6786_v26, 0.0  ;;  %1515 = vperm.xlu1 %2719, %v6792_v21   ;;  %1535 = vperm.xlu0 %2718, %v6688_v50   ;;  %v6793_v26 = vld [vmem:[#allocation43_spill] sm:$0xff]  ;;  %v4207_v21 = vsel %vm295_vm1, %v6798_v20, 0.0  ;;  %v4227_v20 = vsel %vm295_vm1, %v6804_v15, 0.0 }
 0x200   : > { %6787 = vst [vmem:[#allocation33_spill] sm:$0xff] %v4170_v49  ;;  %6790 = vst [vmem:[#allocation34_spill] sm:$0xff] %v4180_v31  ;;  %v4192_v18 = vsel %vm295_vm1, %v6793_v26, 0.0  ;;  %v6799_v50 = vld [vmem:[#allocation47_spill] sm:$0xff]  ;;  %v4241_v11 = vsel %vm295_vm1, %v6809_v17, 0.0  ;;  %v6810_v14 = vld [vmem:[#allocation53_spill] sm:$0xff] }
 0x201   : > { %6794 = vst [vmem:[#allocation35_spill] sm:$0xff] %v4192_v18  ;;  %6797 = vst [vmem:[#allocation36_spill] sm:$0xff] %v4202_v16  ;;  %v4212_v26 = vsel %vm295_vm1, %v6799_v50, 0.0  ;;  %v4229_v12 = vpop.permute.xlu1 %1212  ;;  %v4231_v13 = vpop.permute.xlu0 %1224  ;;  %v6807_v50 = vld [vmem:[#allocation51_spill] sm:$0xff]  ;;  %v4246_v8 = vsel %vm295_vm1, %v6810_v14, 0.0  ;;  %v6812_v15 = vld [vmem:[#allocation54_spill] sm:$0xff] }
 0x202   : > { %6800 = vst [vmem:[#allocation37_spill] sm:$0xff] %v4212_v26  ;;  %6803 = vst [vmem:[#allocation38_spill] sm:$0xff] %v4222_v23  ;;  %v4236_v10 = vsel %vm295_vm1, %v6807_v50, 0.0  ;;  %v4261_v17 = vsel %vm295_vm1, %v6815_v9, 0.0  ;;  %v4266_v14 = vsel %vm295_vm1, %v6817_v6, 0.0  ;;  %v6824_v9 = vld [vmem:[#allocation60_spill] sm:$0xff] }
 0x203   : > { %6805 = vst [vmem:[#allocation39_spill] sm:$0xff] %v4229_v12  ;;  %6806 = vst [vmem:[#allocation40_spill] sm:$0xff] %v4231_v13  ;;  %v4251_v12 = vsel %vm295_vm1, %v6812_v15, 0.0  ;;  %v6813_v13 = vld [vmem:[#allocation55_spill] sm:$0xff]  ;;  %v4271_v15 = vsel %vm295_vm1, %v6819_v7, 0.0  ;;  %1523 = vperm.xlu1 %2719, %v6821_v1   ;;  %1543 = vperm.xlu0 %2718, %v6692_v52   ;;  %v4283_v4 = vsel %vm295_vm1, %v6824_v9, 0.0 }
 0x204   : > { %6808 = vst [vmem:[#allocation41_spill] sm:$0xff] %v4236_v10  ;;  %6811 = vst [vmem:[#allocation42_spill] sm:$0xff] %v4246_v8  ;;  %v4256_v50 = vsel %vm295_vm1, %v6813_v13, 0.0  ;;  %v6822_v13 = vld [vmem:[#allocation59_spill] sm:$0xff]  ;;  %v6825_v6 = vld [vmem:[#allocation61_spill] sm:$0xff]  ;;  %v4303_v9 = vsel %vm295_vm1, %v6830_v3, 0.0 }
 0x205   : > { %6814 = vst [vmem:[#allocation7_spill] sm:$0xff] %v4256_v50  ;;  %6816 = vst [vmem:[#allocation43_spill] sm:$0xff] %v4261_v17  ;;  %v4278_v5 = vsel %vm295_vm1, %v6822_v13, 0.0  ;;  %v4288_v53 = vsel %vm295_vm1, %v6825_v6, 0.0  ;;  %v6827_v7 = vld [vmem:[#allocation62_spill] sm:$0xff]  ;;  %v6828_v52 = vld [vmem:[#allocation63_spill] sm:$0xff]  ;;  %v4315_v57 = vpop.permute.xlu1 %1220  ;;  %v4317_v0 = vpop.permute.xlu0 %1232  ;;  %v4632_v50 = vstv %s1650_s14 }
 0x206   : > { %6818 = vst [vmem:[#allocation44_spill] sm:$0xff] %v4266_v14  ;;  %6820 = vst [vmem:[#allocation45_spill] sm:$0xff] %v4271_v15  ;;  %v4293_v1 = vsel %vm295_vm1, %v6827_v7, 0.0  ;;  %v4298_v13 = vsel %vm295_vm1, %v6828_v52, 0.0  ;;  %v4308_v6 = vsel %vm295_vm1, %v6832_v63, 0.0  ;;  %v4313_v7 = vsel %vm295_vm1, %v6834_v2, 0.0 }
 0x207   : > { %6823 = vst [vmem:[#allocation46_spill] sm:$0xff] %v4278_v5  ;;  %6826 = vst [vmem:[#allocation47_spill] sm:$0xff] %v4288_v53  ;;  %v6840_v52 = vld [vmem:[#allocation67_spill] sm:$0xff]  ;;  %v4335_v2 = vsel %vm295_vm1, %v6842_v62, 0.0  ;;  %v4355_v62 = vsel %vm295_vm1, %v6850_v48, 0.0  ;;  %1531 = vperm.xlu1 %2719, %v6856_v56   ;;  %1551 = vperm.xlu0 %2718, %v6695_v54   ;;  %v6863_v54 = vld [vmem:[#allocation78_spill] sm:$0xff] }
 0x208   : > { %6829 = vst [vmem:[#allocation48_spill] sm:$0xff] %v4298_v13  ;;  %6831 = vst [vmem:[#allocation49_spill] sm:$0xff] %v4303_v9  ;;  %v4330_v63 = vsel %vm295_vm1, %v6840_v52, 0.0  ;;  %v4350_v52 = vsel %vm295_vm1, %v6848_v46, 0.0  ;;  %v6857_v46 = vld [vmem:[#allocation75_spill] sm:$0xff]  ;;  %v6875_v36 = vld [vmem:[#allocation85_spill] sm:$0xff] }
 0x209   : > { %6833 = vst [vmem:[#allocation50_spill] sm:$0xff] %v4308_v6  ;;  %6835 = vst [vmem:[#allocation51_spill] sm:$0xff] %v4313_v7  ;;  %v4374_v48 = vsel %vm295_vm1, %v6857_v46, 0.0  ;;  %v6881_v32 = vld [vmem:[#allocation89_spill] sm:$0xff]  ;;  %v6888_v39 = vld [vmem:[#allocation95_spill] sm:$0xff] }
 0x20a   : > { %6836 = vst [vmem:[#allocation52_spill] sm:$0xff] %v4315_v57  ;;  %6837 = vst [vmem:[#allocation53_spill] sm:$0xff] %v4317_v0  ;;  %v6844_v57 = vld [vmem:[#allocation69_spill] sm:$0xff]  ;;  %v6900_v25 = vld [vmem:[#allocation103_spill] sm:$0xff] }
 0x20b   : > { %6841 = vst [vmem:[#allocation54_spill] sm:$0xff] %v4330_v63  ;;  %6843 = vst [vmem:[#allocation55_spill] sm:$0xff] %v4335_v2  ;;  %v4340_v0 = vsel %vm295_vm1, %v6844_v57, 0.0  ;;  %v4360_v57 = vsel %vm295_vm1, %v6852_v55, 0.0  ;;  %v6859_v55 = vld [vmem:[#allocation76_spill] sm:$0xff]  ;;  %v6882_v43 = vld [vmem:[#allocation13_spill] sm:$0xff]  ;;  %1559 = vperm.xlu0 %2718, %v6622_v58  }
 0x20c   : > { %6845 = vst [vmem:[#allocation56_spill] sm:$0xff] %v4340_v0  ;;  %6849 = vst [vmem:[#allocation58_spill] sm:$0xff] %v4350_v52  ;;  %v6854_v0 = vld [vmem:[#allocation74_spill] sm:$0xff]  ;;  %v6865_v52 = vld [vmem:[#allocation79_spill] sm:$0xff]  ;;  %1539 = vperm.xlu1 %2719, %v6882_v43  }
 0x20d   : > { %6851 = vst [vmem:[#allocation9_spill] sm:$0xff] %v4355_v62  ;;  %6853 = vst [vmem:[#allocation59_spill] sm:$0xff] %v4360_v57  ;;  %v4365_v61 = vsel %vm295_vm1, %v6854_v0, 0.0  ;;  %v4379_v57 = vsel %vm295_vm1, %v6859_v55, 0.0  ;;  %v6861_v0 = vld [vmem:[#allocation77_spill] sm:$0xff]  ;;  %v4394_v46 = vsel %vm295_vm1, %v6865_v52, 0.0  ;;  %v4411_v62 = vpop.permute.xlu0 %1240 }
 0x20e   : > { %6855 = vst [vmem:[#allocation60_spill] sm:$0xff] %v4365_v61  ;;  %6858 = vst [vmem:[#allocation61_spill] sm:$0xff] %v4374_v48  ;;  %v4384_v56 = vsel %vm295_vm1, %v6861_v0, 0.0  ;;  %v4389_v61 = vsel %vm295_vm1, %v6863_v54, 0.0  ;;  %v6867_v48 = vld [vmem:[#allocation80_spill] sm:$0xff]  ;;  %v6873_v52 = vld [vmem:[#allocation83_spill] sm:$0xff] }
 0x20f   : > { %6860 = vst [vmem:[#allocation62_spill] sm:$0xff] %v4379_v57  ;;  %6862 = vst [vmem:[#allocation63_spill] sm:$0xff] %v4384_v56  ;;  %v4399_v55 = vsel %vm295_vm1, %v6867_v48, 0.0  ;;  %v6870_v56 = vld [vmem:[#allocation82_spill] sm:$0xff]  ;;  %v6877_v57 = vld [vmem:[#allocation17_spill] sm:$0xff]  ;;  %1567 = vperm.xlu0 %2718, %v6700_v51  }
 0x210   : > { %6864 = vst [vmem:[#allocation64_spill] sm:$0xff] %v4389_v61  ;;  %6866 = vst [vmem:[#allocation65_spill] sm:$0xff] %v4394_v46  ;;  %v4409_v61 = vpop.permute.xlu1 %1228  ;;  %v6874_v46 = vld [vmem:[#allocation84_spill] sm:$0xff]  ;;  %v6879_v48 = vld [vmem:[#allocation87_spill] sm:$0xff]  ;;  %1547 = vperm.xlu1 %2719, %v6689_v59   ;;  %v6934_v14 = vsel %vm4323_vm4, %v6870_v56, %v4077_v34 }
 0x211   : > { %6868 = vst [vmem:[#allocation66_spill] sm:$0xff] %v4399_v55  ;;  %6871 = vst [vmem:[#allocation67_spill] sm:$0xff] %v4409_v61  ;;  %v4434_v55 = vsel %vm295_vm1, %v6877_v57, 0.0  ;;  %v6884_v61 = vld [vmem:[#allocation91_spill] sm:$0xff]  ;;  %v6886_v43 = vld [vmem:[#allocation93_spill] sm:$0xff]  ;;  %v4485_v40 = vpop.permute.xlu0 %1248  ;;  %v6961_v9 = vsel %vm4323_vm4, %v6874_v46, %v4084_v47 }
 0x212   : > { %6872 = vst [vmem:[#allocation68_spill] sm:$0xff] %v4411_v62  ;;  %6878 = vst [vmem:[#allocation69_spill] sm:$0xff] %v4434_v55  ;;  %v6890_v44 = vld [vmem:[#allocation97_spill] sm:$0xff]  ;;  %v6893_v0 = vld [vmem:[#allocation98_spill] sm:$0xff] }
 0x213   : > { %6892 = vst [vmem:[#allocation71_spill] sm:$0xff] %v4485_v40  ;;  %v6894_v54 = vld [vmem:[#allocation99_spill] sm:$0xff]  ;;  %v6896_v58 = vld [vmem:[#allocation101_spill] sm:$0xff]  ;;  %v6901_v49 = vld [vmem:[#allocation104_spill] sm:$0xff] }
 0x214   : > { %v4483_v37 = vpop.permute.xlu1 %1236  ;;  %v6904_v27 = vld [vmem:[#allocation107_spill] sm:$0xff]  ;;  %v6906_v51 = vld [vmem:[#allocation109_spill] sm:$0xff]  ;;  %v3104_v17 = vld [vmem:[%s3270_s10 + $0x1c0] sm:$0xff] }
 0x215   : > { %6891 = vst [vmem:[#allocation70_spill] sm:$0xff] %v4483_v37  ;;  %v6897_v37 = vld [vmem:[#allocation16_spill] sm:$0xff]  ;;  %v6908_v16 = vld [vmem:[#allocation111_spill] sm:$0xff]  ;;  %v4556_v62 = vpop.permute.xlu0 %1256  ;;  %v6912_v40 = vld [vmem:[#allocation113_spill] sm:$0xff]  ;;  %1555 = vperm.xlu1 %2719, %v3104_v17  }
 0x216   : > { %v4506_v57 = vsel %vm295_vm1, %v6897_v37, 0.0  ;;  %v6902_v37 = vld [vmem:[#allocation105_spill] sm:$0xff]  ;;  %6911 = vst [vmem:[#allocation74_spill] sm:$0xff] %v4556_v62  ;;  %v6918_v10 = vld [vmem:[#allocation19_spill] sm:$0xff]  ;;  %v6921_v62 = vld [vmem:[#allocation118_spill] sm:$0xff] }
 0x217   : > { %6898 = vst [vmem:[#allocation72_spill] sm:$0xff] %v4506_v57  ;;  %v4586_v41 = vsel %vm295_vm1, %v6918_v10, 0.0  ;;  %v6920_v59 = vld [vmem:[#allocation117_spill] sm:$0xff]  ;;  %v3105_v18 = vld [vmem:[%s3270_s10 + $0x1e8] sm:$0xff]  ;;  %v3108_v46 = vld [vmem:[%s3270_s10 + $0x1e0] sm:$0xff] }
 0x218   : > { %v4554_v26 = vpop.permute.xlu1 %1244  ;;  %6919 = vst [vmem:[#allocation11_spill] sm:$0xff] %v4586_v41  ;;  %1575 = vperm.xlu0 %2718, %v3105_v18   ;;  %v6924_v8 = vld [vmem:[#allocation121_spill] sm:$0xff]  ;;  %v6926_v23 = vld [vmem:[#allocation123_spill] sm:$0xff]  ;;  %v6967_v57 = vld [vmem:[#allocation20_spill] sm:$0xff] }
 0x219   : > { %6910 = vst [vmem:[#allocation73_spill] sm:$0xff] %v4554_v26  ;;  %v6922_v26 = vld [vmem:[#allocation119_spill] sm:$0xff]  ;;  %v1332_v38 = vpop.permute.xlu0 %1331  ;;  %v6936_v10 = vld [vmem:[#allocation81_spill] sm:$0xff]  ;;  %v6968_v17 = vld [vmem:[#allocation22_spill] sm:$0xff] }
 0x21a   : > { %v4657_v2 = vsel %vm295_vm1, %v6936_v10, 0.0  ;;  %v6962_v18 = vld [vmem:[#allocation143_spill] sm:$0xff]  ;;  %v6969_v10 = vsel %vm4323_vm4, %v6967_v57, %v6968_v17  ;;  %v6970_v55 = vld [vmem:[#allocation140_spill] sm:$0xff]  ;;  %v7114_v5 = vld [vmem:[#allocation185_spill] sm:$0xff] }
 0x21b   : > { %6937 = vst [vmem:[#allocation76_spill] sm:$0xff] %v4657_v2  ;;  %v1264_v13 = vsel %vm4579_vm8, %v6970_v55, %v6969_v10  ;;  %v6974_v57 = vld [vmem:[#allocation24_spill] sm:$0xff]  ;;  %v6976_v55 = vld [vmem:[#allocation142_spill] sm:$0xff]  ;;  %v6977_v10 = vsel %vm4323_vm4, %v6879_v48, %v4111_v45  ;;  %v7107_v15 = vld [vmem:[#allocation55_spill] sm:$0xff] }
 0x21c   : > { %v4630_v53 = vpop.permute.xlu1 %1252  ;;  %v6975_v17 = vsel %vm4323_vm4, %v6875_v36, %v6974_v57  ;;  %v6982_v36 = vld [vmem:[#allocation145_spill] sm:$0xff]  ;;  %v6984_v45 = vld [vmem:[#allocation146_spill] sm:$0xff] }
 0x21d   : > { %6930 = vst [vmem:[#allocation75_spill] sm:$0xff] %v4630_v53  ;;  %v6935_v53 = vld [vmem:[#allocation18_spill] sm:$0xff]  ;;  %v1344_v34 = vpop.permute.xlu0 %1343 }
 0x21e   : > { %v1263_v6 = vsel %vm4579_vm8, %v6935_v53, %v6934_v14  ;;  %v3106_v53 = vld [vmem:[%s3270_s10 + $0x1d0] sm:$0xff]  ;;  %v3107_v14 = vld [vmem:[%s3270_s10 + $0x1f8] sm:$0xff] }
 0x21f   : > { %v1586_v56 = vsel %vm1327_vm7, %v1332_v38, %v1263_v6  ;;  %1563 = vperm.xlu1 %2719, %v3106_v53   ;;  %1583 = vperm.xlu0 %2718, %v3107_v14   ;;  %v6973_v14 = vld [vmem:[#allocation141_spill] sm:$0xff]  ;;  %v7074_v53 = vld [vmem:[#allocation175_spill] sm:$0xff] }
 0x220   : > { %v4684_v38 = vmul.f32 %v4632_v50, %v1586_v56  ;;  %v4702_v63 = vpop.permute.xlu1 %1260  ;;  %v1266_v56 = vsel %vm4579_vm8, %v6962_v18, %v6961_v9 }
 0x221   : > { %6956 = vst [vmem:[#allocation77_spill] sm:$0xff] %v4702_v63  ;;  %v1589_v9 = vsel %vm1327_vm7, %v1344_v34, %v1266_v56  ;;  %v6971_v56 = vld [vmem:[#allocation21_spill] sm:$0xff] }
 0x222   : > { %v1716_v63 = vmul.f32 1.442695, %v4684_v38  ;;  %v4749_v34 = vmul.f32 %v4632_v50, %v1589_v9  ;;  %v6978_v9 = vld [vmem:[#allocation144_spill] sm:$0xff] }
 0x223   : > { %1571 = vperm.xlu1 %2719, %v3108_v46   ;;  %v6972_v46 = vsel %vm4323_vm4, %v6873_v52, %v6971_v56  ;;  %v4775_v52 = vsel %vm4579_vm8, %v6978_v9, %v6977_v10  ;;  %v6980_v56 = vld [vmem:[#allocation23_spill] sm:$0xff]  ;;  %v6986_v10 = vld [vmem:[#allocation25_spill] sm:$0xff] }
 0x224   : > { %2720 = vpow2.f32 %v1716_v63  ;;  %v1265_v47 = vsel %vm4579_vm8, %v6973_v14, %v6972_v46  ;;  %v1267_v63 = vsel %vm4579_vm8, %v6976_v55, %v6975_v17  ;;  %v6979_v14 = vld [vmem:[#allocation86_spill] sm:$0xff]  ;;  %v6983_v17 = vsel %vm4323_vm4, %v6881_v32, %v4121_v42  ;;  %v6985_v55 = vld [vmem:[#allocation88_spill] sm:$0xff] }
 0x225   : > { %v6981_v46 = vsel %vm4323_vm4, %v6979_v14, %v6980_v56  ;;  %v4793_v48 = vsel %vm4579_vm8, %v6984_v45, %v6983_v17  ;;  %v6987_v9 = vsel %vm4323_vm4, %v6985_v55, %v6986_v10  ;;  %v6988_v14 = vld [vmem:[#allocation147_spill] sm:$0xff]  ;;  %v6990_v32 = vld [vmem:[#allocation148_spill] sm:$0xff]  ;;  %v1336_v17 = vpop.permute.xlu1 %1335  ;;  %v1352_v45 = vpop.permute.xlu0 %1351  ;;  %v6991_v55 = vld [vmem:[#allocation90_spill] sm:$0xff] }
 0x226   : > { %v1268_v57 = vsel %vm4579_vm8, %v6982_v36, %v6981_v46  ;;  %v1270_v56 = vsel %vm4579_vm8, %v6988_v14, %v6987_v9  ;;  %v6989_v46 = vsel %vm4323_vm4, %v6884_v61, %v4131_v35  ;;  %v1722_v36 = vmul.f32 1.442695, %v4749_v34  ;;  %v6992_v10 = vld [vmem:[#allocation26_spill] sm:$0xff]  ;;  %v6994_v9 = vld [vmem:[#allocation149_spill] sm:$0xff]  ;;  %v6995_v35 = vld [vmem:[#allocation28_spill] sm:$0xff] }
 0x227   : > { %v4811_v42 = vsel %vm4579_vm8, %v6990_v32, %v6989_v46  ;;  %v6993_v41 = vsel %vm4323_vm4, %v6991_v55, %v6992_v10  ;;  %v6996_v61 = vsel %vm4323_vm4, %v6886_v43, %v6995_v35  ;;  %v6997_v46 = vld [vmem:[#allocation150_spill] sm:$0xff]  ;;  %v1587_v18 = vsel %vm1327_vm7, %v1336_v17, %v1264_v13  ;;  %v3109_v10 = vld [vmem:[%s3270_s10 + $0x1f0] sm:$0xff] }
 0x228   : > { %v1272_v14 = vsel %vm4579_vm8, %v6994_v9, %v6993_v41  ;;  %v4830_v32 = vsel %vm4579_vm8, %v6997_v46, %v6996_v61  ;;  %v1591_v55 = vsel %vm1327_vm7, %v1352_v45, %v1268_v57  ;;  %1579 = vperm.xlu1 %2719, %v3109_v10   ;;  %v6998_v41 = vld [vmem:[#allocation92_spill] sm:$0xff]  ;;  %v6999_v9 = vld [vmem:[#allocation6_spill] sm:$0xff]  ;;  %2722 = vpow2.f32 %v1722_v36  ;;  %v7011_v10 = vld [vmem:[#allocation31_spill] sm:$0xff] }
 0x229   : > { %v7000_v2 = vsel %vm4323_vm4, %v6998_v41, %v6999_v9  ;;  %v4846_v35 = vmul.f32 %v4632_v50, %v1587_v18  ;;  %v4849_v13 = vmul.f32 %v4632_v50, %v1591_v55  ;;  %v7002_v57 = vsel %vm4323_vm4, %v6888_v39, %v4155_v24  ;;  %v7003_v17 = vld [vmem:[#allocation152_spill] sm:$0xff]  ;;  %v7007_v18 = vld [vmem:[#allocation153_spill] sm:$0xff]  ;;  %v7009_v39 = vld [vmem:[#allocation154_spill] sm:$0xff] }
 0x22a   : > { %v1274_v43 = vsel %vm4579_vm8, %v7001_v60, %v7000_v2  ;;  %v4859_v45 = vsel %vm4579_vm8, %v7003_v17, %v7002_v57  ;;  %v7004_v60 = vld [vmem:[#allocation94_spill] sm:$0xff]  ;;  %v7005_v2 = vld [vmem:[#allocation27_spill] sm:$0xff]  ;;  %v7008_v24 = vsel %vm4323_vm4, %v6890_v44, %v4165_v29  ;;  %v7010_v55 = vld [vmem:[#allocation96_spill] sm:$0xff]  ;;  %v7014_v29 = vsel %vm4323_vm4, %v6894_v54, %v4175_v30  ;;  %v1340_v30 = vpop.permute.xlu1 %1339  ;;  %v1360_v54 = vpop.permute.xlu0 %1359 }
 0x22b   : > { %v7006_v36 = vsel %vm4323_vm4, %v7004_v60, %v7005_v2  ;;  %v4879_v46 = vsel %vm4579_vm8, %v7009_v39, %v7008_v24  ;;  %v7012_v41 = vsel %vm4323_vm4, %v7010_v55, %v7011_v10  ;;  %v7013_v9 = vld [vmem:[#allocation155_spill] sm:$0xff]  ;;  %v7015_v44 = vld [vmem:[#allocation156_spill] sm:$0xff]  ;;  %v1718_v24 = vmul.f32 1.442695, %v4846_v35  ;;  %v7020_v10 = vld [vmem:[#allocation158_spill] sm:$0xff] }
 0x22c   : > { %v4869_v61 = vsel %vm4579_vm8, %v7007_v18, %v7006_v36  ;;  %v4889_v57 = vsel %vm4579_vm8, %v7013_v9, %v7012_v41  ;;  %v4899_v17 = vsel %vm4579_vm8, %v7015_v44, %v7014_v29  ;;  %v7016_v60 = vld [vmem:[#allocation32_spill] sm:$0xff]  ;;  %v7018_v36 = vld [vmem:[#allocation157_spill] sm:$0xff]  ;;  %v1726_v39 = vmul.f32 1.442695, %v4849_v13  ;;  %v7024_v44 = vld [vmem:[#allocation159_spill] sm:$0xff] }
 0x22d   : > { %v7017_v2 = vsel %vm4323_vm4, %v6893_v0, %v7016_v60  ;;  %v7019_v55 = vsel %vm4323_vm4, %v6896_v58, %v4185_v28  ;;  %v7021_v41 = vld [vmem:[#allocation100_spill] sm:$0xff]  ;;  %v7022_v9 = vld [vmem:[#allocation33_spill] sm:$0xff]  ;;  %v1593_v28 = vsel %vm1327_vm7, %v1360_v54, %v1270_v56  ;;  %v7025_v58 = vsel %vm4323_vm4, %v6900_v25, %v4197_v19  ;;  %v7028_v56 = vld [vmem:[#allocation34_spill] sm:$0xff] }
 0x22e   : > { %v4909_v18 = vsel %vm4579_vm8, %v7018_v36, %v7017_v2  ;;  %v4921_v0 = vsel %vm4579_vm8, %v7020_v10, %v7019_v55  ;;  %v7023_v29 = vsel %vm4323_vm4, %v7021_v41, %v7022_v9  ;;  %v1588_v2 = vsel %vm1327_vm7, %v1340_v30, %v1265_v47  ;;  %v7026_v36 = vld [vmem:[#allocation160_spill] sm:$0xff]  ;;  %v7027_v47 = vld [vmem:[#allocation102_spill] sm:$0xff]  ;;  %v7030_v54 = vld [vmem:[#allocation161_spill] sm:$0xff] }
 0x22f   : > { %v4931_v60 = vsel %vm4579_vm8, %v7024_v44, %v7023_v29  ;;  %v4945_v55 = vsel %vm4579_vm8, %v7026_v36, %v7025_v58  ;;  %2724 = vpow2.f32 %v1718_v24  ;;  %v4948_v10 = vmul.f32 %v4632_v50, %v1588_v2  ;;  %v7032_v24 = vld [vmem:[#allocation162_spill] sm:$0xff]  ;;  %v7033_v29 = vld [vmem:[#allocation35_spill] sm:$0xff] }
 0x230   : > { %v4951_v41 = vmul.f32 %v4632_v50, %v1593_v28  ;;  %v7029_v30 = vsel %vm4323_vm4, %v7027_v47, %v7028_v56  ;;  %v7031_v25 = vsel %vm4323_vm4, %v6902_v37, %v4207_v21  ;;  %v7034_v44 = vsel %vm4323_vm4, %v6901_v49, %v7033_v29  ;;  %v7035_v2 = vld [vmem:[#allocation163_spill] sm:$0xff]  ;;  %v7037_v37 = vld [vmem:[#allocation164_spill] sm:$0xff]  ;;  %v7038_v36 = vld [vmem:[#allocation106_spill] sm:$0xff] }
 0x231   : > { %v4961_v19 = vsel %vm4579_vm8, %v7030_v54, %v7029_v30  ;;  %v4971_v9 = vsel %vm4579_vm8, %v7032_v24, %v7031_v25  ;;  %v4981_v28 = vsel %vm4579_vm8, %v7035_v2, %v7034_v44  ;;  %2726 = vpow2.f32 %v1726_v39  ;;  %v7039_v49 = vld [vmem:[#allocation36_spill] sm:$0xff]  ;;  %v7041_v56 = vld [vmem:[#allocation165_spill] sm:$0xff]  ;;  %v7043_v24 = vld [vmem:[#allocation166_spill] sm:$0xff] }
 0x232   : > { %v7036_v21 = vsel %vm4323_vm4, %v6904_v27, %v4217_v22  ;;  %v7040_v47 = vsel %vm4323_vm4, %v7038_v36, %v7039_v49  ;;  %v1720_v39 = vmul.f32 1.442695, %v4948_v10  ;;  %v1730_v54 = vmul.f32 1.442695, %v4951_v41  ;;  %v1348_v27 = vpop.permute.xlu1 %1347  ;;  %v1368_v22 = vpop.permute.xlu0 %1367  ;;  %v7044_v44 = vld [vmem:[#allocation108_spill] sm:$0xff]  ;;  %v7045_v2 = vld [vmem:[#allocation37_spill] sm:$0xff] }
 0x233   : > { %v4991_v58 = vsel %vm4579_vm8, %v7037_v37, %v7036_v21  ;;  %v5001_v30 = vsel %vm4579_vm8, %v7041_v56, %v7040_v47  ;;  %v7042_v25 = vsel %vm4323_vm4, %v6906_v51, %v4227_v20  ;;  %v7046_v21 = vsel %vm4323_vm4, %v7044_v44, %v7045_v2  ;;  %v7047_v37 = vld [vmem:[#allocation167_spill] sm:$0xff]  ;;  %v7049_v47 = vld [vmem:[#allocation168_spill] sm:$0xff]  ;;  %v7053_v44 = vld [vmem:[#allocation169_spill] sm:$0xff] }
 0x234   : > { %v5013_v29 = vsel %vm4579_vm8, %v7043_v24, %v7042_v25  ;;  %v5023_v36 = vsel %vm4579_vm8, %v7047_v37, %v7046_v21  ;;  %v1590_v49 = vsel %vm1327_vm7, %v1348_v27, %v1267_v63  ;;  %v1595_v20 = vsel %vm1327_vm7, %v1368_v22, %v1272_v14  ;;  %v2721_v63 = vpop.eup %2720  ;;  %v7050_v14 = vld [vmem:[#allocation110_spill] sm:$0xff]  ;;  %v7056_v21 = vld [vmem:[#allocation112_spill] sm:$0xff]  ;;  %v7057_v37 = vld [vmem:[#allocation41_spill] sm:$0xff] }
 0x235   : > { %v7048_v51 = vsel %vm4323_vm4, %v6908_v16, %v4241_v11  ;;  %2728 = vpow2.f32 %v1720_v39  ;;  %v5040_v25 = vmul.f32 %v4632_v50, %v1590_v49  ;;  %v5043_v24 = vmul.f32 %v4632_v50, %v1595_v20  ;;  %v7051_v27 = vld [vmem:[#allocation38_spill] sm:$0xff]  ;;  %v7059_v20 = vld [vmem:[#allocation171_spill] sm:$0xff] }
 0x236   : > { %v5037_v56 = vsel %vm4579_vm8, %v7049_v47, %v7048_v51  ;;  %v7052_v22 = vsel %vm4323_vm4, %v7050_v14, %v7051_v27  ;;  %v7054_v16 = vsel %vm4323_vm4, %v6912_v40, %v4251_v12  ;;  %v7055_v39 = vld [vmem:[#allocation170_spill] sm:$0xff]  ;;  %v7058_v49 = vsel %vm4323_vm4, %v7056_v21, %v7057_v37  ;;  %v7060_v47 = vld [vmem:[#allocation115_spill] sm:$0xff]  ;;  %v7063_v14 = vld [vmem:[#allocation172_spill] sm:$0xff]  ;;  %v1376_v21 = vpop.permute.xlu0 %1375 }
 0x237   : > { %v5053_v11 = vsel %vm4579_vm8, %v7053_v44, %v7052_v22  ;;  %v5063_v2 = vsel %vm4579_vm8, %v7055_v39, %v7054_v16  ;;  %v5073_v51 = vsel %vm4579_vm8, %v7059_v20, %v7058_v49  ;;  %2730 = vpow2.f32 %v1730_v54  ;;  %v7061_v12 = vld [vmem:[#allocation43_spill] sm:$0xff]  ;;  %v1356_v39 = vpop.permute.xlu1 %1355  ;;  %v7064_v54 = vld [vmem:[#allocation114_spill] sm:$0xff]  ;;  %v7067_v20 = vld [vmem:[#allocation173_spill] sm:$0xff] }
 0x238   : > { %v7062_v40 = vsel %vm4323_vm4, %v7060_v47, %v7061_v12  ;;  %v1844_v22 = vsub.f32 1.0, %v2721_v63  ;;  %v1724_v44 = vmul.f32 1.442695, %v5040_v25  ;;  %v1734_v16 = vmul.f32 1.442695, %v5043_v24  ;;  %v7065_v37 = vld [vmem:[#allocation42_spill] sm:$0xff] }
 0x239   : > { %v5083_v27 = vsel %vm4579_vm8, %v7063_v14, %v7062_v40  ;;  %v7066_v49 = vsel %vm4323_vm4, %v7064_v54, %v7065_v37  ;;  %v7068_v63 = vld [vmem:[#allocation45_spill] sm:$0xff]  ;;  %v7070_v40 = vld [vmem:[#allocation174_spill] sm:$0xff]  ;;  %v1592_v6 = vsel %vm1327_vm7, %v1356_v39, %v4775_v52  ;;  %v1597_v54 = vsel %vm1327_vm7, %v1376_v21, %v1274_v43  ;;  %v7071_v37 = vld [vmem:[#allocation116_spill] sm:$0xff]  ;;  %v2723_v52 = vpop.eup %2722 }
 0x23a   : > { %v5095_v47 = vsel %vm4579_vm8, %v7067_v20, %v7066_v49  ;;  %v7069_v12 = vsel %vm4323_vm4, %v6920_v59, %v7068_v63  ;;  %v7072_v49 = vld [vmem:[#allocation7_spill] sm:$0xff]  ;;  %2732 = vlog2.f32 %v1844_v22  ;;  %v5123_v63 = vmul.f32 %v4632_v50, %v1592_v6  ;;  %v7076_v39 = vld [vmem:[#allocation176_spill] sm:$0xff]  ;;  %v7080_v22 = vld [vmem:[#allocation177_spill] sm:$0xff] }
 0x23b   : > { %v5105_v14 = vsel %vm4579_vm8, %v7070_v40, %v7069_v12  ;;  %v7073_v20 = vsel %vm4323_vm4, %v7071_v37, %v7072_v49  ;;  %v5126_v12 = vmul.f32 %v4632_v50, %v1597_v54  ;;  %v7075_v43 = vsel %vm4323_vm4, %v6922_v26, %v4283_v4  ;;  %v7082_v26 = vld [vmem:[#allocation178_spill] sm:$0xff]  ;;  %v7084_v37 = vld [vmem:[#allocation120_spill] sm:$0xff] }
 0x23c   : > { %v5120_v59 = vsel %vm4579_vm8, %v7074_v53, %v7073_v20  ;;  %v5136_v21 = vsel %vm4579_vm8, %v7076_v39, %v7075_v43  ;;  %v7078_v53 = vld [vmem:[#allocation44_spill] sm:$0xff]  ;;  %v7081_v4 = vsel %vm4323_vm4, %v6924_v8, %v4293_v1  ;;  %2734 = vpow2.f32 %v1724_v44  ;;  %v7087_v20 = vld [vmem:[#allocation179_spill] sm:$0xff]  ;;  %v1364_v1 = vpop.permute.xlu1 %1363  ;;  %v7088_v44 = vld [vmem:[#allocation49_spill] sm:$0xff] }
 0x23d   : > { %7077 = vst [vmem:[#allocation78_spill] sm:$0xff] %v5136_v21  ;;  %v7079_v6 = vsel %vm4323_vm4, %v6921_v62, %v7078_v53  ;;  %v5156_v54 = vsel %vm4579_vm8, %v7082_v26, %v7081_v4  ;;  %v7085_v62 = vld [vmem:[#allocation46_spill] sm:$0xff]  ;;  %v1847_v39 = vsub.f32 1.0, %v2723_v52  ;;  %2736 = vpow2.f32 %v1734_v16  ;;  %v1384_v53 = vpop.permute.xlu0 %1383 }
 0x23e   : > { %v5146_v40 = vsel %vm4579_vm8, %v7080_v22, %v7079_v6  ;;  %7083 = vst [vmem:[#allocation79_spill] sm:$0xff] %v5156_v54  ;;  %v7086_v49 = vsel %vm4323_vm4, %v7084_v37, %v7085_v62  ;;  %v1728_v8 = vmul.f32 1.442695, %v5123_v63  ;;  %v7089_v6 = vsel %vm4323_vm4, %v6926_v23, %v7088_v44  ;;  %v7090_v22 = vld [vmem:[#allocation180_spill] sm:$0xff]  ;;  %v7092_v37 = vld [vmem:[#allocation122_spill] sm:$0xff]  ;;  %v7093_v62 = vld [vmem:[#allocation47_spill] sm:$0xff] }
 0x23f   : > { %v5166_v43 = vsel %vm4579_vm8, %v7087_v20, %v7086_v49  ;;  %v5177_v4 = vsel %vm4579_vm8, %v7090_v22, %v7089_v6  ;;  %v1738_v26 = vmul.f32 1.442695, %v5126_v12  ;;  %v1594_v16 = vsel %vm1327_vm7, %v1364_v1, %v4793_v48  ;;  %v7095_v49 = vld [vmem:[#allocation181_spill] sm:$0xff]  ;;  %v2725_v1 = vpop.eup %2724  ;;  %v7099_v22 = vld [vmem:[#allocation182_spill] sm:$0xff] }
 0x240   : > { %7091 = vst [vmem:[#allocation80_spill] sm:$0xff] %v5177_v4  ;;  %v1599_v52 = vsel %vm1327_vm7, %v1384_v53, %v4869_v61  ;;  %v7094_v23 = vsel %vm4323_vm4, %v7092_v37, %v7093_v62  ;;  %2738 = vlog2.f32 %v1847_v39  ;;  %v5197_v44 = vmul.f32 %v4632_v50, %v1594_v16  ;;  %v7096_v61 = vld [vmem:[#allocation125_spill] sm:$0xff]  ;;  %v7097_v53 = vld [vmem:[#allocation51_spill] sm:$0xff]  ;;  %v7101_v39 = vld [vmem:[#allocation124_spill] sm:$0xff] }
 0x241   : > { %v5194_v20 = vsel %vm4579_vm8, %v7095_v49, %v7094_v23  ;;  %v5200_v48 = vmul.f32 %v4632_v50, %v1599_v52  ;;  %v7098_v6 = vsel %vm4323_vm4, %v7096_v61, %v7097_v53  ;;  %v7102_v62 = vld [vmem:[#allocation48_spill] sm:$0xff]  ;;  %v7104_v23 = vld [vmem:[#allocation183_spill] sm:$0xff]  ;;  %2740 = vpow2.f32 %v1728_v8 }
 0x242   : > { %v5210_v37 = vsel %vm4579_vm8, %v7099_v22, %v7098_v6  ;;  %v7103_v16 = vsel %vm4323_vm4, %v7101_v39, %v7102_v62  ;;  %v7106_v49 = vld [vmem:[#allocation127_spill] sm:$0xff]  ;;  %v7109_v53 = vld [vmem:[#allocation184_spill] sm:$0xff]  ;;  %v2727_v22 = vpop.eup %2726  ;;  %v7111_v39 = vld [vmem:[#allocation126_spill] sm:$0xff]  ;;  %2742 = vpow2.f32 %v1738_v26  ;;  %v1732_v8 = vmul.f32 1.442695, %v5197_v44 }
 0x243   : > { %7100 = vst [vmem:[#allocation82_spill] sm:$0xff] %v5210_v37  ;;  %v5220_v52 = vsel %vm4579_vm8, %v7104_v23, %v7103_v16  ;;  %v7108_v61 = vsel %vm4323_vm4, %v7106_v49, %v7107_v15  ;;  %v7112_v62 = vld [vmem:[#allocation50_spill] sm:$0xff]  ;;  %v1845_v23 = vsub.f32 1.0, %v2725_v1  ;;  %v1372_v49 = vpop.permute.xlu1 %1371  ;;  %v1849_v37 = vsub.f32 1.0, %v2727_v22  ;;  %v7122_v4 = vld [vmem:[#allocation128_spill] sm:$0xff] }
 0x244   : > { %7105 = vst [vmem:[#allocation83_spill] sm:$0xff] %v5220_v52  ;;  %v5230_v6 = vsel %vm4579_vm8, %v7109_v53, %v7108_v61  ;;  %v7113_v7 = vsel %vm4323_vm4, %v7111_v39, %v7112_v62  ;;  %v5245_v15 = vld [vmem:[%s6400_s3] ss:$0 sm:$0xff]  ;;  %v1392_v61 = vpop.permute.xlu0 %1391  ;;  %v7117_v39 = vld [vmem:[#allocation129_spill] sm:$0xff]  ;;  %v1742_v1 = vmul.f32 1.442695, %v5200_v48  ;;  %v1596_v26 = vsel %vm1327_vm7, %v1372_v49, %v4811_v42 }
 0x245   : > { %7110 = vst [vmem:[#allocation84_spill] sm:$0xff] %v5230_v6  ;;  %v5240_v16 = vsel %vm4579_vm8, %v7114_v5, %v7113_v7  ;;  %v7116_v53 = vld [vmem:[#allocation190_spill] sm:$0xff]  ;;  %v7118_v62 = vld [vmem:[#allocation57_spill] sm:$0xff]  ;;  %v7125_v52 = vld [vmem:[#allocation187_spill] sm:$0xff]  ;;  %2744 = vlog2.f32 %v1845_v23  ;;  %v1601_v22 = vsel %vm1327_vm7, %v1392_v61, %v4889_v57  ;;  %v1917_v42 = vmul.f32 %v5245_v15, %v4684_v38 }
 0x246   : > { %7115 = vst [vmem:[#allocation85_spill] sm:$0xff] %v5240_v16  ;;  %vm2185_vm9 = vcmp.eq.s32.totalorder %v7116_v53, 1  ;;  %v7119_v6 = vsel %vm4323_vm4, %v7117_v39, %v7118_v62  ;;  %v7120_v5 = vld [vmem:[#allocation186_spill] sm:$0xff]  ;;  %v2729_v62 = vpop.eup %2728  ;;  %2746 = vlog2.f32 %v1849_v37  ;;  %v5295_v38 = vmul.f32 %v5245_v15, %v4849_v13 }
 0x247   : > { %v5257_v7 = vsel %vm4579_vm8, %v7120_v5, %v7119_v6  ;;  %v7123_v16 = vld [vmem:[#allocation54_spill] sm:$0xff]  ;;  %v5274_v6 = vmul.f32 %v4632_v50, %v1596_v26  ;;  %v1846_v23 = vsub.f32 1.0, %v2729_v62  ;;  %2748 = vpow2.f32 %v1732_v8  ;;  %v1380_v49 = vpop.permute.xlu1 %1379 }
 0x248   : > { %7121 = vst [vmem:[#allocation17_spill] sm:$0xff] %v5257_v7  ;;  %v7124_v54 = vsel %vm4323_vm4, %v7122_v4, %v7123_v16  ;;  %v5283_v4 = vmul.f32 %v5245_v15, %v4749_v34  ;;  %v5290_v16 = vmul.f32 %v5245_v15, %v4846_v35  ;;  %v1400_v61 = vpop.permute.xlu0 %1399  ;;  %2750 = vpow2.f32 %v1742_v1 }
 0x249   : > { %v5271_v39 = vsel %vm4579_vm8, %v7125_v52, %v7124_v54  ;;  %v5286_v54 = vmul.f32 %v4632_v50, %v1601_v22  ;;  %v2731_v52 = vpop.eup %2730  ;;  %v1736_v57 = vmul.f32 1.442695, %v5274_v6  ;;  %v5300_v5 = vmul.f32 %v5245_v15, %v4948_v10 }
 0x24a   : > { %7126 = vst [vmem:[#allocation87_spill] sm:$0xff] %v5271_v39  ;;  %v1851_v34 = vsub.f32 1.0, %v2731_v52  ;;  %2752 = vlog2.f32 %v1846_v23  ;;  %v1598_v35 = vsel %vm1327_vm7, %v1380_v49, %v4830_v32  ;;  %v1603_v8 = vsel %vm1327_vm7, %v1400_v61, %v4909_v18  ;;  %v2733_v26 = vpop.eup %2732 }
 0x24b   : > { %v1746_v37 = vmul.f32 1.442695, %v5286_v54  ;;  %v5310_v13 = vmul.f32 %v5245_v15, %v4951_v41  ;;  %v5313_v1 = vmul.f32 %v4632_v50, %v1598_v35  ;;  %v5316_v10 = vmul.f32 %v4632_v50, %v1603_v8  ;;  %v2735_v22 = vpop.eup %2734  ;;  %v1388_v41 = vpop.permute.xlu1 %1387  ;;  %v7127_v35 = vld [vmem:[#allocation189_spill] sm:$0xff] }
 0x24c   : > { %2754 = vlog2.f32 %v1851_v34  ;;  %v1983_v62 = vmul.f32 0.6931472, %v2733_v26  ;;  %v5320_v32 = vmul.f32 %v5245_v15, %v5040_v25  ;;  %v5324_v18 = vmul.f32 %v5245_v15, %v5043_v24  ;;  %v1408_v52 = vpop.permute.xlu0 %1407  ;;  %v2737_v23 = vpop.eup %2736 }
 0x24d   : > { %2756 = vpow2.f32 %v1736_v57  ;;  %v1848_v49 = vsub.f32 1.0, %v2735_v22  ;;  %v5328_v61 = vmul.f32 %v5245_v15, %v5123_v63  ;;  %v1740_v34 = vmul.f32 1.442695, %v5313_v1  ;;  %v2739_v57 = vpop.eup %2738 }
 0x24e   : > { %2758 = vpow2.f32 %v1746_v37  ;;  %v2116_v8 = vmul.f32 %v7127_v35, %v1983_v62  ;;  %v1853_v25 = vsub.f32 1.0, %v2737_v23  ;;  %v5334_v26 = vmul.f32 %v5245_v15, %v5126_v12  ;;  %v2741_v62 = vpop.eup %2740 }
 0x24f   : > { %v1750_v24 = vmul.f32 1.442695, %v5316_v10  ;;  %2760 = vlog2.f32 %v1848_v49  ;;  %v5339_v22 = vmul.f32 %v5245_v15, %v5197_v44  ;;  %v1600_v63 = vsel %vm1327_vm7, %v1388_v41, %v4859_v45  ;;  %v2743_v7 = vpop.eup %2742 }
 0x250   : > { %v1605_v37 = vsel %vm1327_vm7, %v1408_v52, %v4931_v60  ;;  %v2186_v12 = vsel %vm2185_vm9, 0.0, %v2116_v8  ;;  %v1989_v23 = vmul.f32 0.6931472, %v2739_v57  ;;  %2762 = vlog2.f32 %v1853_v25  ;;  %v1396_v52 = vpop.permute.xlu1 %1395 }
 0x251   : > { %v5350_v49 = vmul.f32 %v4632_v50, %v1600_v63  ;;  %v2250_v44 = vadd.f32 %v2186_v12, %v1917_v42  ;;  %v1850_v39 = vsub.f32 1.0, %v2741_v62  ;;  %2764 = vpow2.f32 %v1740_v34 }
 0x252   : > { %v5353_v21 = vmul.f32 %v4632_v50, %v1605_v37  ;;  %v2119_v45 = vmul.f32 %v7127_v35, %v1989_v23  ;;  %v1855_v41 = vsub.f32 1.0, %v2743_v7  ;;  %2766 = vpow2.f32 %v1750_v24  ;;  %v2745_v8 = vpop.eup %2744 }
 0x253   : > { %v1744_v60 = vmul.f32 1.442695, %v5350_v49  ;;  %v2314_v57 = vmul.f32 1.442695, %v2250_v44  ;;  %2768 = vlog2.f32 %v1850_v39  ;;  %v5359_v25 = vmul.f32 %v5245_v15, %v5200_v48  ;;  %v2747_v34 = vpop.eup %2746 }
 0x254   : > { %v1754_v42 = vmul.f32 1.442695, %v5353_v21  ;;  %v2189_v63 = vsel %vm2185_vm9, 0.0, %v2119_v45  ;;  %v1985_v37 = vmul.f32 0.6931472, %v2745_v8  ;;  %2770 = vlog2.f32 %v1855_v41  ;;  %v2749_v24 = vpop.eup %2748 }
 0x255   : > { %v5366_v7 = vmul.f32 %v5245_v15, %v5274_v6  ;;  %2772 = vpow2.f32 %v2314_v57  ;;  %v2253_v39 = vadd.f32 %v2189_v63, %v5283_v4  ;;  %v1993_v62 = vmul.f32 0.6931472, %v2747_v34  ;;  %v2751_v12 = vpop.eup %2750 }
 0x256   : > { %v1602_v48 = vsel %vm1327_vm7, %v1396_v52, %v4879_v46  ;;  %v2117_v23 = vmul.f32 %v7127_v35, %v1985_v37  ;;  %v1852_v44 = vsub.f32 1.0, %v2749_v24  ;;  %2774 = vpow2.f32 %v1744_v60 }
 0x257   : > { %v5374_v45 = vmul.f32 %v4632_v50, %v1602_v48  ;;  %v2753_v41 = vpop.eup %2752  ;;  %v2320_v6 = vmul.f32 1.442695, %v2253_v39  ;;  %v2121_v8 = vmul.f32 %v7127_v35, %v1993_v62  ;;  %v1857_v57 = vsub.f32 1.0, %v2751_v12 }
 0x258   : > { %2776 = vpow2.f32 %v1754_v42  ;;  %v2187_v34 = vsel %vm2185_vm9, 0.0, %v2117_v23  ;;  %v1987_v63 = vmul.f32 0.6931472, %v2753_v41  ;;  %v1416_v41 = vpop.permute.xlu0 %1415 }
 0x259   : > { %v2755_v4 = vpop.eup %2754  ;;  %2778 = vlog2.f32 %v1852_v44  ;;  %v1748_v46 = vmul.f32 1.442695, %v5374_v45  ;;  %v2251_v60 = vadd.f32 %v2187_v34, %v5290_v16  ;;  %v2191_v37 = vsel %vm2185_vm9, 0.0, %v2121_v8 }
 0x25a   : > { %v2757_v52 = vpop.eup %2756  ;;  %2780 = vpow2.f32 %v2320_v6  ;;  %v1997_v24 = vmul.f32 0.6931472, %v2755_v4  ;;  %v2255_v42 = vadd.f32 %v2191_v37, %v5295_v38  ;;  %v2118_v62 = vmul.f32 %v7127_v35, %v1987_v63 }
 0x25b   : > { %v2759_v39 = vpop.eup %2758  ;;  %2782 = vlog2.f32 %v1857_v57  ;;  %v1854_v48 = vsub.f32 1.0, %v2757_v52  ;;  %v2316_v12 = vmul.f32 1.442695, %v2251_v60  ;;  %v5391_v38 = vmul.f32 %v5245_v15, %v5286_v54 }
 0x25c   : > { %v2123_v23 = vmul.f32 %v7127_v35, %v1997_v24  ;;  %v1859_v44 = vsub.f32 1.0, %v2759_v39  ;;  %2784 = vpow2.f32 %v1748_v46  ;;  %v2761_v6 = vpop.eup %2760  ;;  %v2324_v16 = vmul.f32 1.442695, %v2255_v42 }
 0x25d   : > { %v2188_v8 = vsel %vm2185_vm9, 0.0, %v2118_v62  ;;  %2786 = vlog2.f32 %v1854_v48  ;;  %v2763_v57 = vpop.eup %2762  ;;  %v1991_v63 = vmul.f32 0.6931472, %v2761_v6  ;;  %v1607_v37 = vsel %vm1327_vm7, %v1416_v41, %v4961_v19  ;;  %v5408_v62 = vld [vmem:[%s6399_s2] ss:$0 sm:$0xff] }
 0x25e   : > { %2788 = vpow2.f32 %v2316_v12  ;;  %v2252_v4 = vadd.f32 %v2188_v8, %v5300_v5  ;;  %v2193_v34 = vsel %vm2185_vm9, 0.0, %v2123_v23  ;;  %v2765_v46 = vpop.eup %2764  ;;  %v2001_v60 = vmul.f32 0.6931472, %v2763_v57 }
 0x25f   : > { %2790 = vpow2.f32 %v2324_v16  ;;  %v2257_v52 = vadd.f32 %v2193_v34, %v5310_v13  ;;  %v2767_v24 = vpop.eup %2766  ;;  %v2120_v5 = vmul.f32 %v7127_v35, %v1991_v63  ;;  %v1856_v39 = vsub.f32 1.0, %v2765_v46 }
 0x260   : > { %v2318_v54 = vmul.f32 1.442695, %v2252_v4  ;;  %2792 = vlog2.f32 %v1859_v44  ;;  %v2769_v42 = vpop.eup %2768  ;;  %v2125_v48 = vmul.f32 %v7127_v35, %v2001_v60  ;;  %v5413_v19 = vmul.f32 %v5245_v15, %v5313_v1  ;;  %v1404_v4 = vpop.permute.xlu1 %1403 }
 0x261   : > { %v2328_v13 = vmul.f32 1.442695, %v2257_v52  ;;  %v1861_v12 = vsub.f32 1.0, %v2767_v24  ;;  %v2771_v23 = vpop.eup %2770  ;;  %v2190_v44 = vsel %vm2185_vm9, 0.0, %v2120_v5  ;;  %v1995_v41 = vmul.f32 0.6931472, %v2769_v42 }
 0x262   : > { %2794 = vpow2.f32 %v2318_v54  ;;  %v5418_v6 = vmul.f32 %v4632_v50, %v1607_v37  ;;  %v2773_v16 = vpop.eup %2772  ;;  %v2254_v8 = vadd.f32 %v2190_v44, %v5320_v32  ;;  %v2195_v57 = vsel %vm2185_vm9, 0.0, %v2125_v48  ;;  %v1424_v54 = vpop.permute.xlu0 %1423 }
 0x263   : > { %2796 = vpow2.f32 %v2328_v13  ;;  %v2005_v1 = vmul.f32 0.6931472, %v2771_v23  ;;  %v2775_v34 = vpop.eup %2774  ;;  %v2448_v63 = vmul.f32 %v2773_v16, %v5408_v62  ;;  %v2259_v46 = vadd.f32 %v2195_v57, %v5324_v18 }
 0x264   : > { %v2122_v52 = vmul.f32 %v7127_v35, %v1995_v41  ;;  %2798 = vlog2.f32 %v1856_v39  ;;  %v2322_v37 = vmul.f32 1.442695, %v2254_v8  ;;  %v1858_v32 = vsub.f32 1.0, %v2775_v34 }
 0x265   : > { %v2777_v60 = vpop.eup %2776  ;;  %v2127_v24 = vmul.f32 %v7127_v35, %v2005_v1  ;;  %2800 = vlog2.f32 %v1861_v12  ;;  %2512 = vst [vmem:[%s5428_s26] sm:$0xff] %v2448_v63  ;;  %v2332_v42 = vmul.f32 1.442695, %v2259_v46  ;;  %v1604_v39 = vsel %vm1327_vm7, %v1404_v4, %v4899_v17  ;;  %v1412_v63 = vpop.permute.xlu1 %1411 }
 0x266   : > { %v2779_v5 = vpop.eup %2778  ;;  %v2192_v13 = vsel %vm2185_vm9, 0.0, %v2122_v52  ;;  %v1863_v18 = vsub.f32 1.0, %v2777_v60  ;;  %2802 = vpow2.f32 %v2322_v37  ;;  %v1758_v57 = vmul.f32 1.442695, %v5418_v6 }
 0x267   : > { %v2781_v48 = vpop.eup %2780  ;;  %v2256_v12 = vadd.f32 %v2192_v13, %v5328_v61  ;;  %v2197_v23 = vsel %vm2185_vm9, 0.0, %v2127_v24  ;;  %v1999_v44 = vmul.f32 0.6931472, %v2779_v5  ;;  %2804 = vpow2.f32 %v2332_v42  ;;  %v5450_v42 = vpop.permute.xlu0 %1431 }
 0x268   : > { %v2783_v41 = vpop.eup %2782  ;;  %v2451_v16 = vmul.f32 %v2781_v48, %v5408_v62  ;;  %v2261_v8 = vadd.f32 %v2197_v23, %v5334_v26  ;;  %2806 = vlog2.f32 %v1858_v32  ;;  %v5445_v60 = vmul.f32 %v4632_v50, %v1604_v39 }
 0x269   : > { %v2785_v1 = vpop.eup %2784  ;;  %v2326_v34 = vmul.f32 1.442695, %v2256_v12  ;;  %v2124_v17 = vmul.f32 %v7127_v35, %v1999_v44  ;;  %v2009_v4 = vmul.f32 0.6931472, %v2783_v41  ;;  %2808 = vlog2.f32 %v1863_v18 }
 0x26a   : > { %v2787_v61 = vpop.eup %2786  ;;  %2515 = vst [vmem:[%s5428_s26 + $0x18] sm:$0xff] %v2451_v16  ;;  %v2336_v46 = vmul.f32 1.442695, %v2261_v8  ;;  %v1860_v52 = vsub.f32 1.0, %v2785_v1  ;;  %v1752_v39 = vmul.f32 1.442695, %v5445_v60 }
 0x26b   : > { %v2789_v37 = vpop.eup %2788  ;;  %2810 = vpow2.f32 %v2326_v34  ;;  %v2194_v26 = vsel %vm2185_vm9, 0.0, %v2124_v17  ;;  %v2129_v24 = vmul.f32 %v7127_v35, %v2009_v4  ;;  %v2003_v5 = vmul.f32 0.6931472, %v2787_v61  ;;  %v5469_v4 = vpop.permute.xlu1 %1419 }
 0x26c   : > { %v2791_v32 = vpop.eup %2790  ;;  %v2449_v13 = vmul.f32 %v2789_v37, %v5408_v62  ;;  %2812 = vpow2.f32 %v2336_v46  ;;  %v2258_v18 = vadd.f32 %v2194_v26, %v5339_v22  ;;  %v1934_v34 = vmul.f32 %v5245_v15, %v5316_v10 }
 0x26d   : > { %v2793_v48 = vpop.eup %2792  ;;  %v2453_v12 = vmul.f32 %v2791_v32, %v5408_v62  ;;  %v2199_v23 = vsel %vm2185_vm9, 0.0, %v2129_v24  ;;  %v2126_v44 = vmul.f32 %v7127_v35, %v2003_v5  ;;  %2814 = vlog2.f32 %v1860_v52 }
 0x26e   : > { %2513 = vst [vmem:[%s5428_s26 + $0x8] sm:$0xff] %v2449_v13  ;;  %v2330_v41 = vmul.f32 1.442695, %v2258_v18  ;;  %v2263_v16 = vadd.f32 %v2199_v23, %v5359_v25  ;;  %v2013_v8 = vmul.f32 0.6931472, %v2793_v48  ;;  %2816 = vpow2.f32 %v1758_v57 }
 0x26f   : > { %v2795_v1 = vpop.eup %2794  ;;  %2517 = vst [vmem:[%s5428_s26 + $0x28] sm:$0xff] %v2453_v12  ;;  %v2196_v22 = vsel %vm2185_vm9, 0.0, %v2126_v44  ;;  %2818 = vpow2.f32 %v1752_v39  ;;  %v1609_v17 = vsel %vm1327_vm7, %v1424_v54, %v4981_v28  ;;  %v1606_v28 = vsel %vm1327_vm7, %v1412_v63, %v4921_v0  ;;  %v5481_v54 = vpop.permute.xlu0 %1439 }
 0x270   : > { %v2797_v61 = vpop.eup %2796  ;;  %v2450_v25 = vmul.f32 %v2795_v1, %v5408_v62  ;;  %2820 = vpow2.f32 %v2330_v41  ;;  %v2340_v57 = vmul.f32 1.442695, %v2263_v16  ;;  %v2260_v46 = vadd.f32 %v2196_v22, %v5366_v7 }
 0x271   : > { %v2799_v52 = vpop.eup %2798  ;;  %v2455_v37 = vmul.f32 %v2797_v61, %v5408_v62  ;;  %v2131_v10 = vmul.f32 %v7127_v35, %v2013_v8  ;;  %v5476_v26 = vmul.f32 %v4632_v50, %v1609_v17  ;;  %v5485_v7 = vmul.f32 %v4632_v50, %v1606_v28 }
 0x272   : > { %v2801_v24 = vpop.eup %2800  ;;  %2514 = vst [vmem:[%s5428_s26 + $0x10] sm:$0xff] %v2450_v25  ;;  %2822 = vpow2.f32 %v2340_v57  ;;  %v2334_v5 = vmul.f32 1.442695, %v2260_v46  ;;  %v2007_v32 = vmul.f32 0.6931472, %v2799_v52  ;;  %v1931_v39 = vmul.f32 %v5245_v15, %v5350_v49  ;;  %v5500_v49 = vpop.permute.xlu1 %1427 }
 0x273   : > { %2519 = vst [vmem:[%s5428_s26 + $0x38] sm:$0xff] %v2455_v37  ;;  %v2201_v13 = vsel %vm2185_vm9, 0.0, %v2131_v10  ;;  %v2017_v18 = vmul.f32 0.6931472, %v2801_v24  ;;  %v1762_v0 = vmul.f32 1.442695, %v5476_v26  ;;  %v2803_v63 = vpop.eup %2802  ;;  %v1936_v8 = vmul.f32 %v5245_v15, %v5353_v21  ;;  %v5513_v52 = vpop.permute.xlu0 %1447 }
 0x274   : > { %2824 = vpow2.f32 %v2334_v5  ;;  %v2265_v48 = vadd.f32 %v2201_v13, %v5391_v38  ;;  %v2128_v12 = vmul.f32 %v7127_v35, %v2007_v32  ;;  %v1756_v23 = vmul.f32 1.442695, %v5485_v7  ;;  %v2805_v44 = vpop.eup %2804 }
 0x275   : > { %v2452_v41 = vmul.f32 %v2803_v63, %v5408_v62  ;;  %v2133_v16 = vmul.f32 %v7127_v35, %v2017_v18  ;;  %2826 = vpow2.f32 %v1762_v0  ;;  %v2807_v1 = vpop.eup %2806  ;;  %v2457_v22 = vmul.f32 %v2805_v44, %v5408_v62 }
 0x276   : > { %v2344_v38 = vmul.f32 1.442695, %v2265_v48  ;;  %v2198_v17 = vsel %vm2185_vm9, 0.0, %v2128_v12  ;;  %2828 = vpow2.f32 %v1756_v23  ;;  %v2809_v61 = vpop.eup %2808  ;;  %v2011_v21 = vmul.f32 0.6931472, %v2807_v1  ;;  %v1436_v44 = vpop.permute.xlu1 %1435 }
 0x277   : > { %2516 = vst [vmem:[%s5428_s26 + $0x20] sm:$0xff] %v2452_v41  ;;  %v2262_v25 = vadd.f32 %v2198_v17, %v5413_v19  ;;  %v2203_v57 = vsel %vm2185_vm9, 0.0, %v2133_v16  ;;  %v1611_v46 = vsel %vm1327_vm7, %v5450_v42, %v5001_v30  ;;  %2521 = vst [vmem:[%s5428_s26 + $0x48] sm:$0xff] %v2457_v22  ;;  %v2021_v28 = vmul.f32 0.6931472, %v2809_v61 }
 0x278   : > { %v2811_v37 = vpop.eup %2810  ;;  %2830 = vpow2.f32 %v2344_v38  ;;  %v2267_v10 = vadd.f32 %v2203_v57, %v1934_v34  ;;  %v5517_v24 = vmul.f32 %v4632_v50, %v1611_v46  ;;  %v2130_v13 = vmul.f32 %v7127_v35, %v2011_v21  ;;  %v1456_v57 = vpop.permute.xlu0 %1455 }
 0x279   : > { %v2813_v19 = vpop.eup %2812  ;;  %v2454_v5 = vmul.f32 %v2811_v37, %v5408_v62  ;;  %v2338_v32 = vmul.f32 1.442695, %v2262_v25  ;;  %v1933_v30 = vmul.f32 %v5245_v15, %v5374_v45  ;;  %v2135_v34 = vmul.f32 %v7127_v35, %v2021_v28 }
 0x27a   : > { %v2815_v42 = vpop.eup %2814  ;;  %v2459_v18 = vmul.f32 %v2813_v19, %v5408_v62  ;;  %v2348_v0 = vmul.f32 1.442695, %v2267_v10  ;;  %v1766_v63 = vmul.f32 1.442695, %v5517_v24  ;;  %v2200_v12 = vsel %vm2185_vm9, 0.0, %v2130_v13  ;;  %v7129_v13 = vld [vmem:[#allocation9_spill] sm:$0xff] }
 0x27b   : > { %v2817_v48 = vpop.eup %2816  ;;  %2518 = vst [vmem:[%s5428_s26 + $0x30] sm:$0xff] %v2454_v5  ;;  %2832 = vpow2.f32 %v2338_v32  ;;  %v2015_v23 = vmul.f32 0.6931472, %v2815_v42  ;;  %v1608_v45 = vsel %vm1327_vm7, %v5469_v4, %v4945_v55  ;;  %v2264_v16 = vadd.f32 %v2200_v12, %v1931_v39  ;;  %v7128_v32 = vld [vmem:[#allocation131_spill] sm:$0xff] }
 0x27c   : > { %v2819_v41 = vpop.eup %2818  ;;  %2523 = vst [vmem:[%s5428_s26 + $0x58] sm:$0xff] %v2459_v18  ;;  %2834 = vpow2.f32 %v2348_v0  ;;  %v2205_v1 = vsel %vm2185_vm9, 0.0, %v2135_v34  ;;  %v1865_v22 = vsub.f32 1.0, %v2817_v48  ;;  %v5539_v4 = vmul.f32 %v4632_v50, %v1608_v45  ;;  %v7131_v18 = vld [vmem:[#allocation188_spill] sm:$0xff]  ;;  %v7132_v45 = vld [vmem:[#allocation130_spill] sm:$0xff] }
 0x27d   : > { %v2821_v38 = vpop.eup %2820  ;;  %v2269_v17 = vadd.f32 %v2205_v1, %v1936_v8  ;;  %v2132_v61 = vmul.f32 %v7127_v35, %v2015_v23  ;;  %v1862_v25 = vsub.f32 1.0, %v2819_v41  ;;  %2836 = vpow2.f32 %v1766_v63  ;;  %v7133_v41 = vld [vmem:[#allocation56_spill] sm:$0xff]  ;;  %v7135_v1 = vld [vmem:[#allocation29_spill] sm:$0xff] }
 0x27e   : > { %v2456_v21 = vmul.f32 %v2821_v38, %v5408_v62  ;;  %v2342_v55 = vmul.f32 1.442695, %v2264_v16  ;;  %2838 = vlog2.f32 %v1865_v22  ;;  %v1613_v8 = vsel %vm1327_vm7, %v5481_v54, %v5023_v36 }
 0x27f   : > { %v2823_v39 = vpop.eup %2822  ;;  %v2352_v46 = vmul.f32 1.442695, %v2269_v17  ;;  %v2202_v37 = vsel %vm2185_vm9, 0.0, %v2132_v61  ;;  %2840 = vlog2.f32 %v1862_v25  ;;  %v1760_v19 = vmul.f32 1.442695, %v5539_v4  ;;  %v1464_v17 = vpop.permute.xlu0 %1463  ;;  %v7136_v61 = vld [vmem:[#allocation133_spill] sm:$0xff] }
 0x280   : > { %2520 = vst [vmem:[%s5428_s26 + $0x40] sm:$0xff] %v2456_v21  ;;  %v2461_v10 = vmul.f32 %v2823_v39, %v5408_v62  ;;  %2842 = vpow2.f32 %v2342_v55  ;;  %v2266_v28 = vadd.f32 %v2202_v37, %v1933_v30  ;;  %v7130_v42 = vsel %vm4323_vm4, %v7128_v32, %v7129_v13  ;;  %v1444_v30 = vpop.permute.xlu1 %1443  ;;  %v7137_v25 = vld [vmem:[#allocation60_spill] sm:$0xff]  ;;  %v7139_v55 = vld [vmem:[#allocation30_spill] sm:$0xff] }
 0x281   : > { %v2825_v5 = vpop.eup %2824  ;;  %v5558_v0 = vsel %vm4579_vm8, %v7131_v18, %v7130_v42  ;;  %2844 = vpow2.f32 %v2352_v46  ;;  %v5561_v36 = vmul.f32 %v4632_v50, %v1613_v8  ;;  %v1610_v54 = vsel %vm1327_vm7, %v5500_v49, %v4971_v9  ;;  %v7140_v32 = vld [vmem:[#allocation132_spill] sm:$0xff]  ;;  %v7141_v13 = vld [vmem:[#allocation58_spill] sm:$0xff]  ;;  %v7143_v18 = vld [vmem:[#allocation39_spill] sm:$0xff] }
 0x282   : > { %v2827_v34 = vpop.eup %2826  ;;  %2525 = vst [vmem:[%s5428_s26 + $0x68] sm:$0xff] %v2461_v10  ;;  %v2458_v63 = vmul.f32 %v2825_v5, %v5408_v62  ;;  %v2346_v48 = vmul.f32 1.442695, %v2266_v28  ;;  %2846 = vpow2.f32 %v1760_v19  ;;  %v5570_v12 = vmul.f32 %v4632_v50, %v1610_v54 }
 0x283   : > { %v2829_v23 = vpop.eup %2828  ;;  %v7134_v16 = vsel %vm4323_vm4, %v7132_v45, %v7133_v41  ;;  %v1867_v49 = vsub.f32 1.0, %v2827_v34  ;;  %v1770_v22 = vmul.f32 1.442695, %v5561_v36  ;;  %v1615_v38 = vsel %vm1327_vm7, %v5513_v52, %v5053_v11 }
 0x284   : > { %v5580_v9 = vsel %vm4579_vm8, %v7135_v1, %v7134_v16  ;;  %v7138_v21 = vsel %vm4323_vm4, %v7136_v61, %v7137_v25  ;;  %2522 = vst [vmem:[%s5428_s26 + $0x50] sm:$0xff] %v2458_v63  ;;  %2848 = vpow2.f32 %v2346_v48  ;;  %v1864_v46 = vsub.f32 1.0, %v2829_v23 }
 0x285   : > { %v5595_v39 = vsel %vm4579_vm8, %v7139_v55, %v7138_v21  ;;  %v1764_v37 = vmul.f32 1.442695, %v5570_v12  ;;  %v2831_v8 = vpop.eup %2830  ;;  %2850 = vlog2.f32 %v1867_v49  ;;  %v5600_v11 = vmul.f32 %v4632_v50, %v1615_v38 }
 0x286   : > { %v1612_v52 = vsel %vm1327_vm7, %v1436_v44, %v4991_v58  ;;  %v1617_v10 = vsel %vm1327_vm7, %v1456_v57, %v5073_v51  ;;  %v2463_v28 = vmul.f32 %v2831_v8, %v5408_v62  ;;  %2852 = vlog2.f32 %v1864_v46  ;;  %v1452_v57 = vpop.permute.xlu1 %1451 }
 0x287   : > { %v5610_v19 = vmul.f32 %v4632_v50, %v1612_v52  ;;  %v5613_v5 = vmul.f32 %v4632_v50, %v1617_v10  ;;  %v7142_v42 = vsel %vm4323_vm4, %v7140_v32, %v7141_v13  ;;  %2854 = vpow2.f32 %v1770_v22 }
 0x288   : > { %v5623_v58 = vsel %vm4579_vm8, %v7143_v18, %v7142_v42  ;;  %v1774_v51 = vmul.f32 1.442695, %v5600_v11  ;;  %v1614_v44 = vsel %vm1327_vm7, %v1444_v30, %v5013_v29  ;;  %v2833_v54 = vpop.eup %2832  ;;  %2527 = vst [vmem:[%s5428_s26 + $0x78] sm:$0xff] %v2463_v28  ;;  %v1938_v34 = vmul.f32 %v5245_v15, %v5418_v6  ;;  %v1472_v30 = vpop.permute.xlu0 %1471 }
 0x289   : > { %2856 = vpow2.f32 %v1764_v37  ;;  %v1768_v63 = vmul.f32 1.442695, %v5610_v19  ;;  %v1778_v48 = vmul.f32 1.442695, %v5613_v5  ;;  %v2835_v23 = vpop.eup %2834  ;;  %v2460_v45 = vmul.f32 %v2833_v54, %v5408_v62 }
 0x28a   : > { %v1935_v41 = vmul.f32 %v5245_v15, %v5445_v60  ;;  %2858 = vpow2.f32 %v1774_v51  ;;  %v5638_v29 = vmul.f32 %v4632_v50, %v1614_v44  ;;  %v2837_v16 = vpop.eup %2836  ;;  %v2465_v6 = vmul.f32 %v2835_v23, %v5408_v62  ;;  %v1460_v28 = vpop.permute.xlu1 %1459 }
 0x28b   : > { %2860 = vpow2.f32 %v1768_v63  ;;  %v1619_v1 = vsel %vm1327_vm7, %v1464_v17, %v5095_v47  ;;  %v1616_v49 = vsel %vm1327_vm7, %v1452_v57, %v5037_v56  ;;  %v2839_v22 = vpop.eup %2838  ;;  %2524 = vst [vmem:[%s5428_s26 + $0x60] sm:$0xff] %v2460_v45  ;;  %v5650_v60 = vmul.f32 %v5245_v15, %v5476_v26 }
 0x28c   : > { %v1869_v38 = vsub.f32 1.0, %v2837_v16  ;;  %2862 = vpow2.f32 %v1778_v48  ;;  %v1772_v61 = vmul.f32 1.442695, %v5638_v29  ;;  %v2841_v25 = vpop.eup %2840  ;;  %2529 = vst [vmem:[%s5428_s26 + $0x88] sm:$0xff] %v2465_v6  ;;  %v2025_v21 = vmul.f32 0.6931472, %v2839_v22  ;;  %v1480_v54 = vpop.permute.xlu0 %1479 }
 0x28d   : > { %v5655_v55 = vmul.f32 %v4632_v50, %v1619_v1  ;;  %v5658_v47 = vmul.f32 %v4632_v50, %v1616_v49  ;;  %v1621_v56 = vsel %vm1327_vm7, %v1472_v30, %v5120_v59  ;;  %v2843_v17 = vpop.eup %2842  ;;  %v2019_v26 = vmul.f32 0.6931472, %v2841_v25 }
 0x28e   : > { %v5665_v46 = vmul.f32 %v5245_v15, %v5485_v7  ;;  %2864 = vlog2.f32 %v1869_v38  ;;  %v5668_v37 = vmul.f32 %v4632_v50, %v1621_v56  ;;  %v2845_v8 = vpop.eup %2844  ;;  %v2462_v52 = vmul.f32 %v2843_v17, %v5408_v62  ;;  %v1468_v25 = vpop.permute.xlu1 %1467 }
 0x28f   : > { %v2137_v10 = vmul.f32 %v7127_v35, %v2025_v21  ;;  %2866 = vpow2.f32 %v1772_v61  ;;  %v1782_v59 = vmul.f32 1.442695, %v5655_v55  ;;  %v2847_v32 = vpop.eup %2846  ;;  %v2467_v13 = vmul.f32 %v2845_v8, %v5408_v62 }
 0x290   : > { %v2134_v7 = vmul.f32 %v7127_v35, %v2019_v26  ;;  %v5677_v42 = vmul.f32 %v5245_v15, %v5517_v24  ;;  %v1776_v18 = vmul.f32 1.442695, %v5658_v47  ;;  %2526 = vst [vmem:[%s5428_s26 + $0x70] sm:$0xff] %v2462_v52  ;;  %v1866_v44 = vsub.f32 1.0, %v2847_v32 }
 0x291   : > { %v2207_v51 = vsel %vm2185_vm9, 0.0, %v2137_v10  ;;  %v5685_v57 = vmul.f32 %v5245_v15, %v5539_v4  ;;  %2868 = vpow2.f32 %v1782_v59  ;;  %v2849_v63 = vpop.eup %2848  ;;  %2531 = vst [vmem:[%s5428_s26 + $0x98] sm:$0xff] %v2467_v13  ;;  %v1786_v23 = vmul.f32 1.442695, %v5668_v37 }
 0x292   : > { %v2271_v48 = vadd.f32 %v2207_v51, %v1938_v34  ;;  %v2204_v24 = vsel %vm2185_vm9, 0.0, %v2134_v7  ;;  %2870 = vpow2.f32 %v1776_v18  ;;  %v2851_v45 = vpop.eup %2850  ;;  %v2464_v30 = vmul.f32 %v2849_v63, %v5408_v62 }
 0x293   : > { %v2268_v16 = vadd.f32 %v2204_v24, %v1935_v41  ;;  %2872 = vlog2.f32 %v1866_v44  ;;  %v5694_v4 = vmul.f32 %v5245_v15, %v5561_v36  ;;  %v2853_v6 = vpop.eup %2852  ;;  %v2029_v49 = vmul.f32 0.6931472, %v2851_v45 }
 0x294   : > { %v2356_v1 = vmul.f32 1.442695, %v2271_v48  ;;  %2874 = vpow2.f32 %v1786_v23  ;;  %v1618_v34 = vsel %vm1327_vm7, %v1460_v28, %v5063_v2  ;;  %v2855_v22 = vpop.eup %2854  ;;  %2528 = vst [vmem:[%s5428_s26 + $0x80] sm:$0xff] %v2464_v30  ;;  %v2023_v61 = vmul.f32 0.6931472, %v2853_v6 }
 0x295   : > { %v2350_v38 = vmul.f32 1.442695, %v2268_v16  ;;  %v5702_v41 = vmul.f32 %v5245_v15, %v5570_v12  ;;  %v5706_v36 = vmul.f32 %v5245_v15, %v5600_v11  ;;  %v2139_v56 = vmul.f32 %v7127_v35, %v2029_v49  ;;  %v1488_v11 = vpop.permute.xlu0 %1487 }
 0x296   : > { %v2857_v21 = vpop.eup %2856  ;;  %2876 = vpow2.f32 %v2356_v1  ;;  %v1871_v17 = vsub.f32 1.0, %v2855_v22  ;;  %v5711_v2 = vmul.f32 %v5245_v15, %v5610_v19  ;;  %v2136_v8 = vmul.f32 %v7127_v35, %v2023_v61 }
 0x297   : > { %v2859_v26 = vpop.eup %2858  ;;  %2878 = vpow2.f32 %v2350_v38  ;;  %v1868_v12 = vsub.f32 1.0, %v2857_v21  ;;  %v5715_v52 = vmul.f32 %v4632_v50, %v1618_v34  ;;  %v2209_v59 = vsel %vm2185_vm9, 0.0, %v2139_v56 }
 0x298   : > { %v2861_v10 = vpop.eup %2860  ;;  %2880 = vlog2.f32 %v1871_v17  ;;  %v1873_v28 = vsub.f32 1.0, %v2859_v26  ;;  %v1623_v19 = vsel %vm1327_vm7, %v1480_v54, %v5146_v40  ;;  %v2273_v13 = vadd.f32 %v2209_v59, %v5650_v60  ;;  %v1476_v54 = vpop.permute.xlu1 %1475 }
 0x299   : > { %v2863_v32 = vpop.eup %2862  ;;  %v2206_v7 = vsel %vm2185_vm9, 0.0, %v2136_v8  ;;  %2882 = vlog2.f32 %v1868_v12  ;;  %v1870_v18 = vsub.f32 1.0, %v2861_v10  ;;  %v1620_v63 = vsel %vm1327_vm7, %v1468_v25, %v5083_v27  ;;  %v1496_v1 = vpop.permute.xlu0 %1495 }
 0x29a   : > { %v2270_v51 = vadd.f32 %v2206_v7, %v5665_v46  ;;  %2884 = vlog2.f32 %v1873_v28  ;;  %v1875_v44 = vsub.f32 1.0, %v2863_v32  ;;  %v2360_v24 = vmul.f32 1.442695, %v2273_v13 }
 0x29b   : > { %v2865_v48 = vpop.eup %2864  ;;  %2886 = vlog2.f32 %v1870_v18  ;;  %v1780_v40 = vmul.f32 1.442695, %v5715_v52  ;;  %v5731_v60 = vmul.f32 %v4632_v50, %v1623_v19  ;;  %v1625_v46 = vsel %vm1327_vm7, %v1488_v11, %v5166_v43 }
 0x29c   : > { %v2867_v23 = vpop.eup %2866  ;;  %v2354_v45 = vmul.f32 1.442695, %v2270_v51  ;;  %v2033_v30 = vmul.f32 0.6931472, %v2865_v48  ;;  %2888 = vlog2.f32 %v1875_v44  ;;  %v5738_v27 = vmul.f32 %v5245_v15, %v5613_v5  ;;  %v1484_v13 = vpop.permute.xlu1 %1483 }
 0x29d   : > { %2890 = vpow2.f32 %v2360_v24  ;;  %v1872_v16 = vsub.f32 1.0, %v2867_v23  ;;  %v5741_v6 = vmul.f32 %v4632_v50, %v1620_v63  ;;  %v5745_v22 = vmul.f32 %v4632_v50, %v1625_v46  ;;  %v5789_v46 = vld [vmem:[%s6400_s3] ss:$0 sm:$0xff] }
 0x29e   : > { %v2869_v49 = vpop.eup %2868  ;;  %2892 = vpow2.f32 %v2354_v45  ;;  %v2141_v34 = vmul.f32 %v7127_v35, %v2033_v30  ;;  %v1622_v43 = vsel %vm1327_vm7, %v1476_v54, %v5105_v14  ;;  %v1790_v61 = vmul.f32 1.442695, %v5731_v60 }
 0x29f   : > { %v2871_v38 = vpop.eup %2870  ;;  %2894 = vlog2.f32 %v1872_v16  ;;  %v1877_v5 = vsub.f32 1.0, %v2869_v49  ;;  %v5752_v25 = vmul.f32 %v4632_v50, %v1622_v43  ;;  %v1627_v26 = vsel %vm1327_vm7, %v1496_v1, %v5194_v20  ;;  %v5799_v1 = vpop.permute.xlu0 %1503 }
 0x2a0   : > { %v2873_v21 = vpop.eup %2872  ;;  %v2211_v56 = vsel %vm2185_vm9, 0.0, %v2141_v34  ;;  %v1874_v17 = vsub.f32 1.0, %v2871_v38  ;;  %2896 = vpow2.f32 %v1780_v40  ;;  %v5762_v11 = vmul.f32 %v5245_v15, %v5638_v29 }
 0x2a1   : > { %v2875_v8 = vpop.eup %2874  ;;  %v2275_v14 = vadd.f32 %v2211_v56, %v5677_v42  ;;  %v2027_v12 = vmul.f32 0.6931472, %v2873_v21  ;;  %2898 = vlog2.f32 %v1877_v5  ;;  %v1784_v59 = vmul.f32 1.442695, %v5741_v6 }
 0x2a2   : > { %2900 = vlog2.f32 %v1874_v17  ;;  %v1879_v10 = vsub.f32 1.0, %v2875_v8  ;;  %v1794_v28 = vmul.f32 1.442695, %v5745_v22  ;;  %v5768_v42 = vmul.f32 %v4632_v50, %v1627_v26 }
 0x2a3   : > { %v2877_v19 = vpop.eup %2876  ;;  %v2364_v32 = vmul.f32 1.442695, %v2275_v14  ;;  %v2138_v20 = vmul.f32 %v7127_v35, %v2027_v12  ;;  %2902 = vpow2.f32 %v1790_v61  ;;  %v5773_v18 = vmul.f32 %v5245_v15, %v5655_v55  ;;  %v7144_v15 = vld [vmem:[#allocation78_spill] sm:$0xff] }
 0x2a4   : > { %v2879_v7 = vpop.eup %2878  ;;  %v2469_v29 = vmul.f32 %v2877_v19, %v5408_v62  ;;  %2904 = vlog2.f32 %v1879_v10  ;;  %v1788_v51 = vmul.f32 1.442695, %v5752_v25  ;;  %v1798_v24 = vmul.f32 1.442695, %v5768_v42 }
 0x2a5   : > { %v2881_v44 = vpop.eup %2880  ;;  %v2466_v63 = vmul.f32 %v2879_v7, %v5408_v62  ;;  %2906 = vpow2.f32 %v2364_v32  ;;  %v2208_v48 = vsel %vm2185_vm9, 0.0, %v2138_v20  ;;  %v1624_v55 = vsel %vm1327_vm7, %v1484_v13, %v7144_v15  ;;  %v5819_v7 = vpop.permute.xlu1 %1491 }
 0x2a6   : > { %v2883_v40 = vpop.eup %2882  ;;  %2533 = vst [vmem:[%s5428_s26 + $0xa8] sm:$0xff] %v2469_v29  ;;  %v2272_v54 = vadd.f32 %v2208_v48, %v5685_v57  ;;  %v2037_v23 = vmul.f32 0.6931472, %v2881_v44  ;;  %2908 = vpow2.f32 %v1784_v59  ;;  %v5793_v16 = vmul.f32 %v5789_v46, %v5658_v47  ;;  %v5825_v48 = vpop.permute.xlu0 %1511 }
 0x2a7   : > { %v2885_v45 = vpop.eup %2884  ;;  %2530 = vst [vmem:[%s5428_s26 + $0x90] sm:$0xff] %v2466_v63  ;;  %v2031_v30 = vmul.f32 0.6931472, %v2883_v40  ;;  %v5797_v57 = vmul.f32 %v5789_v46, %v5668_v37  ;;  %2910 = vpow2.f32 %v1794_v28  ;;  %v5804_v47 = vmul.f32 %v4632_v50, %v1624_v55 }
 0x2a8   : > { %v2887_v49 = vpop.eup %2886  ;;  %v2358_v34 = vmul.f32 1.442695, %v2272_v54  ;;  %v2143_v43 = vmul.f32 %v7127_v35, %v2037_v23  ;;  %v2041_v38 = vmul.f32 0.6931472, %v2885_v45  ;;  %2912 = vpow2.f32 %v1788_v51 }
 0x2a9   : > { %v2889_v5 = vpop.eup %2888  ;;  %v2140_v61 = vmul.f32 %v7127_v35, %v2031_v30  ;;  %v2035_v21 = vmul.f32 0.6931472, %v2887_v49  ;;  %2914 = vpow2.f32 %v1798_v24 }
 0x2aa   : > { %v2891_v56 = vpop.eup %2890  ;;  %2916 = vpow2.f32 %v2358_v34  ;;  %v2213_v37 = vsel %vm2185_vm9, 0.0, %v2143_v43  ;;  %v2145_v17 = vmul.f32 %v7127_v35, %v2041_v38  ;;  %v2045_v26 = vmul.f32 0.6931472, %v2889_v5 }
 0x2ab   : > { %v2893_v8 = vpop.eup %2892  ;;  %v2471_v14 = vmul.f32 %v2891_v56, %v5408_v62  ;;  %v2277_v12 = vadd.f32 %v2213_v37, %v5694_v4  ;;  %v2210_v10 = vsel %vm2185_vm9, 0.0, %v2140_v61  ;;  %v2142_v59 = vmul.f32 %v7127_v35, %v2035_v21 }
 0x2ac   : > { %v2895_v28 = vpop.eup %2894  ;;  %v2468_v19 = vmul.f32 %v2893_v8, %v5408_v62  ;;  %v2274_v32 = vadd.f32 %v2210_v10, %v5702_v41  ;;  %v2215_v20 = vsel %vm2185_vm9, 0.0, %v2145_v17  ;;  %v2147_v13 = vmul.f32 %v7127_v35, %v2045_v26  ;;  %v1500_v17 = vpop.permute.xlu1 %1499 }
 0x2ad   : > { %v2897_v29 = vpop.eup %2896  ;;  %2535 = vst [vmem:[%s5428_s26 + $0xb8] sm:$0xff] %v2471_v14  ;;  %v2368_v4 = vmul.f32 1.442695, %v2277_v12  ;;  %v2279_v51 = vadd.f32 %v2215_v20, %v5706_v36  ;;  %v2212_v44 = vsel %vm2185_vm9, 0.0, %v2142_v59  ;;  %v2039_v63 = vmul.f32 0.6931472, %v2895_v28  ;;  %v1520_v59 = vpop.permute.xlu0 %1519 }
 0x2ae   : > { %v2899_v24 = vpop.eup %2898  ;;  %2532 = vst [vmem:[%s5428_s26 + $0xa0] sm:$0xff] %v2468_v19  ;;  %v2362_v41 = vmul.f32 1.442695, %v2274_v32  ;;  %v2276_v40 = vadd.f32 %v2212_v44, %v5711_v2  ;;  %v2217_v54 = vsel %vm2185_vm9, 0.0, %v2147_v13  ;;  %v1876_v23 = vsub.f32 1.0, %v2897_v29  ;;  %v7145_v12 = vld [vmem:[#allocation83_spill] sm:$0xff] }
 0x2af   : > { %v2901_v15 = vpop.eup %2900  ;;  %2918 = vpow2.f32 %v2368_v4  ;;  %v2372_v55 = vmul.f32 1.442695, %v2279_v51  ;;  %v2281_v36 = vadd.f32 %v2217_v54, %v5738_v27  ;;  %v2144_v45 = vmul.f32 %v7127_v35, %v2039_v63 }
 0x2b0   : > { %v2903_v30 = vpop.eup %2902  ;;  %2920 = vpow2.f32 %v2362_v41  ;;  %v2366_v49 = vmul.f32 1.442695, %v2276_v40  ;;  %v2049_v34 = vmul.f32 0.6931472, %v2899_v24  ;;  %v2043_v43 = vmul.f32 0.6931472, %v2901_v15 }
 0x2b1   : > { %v2905_v38 = vpop.eup %2904  ;;  %2922 = vpow2.f32 %v2372_v55  ;;  %v2376_v5 = vmul.f32 1.442695, %v2281_v36  ;;  %v2214_v2 = vsel %vm2185_vm9, 0.0, %v2144_v45  ;;  %v1881_v61 = vsub.f32 1.0, %v2903_v30  ;;  %v1508_v55 = vpop.permute.xlu1 %1507  ;;  %v7146_v45 = vld [vmem:[#allocation79_spill] sm:$0xff] }
 0x2b2   : > { %v2907_v21 = vpop.eup %2906  ;;  %2924 = vpow2.f32 %v2366_v49  ;;  %v2278_v56 = vadd.f32 %v2214_v2, %v5762_v11  ;;  %v2149_v27 = vmul.f32 %v7127_v35, %v2049_v34  ;;  %v2146_v37 = vmul.f32 %v7127_v35, %v2043_v43  ;;  %v7147_v49 = vld [vmem:[#allocation85_spill] sm:$0xff]  ;;  %v1528_v43 = vpop.permute.xlu0 %1527  ;;  %v7148_v2 = vld [vmem:[#allocation80_spill] sm:$0xff] }
 0x2b3   : > { %v2909_v26 = vpop.eup %2908  ;;  %v2473_v8 = vmul.f32 %v2907_v21, %v5408_v62  ;;  %2926 = vpow2.f32 %v2376_v5  ;;  %v2053_v14 = vmul.f32 0.6931472, %v2905_v38  ;;  %v1629_v10 = vsel %vm1327_vm7, %v5799_v1, %v7145_v12 }
 0x2b4   : > { %v2911_v28 = vpop.eup %2910  ;;  %v2370_v19 = vmul.f32 1.442695, %v2278_v56  ;;  %v2219_v11 = vsel %vm2185_vm9, 0.0, %v2149_v27  ;;  %v2216_v32 = vsel %vm2185_vm9, 0.0, %v2146_v37  ;;  %2928 = vlog2.f32 %v1876_v23  ;;  %v7151_v37 = vld [vmem:[#allocation8_spill] sm:$0xff] }
 0x2b5   : > { %v2913_v20 = vpop.eup %2912  ;;  %2537 = vst [vmem:[%s5428_s26 + $0xc8] sm:$0xff] %v2473_v8  ;;  %v2283_v13 = vadd.f32 %v2219_v11, %v5773_v18  ;;  %v2280_v29 = vadd.f32 %v2216_v32, %v5793_v16  ;;  %v2151_v4 = vmul.f32 %v7127_v35, %v2053_v14  ;;  %2930 = vlog2.f32 %v1881_v61  ;;  %v7149_v61 = vld [vmem:[#allocation87_spill] sm:$0xff]  ;;  %v7154_v14 = vld [vmem:[#allocation40_spill] sm:$0xff] }
 0x2b6   : > { %v2915_v1 = vpop.eup %2914  ;;  %2932 = vpow2.f32 %v2370_v19  ;;  %v1878_v51 = vsub.f32 1.0, %v2909_v26  ;;  %v1792_v44 = vmul.f32 1.442695, %v5804_v47  ;;  %v5853_v63 = vmul.f32 %v4632_v50, %v1629_v10  ;;  %v7152_v26 = vld [vmem:[#allocation62_spill] sm:$0xff] }
 0x2b7   : > { %v2917_v24 = vpop.eup %2916  ;;  %v2380_v41 = vmul.f32 1.442695, %v2283_v13  ;;  %v2374_v40 = vmul.f32 1.442695, %v2280_v29  ;;  %v2221_v18 = vsel %vm2185_vm9, 0.0, %v2151_v4  ;;  %v1883_v54 = vsub.f32 1.0, %v2911_v28 }
 0x2b8   : > { %v2470_v16 = vmul.f32 %v2917_v24, %v5408_v62  ;;  %v2285_v23 = vadd.f32 %v2221_v18, %v5797_v57  ;;  %2934 = vlog2.f32 %v1878_v51  ;;  %v1880_v15 = vsub.f32 1.0, %v2913_v20  ;;  %v7156_v51 = vld [vmem:[#allocation59_spill] sm:$0xff] }
 0x2b9   : > { %2936 = vpow2.f32 %v2380_v41  ;;  %v1885_v36 = vsub.f32 1.0, %v2915_v1  ;;  %v1626_v30 = vsel %vm1327_vm7, %v5819_v7, %v7146_v45  ;;  %v1631_v34 = vsel %vm1327_vm7, %v5825_v48, %v7147_v49  ;;  %v7150_v48 = vld [vmem:[#allocation82_spill] sm:$0xff]  ;;  %v7158_v41 = vld [vmem:[#allocation52_spill] sm:$0xff] }
 0x2ba   : > { %2534 = vst [vmem:[%s5428_s26 + $0xb0] sm:$0xff] %v2470_v16  ;;  %2938 = vpow2.f32 %v2374_v40  ;;  %v2384_v38 = vmul.f32 1.442695, %v2285_v23  ;;  %v5869_v57 = vmul.f32 %v4632_v50, %v1626_v30  ;;  %v5872_v5 = vmul.f32 %v4632_v50, %v1631_v34  ;;  %v7155_v1 = vld [vmem:[#allocation134_spill] sm:$0xff]  ;;  %v1516_v16 = vpop.permute.xlu1 %1515  ;;  %v1536_v23 = vpop.permute.xlu0 %1535  ;;  %v7162_v30 = vld [vmem:[#allocation53_spill] sm:$0xff] }
 0x2bb   : > { %2940 = vlog2.f32 %v1883_v54  ;;  %v1628_v7 = vsel %vm1327_vm7, %v1500_v17, %v7148_v2  ;;  %v1633_v21 = vsel %vm1327_vm7, %v1520_v59, %v7149_v61  ;;  %v1630_v56 = vsel %vm1327_vm7, %v1508_v55, %v7150_v48  ;;  %v7159_v55 = vld [vmem:[#allocation10_spill] sm:$0xff] }
 0x2bc   : > { %v2919_v27 = vpop.eup %2918  ;;  %v7153_v8 = vsel %vm4323_vm4, %v7151_v37, %v7152_v26  ;;  %2942 = vpow2.f32 %v2384_v38  ;;  %v1802_v17 = vmul.f32 1.442695, %v5853_v63  ;;  %v1796_v10 = vmul.f32 1.442695, %v5869_v57 }
 0x2bd   : > { %v5891_v12 = vsel %vm4579_vm8, %v7154_v14, %v7153_v8  ;;  %v2921_v59 = vpop.eup %2920  ;;  %v2475_v28 = vmul.f32 %v2919_v27, %v5408_v62  ;;  %2944 = vlog2.f32 %v1880_v15  ;;  %v1806_v19 = vmul.f32 1.442695, %v5872_v5  ;;  %v7163_v27 = vld [vmem:[#allocation84_spill] sm:$0xff] }
 0x2be   : > { %v5898_v11 = vmul.f32 %v4632_v50, %v1628_v7  ;;  %v2923_v32 = vpop.eup %2922  ;;  %v2472_v20 = vmul.f32 %v2921_v59, %v5408_v62  ;;  %2946 = vlog2.f32 %v1885_v36  ;;  %v5902_v13 = vmul.f32 %v4632_v50, %v1633_v21  ;;  %v7160_v36 = vld [vmem:[#allocation64_spill] sm:$0xff] }
 0x2bf   : > { %v5905_v29 = vmul.f32 %v4632_v50, %v1630_v56  ;;  %v2925_v4 = vpop.eup %2924  ;;  %v7157_v24 = vsel %vm4323_vm4, %v7155_v1, %v7156_v51  ;;  %2539 = vst [vmem:[%s5428_s26 + $0xd8] sm:$0xff] %v2475_v28  ;;  %v2477_v18 = vmul.f32 %v2923_v32, %v5408_v62  ;;  %2948 = vpow2.f32 %v1792_v44  ;;  %v5934_v62 = vld [vmem:[%s6399_s2] ss:$0 sm:$0xff]  ;;  %v1524_v32 = vpop.permute.xlu1 %1523 }
 0x2c0   : > { %v5915_v40 = vsel %vm4579_vm8, %v7158_v41, %v7157_v24  ;;  %v1800_v54 = vmul.f32 1.442695, %v5898_v11  ;;  %v2927_v15 = vpop.eup %2926  ;;  %v7161_v45 = vsel %vm4323_vm4, %v7159_v55, %v7160_v36  ;;  %2536 = vst [vmem:[%s5428_s26 + $0xc0] sm:$0xff] %v2472_v20  ;;  %v2474_v44 = vmul.f32 %v5934_v62, %v2925_v4  ;;  %v5965_v20 = vpop.permute.xlu0 %1543 }
 0x2c1   : > { %v5928_v49 = vsel %vm4579_vm8, %v7162_v30, %v7161_v45  ;;  %2950 = vpow2.f32 %v1802_v17  ;;  %v1810_v34 = vmul.f32 1.442695, %v5902_v13  ;;  %v2929_v38 = vpop.eup %2928  ;;  %2541 = vst [vmem:[%s5428_s26 + $0xe8] sm:$0xff] %v2477_v18  ;;  %v2479_v2 = vmul.f32 %v5934_v62, %v2927_v15 }
 0x2c2   : > { %v1949_v7 = vmul.f32 %v5789_v46, %v5715_v52  ;;  %2952 = vpow2.f32 %v1796_v10  ;;  %v1804_v61 = vmul.f32 1.442695, %v5905_v29  ;;  %v2931_v21 = vpop.eup %2930  ;;  %2538 = vst [vmem:[%s5428_s26 + $0xd0] sm:$0xff] %v2474_v44  ;;  %v2047_v48 = vmul.f32 0.6931472, %v2929_v38 }
 0x2c3   : > { %2954 = vpow2.f32 %v1806_v19  ;;  %v1635_v56 = vsel %vm1327_vm7, %v1528_v43, %v5580_v9  ;;  %v1632_v37 = vsel %vm1327_vm7, %v1516_v16, %v7163_v27  ;;  %v2933_v26 = vpop.eup %2932  ;;  %2543 = vst [vmem:[%s5428_s26 + $0xf8] sm:$0xff] %v2479_v2  ;;  %v2057_v8 = vmul.f32 0.6931472, %v2931_v21  ;;  %v1532_v27 = vpop.permute.xlu1 %1531 }
 0x2c4   : > { %2956 = vpow2.f32 %v1800_v54  ;;  %v5952_v52 = vmul.f32 %v4632_v50, %v1635_v56  ;;  %v5955_v14 = vmul.f32 %v4632_v50, %v1632_v37  ;;  %v2476_v17 = vmul.f32 %v5934_v62, %v2933_v26  ;;  %v1552_v37 = vpop.permute.xlu0 %1551 }
 0x2c5   : > { %v2148_v10 = vmul.f32 %v7127_v35, %v2047_v48  ;;  %v1954_v9 = vmul.f32 %v5789_v46, %v5731_v60  ;;  %2958 = vpow2.f32 %v1810_v34  ;;  %v2935_v43 = vpop.eup %2934  ;;  %v2153_v59 = vmul.f32 %v7127_v35, %v2057_v8 }
 0x2c6   : > { %v1951_v28 = vmul.f32 %v5789_v46, %v5741_v6  ;;  %2960 = vpow2.f32 %v1804_v61  ;;  %v1814_v19 = vmul.f32 1.442695, %v5952_v52  ;;  %v2937_v4 = vpop.eup %2936  ;;  %2540 = vst [vmem:[%s5428_s26 + $0xe0] sm:$0xff] %v2476_v17  ;;  %v2051_v60 = vmul.f32 0.6931472, %v2935_v43 }
 0x2c7   : > { %v2218_v1 = vsel %vm2185_vm9, 0.0, %v2148_v10  ;;  %v1808_v51 = vmul.f32 1.442695, %v5955_v14  ;;  %v1637_v24 = vsel %vm1327_vm7, %v1536_v23, %v5623_v58  ;;  %v2939_v6 = vpop.eup %2938  ;;  %v2481_v41 = vmul.f32 %v5934_v62, %v2937_v4  ;;  %v7164_v10 = vld [vmem:[#allocation17_spill] sm:$0xff] }
 0x2c8   : > { %v2282_v18 = vadd.f32 %v2218_v1, %v1949_v7  ;;  %v2223_v54 = vsel %vm2185_vm9, 0.0, %v2153_v59  ;;  %2962 = vpow2.f32 %v1814_v19  ;;  %v2941_v16 = vpop.eup %2940  ;;  %v2478_v15 = vmul.f32 %v5934_v62, %v2939_v6 }
 0x2c9   : > { %v2287_v55 = vadd.f32 %v2223_v54, %v1954_v9  ;;  %v2150_v36 = vmul.f32 %v7127_v35, %v2051_v60  ;;  %2964 = vpow2.f32 %v1808_v51  ;;  %v2943_v45 = vpop.eup %2942  ;;  %2545 = vst [vmem:[%s5428_s26 + $0x108] sm:$0xff] %v2481_v41  ;;  %v1956_v58 = vmul.f32 %v5789_v46, %v5745_v22 }
 0x2ca   : > { %v2378_v30 = vmul.f32 1.442695, %v2282_v18  ;;  %v2061_v23 = vmul.f32 0.6931472, %v2941_v16  ;;  %v5983_v44 = vmul.f32 %v4632_v50, %v1637_v24  ;;  %v2945_v34 = vpop.eup %2944  ;;  %2542 = vst [vmem:[%s5428_s26 + $0xf0] sm:$0xff] %v2478_v15  ;;  %v2483_v38 = vmul.f32 %v5934_v62, %v2943_v45  ;;  %v7166_v45 = vld [vmem:[#allocation61_spill] sm:$0xff] }
 0x2cb   : > { %v2388_v2 = vmul.f32 1.442695, %v2287_v55  ;;  %v2220_v7 = vsel %vm2185_vm9, 0.0, %v2150_v36  ;;  %v1953_v61 = vmul.f32 %v5789_v46, %v5752_v25  ;;  %v2947_v21 = vpop.eup %2946  ;;  %v2055_v56 = vmul.f32 0.6931472, %v2945_v34  ;;  %v7165_v36 = vld [vmem:[#allocation135_spill] sm:$0xff] }
 0x2cc   : > { %2966 = vpow2.f32 %v2378_v30  ;;  %v2284_v48 = vadd.f32 %v2220_v7, %v1951_v28  ;;  %v2155_v22 = vmul.f32 %v7127_v35, %v2061_v23  ;;  %v2949_v26 = vpop.eup %2948  ;;  %2547 = vst [vmem:[%s5428_s26 + $0x118] sm:$0xff] %v2483_v38  ;;  %v2065_v8 = vmul.f32 0.6931472, %v2947_v21  ;;  %v1540_v38 = vpop.permute.xlu1 %1539 }
 0x2cd   : > { %2968 = vpow2.f32 %v2388_v2  ;;  %v1818_v17 = vmul.f32 1.442695, %v5983_v44  ;;  %v1634_v9 = vsel %vm1327_vm7, %v1524_v32, %v7164_v10  ;;  %v2152_v28 = vmul.f32 %v7127_v35, %v2055_v56  ;;  %v1560_v2 = vpop.permute.xlu0 %1559 }
 0x2ce   : > { %v2951_v43 = vpop.eup %2950  ;;  %v2382_v25 = vmul.f32 1.442695, %v2284_v48  ;;  %v2225_v59 = vsel %vm2185_vm9, 0.0, %v2155_v22  ;;  %v1882_v19 = vsub.f32 1.0, %v2949_v26  ;;  %v2157_v60 = vmul.f32 %v7127_v35, %v2065_v8 }
 0x2cf   : > { %v2953_v4 = vpop.eup %2952  ;;  %v2289_v1 = vadd.f32 %v2225_v59, %v1956_v58  ;;  %v1887_v51 = vsub.f32 1.0, %v2951_v43  ;;  %2970 = vpow2.f32 %v1818_v17  ;;  %v2222_v6 = vsel %vm2185_vm9, 0.0, %v2152_v28  ;;  %v7168_v58 = vld [vmem:[#allocation67_spill] sm:$0xff] }
 0x2d0   : > { %v2955_v24 = vpop.eup %2954  ;;  %2972 = vpow2.f32 %v2382_v25  ;;  %v1958_v32 = vmul.f32 %v5789_v46, %v5768_v42  ;;  %v1884_v41 = vsub.f32 1.0, %v2953_v4  ;;  %v2286_v16 = vadd.f32 %v2222_v6, %v1953_v61  ;;  %v7169_v25 = vld [vmem:[#allocation15_spill] sm:$0xff]  ;;  %v7174_v4 = vld [vmem:[#allocation65_spill] sm:$0xff] }
 0x2d1   : > { %v2957_v18 = vpop.eup %2956  ;;  %v2392_v54 = vmul.f32 1.442695, %v2289_v1  ;;  %v2227_v15 = vsel %vm2185_vm9, 0.0, %v2157_v60  ;;  %2974 = vlog2.f32 %v1882_v19  ;;  %v7167_v30 = vsel %vm4323_vm4, %v7165_v36, %v7166_v45  ;;  %v7170_v59 = vld [vmem:[#allocation63_spill] sm:$0xff]  ;;  %v7172_v19 = vld [vmem:[#allocation70_spill] sm:$0xff]  ;;  %v7176_v60 = vld [vmem:[#allocation73_spill] sm:$0xff] }
 0x2d2   : > { %v2959_v55 = vpop.eup %2958  ;;  %v1318_v23 = vsel %vm4579_vm8, %v7168_v58, %v7167_v30  ;;  %v2291_v34 = vadd.f32 %v2227_v15, %v1958_v32  ;;  %2976 = vlog2.f32 %v1887_v51  ;;  %v6016_v42 = vmul.f32 %v4632_v50, %v1634_v9 }
 0x2d3   : > { %v2961_v7 = vpop.eup %2960  ;;  %2978 = vpow2.f32 %v2392_v54  ;;  %v2386_v61 = vmul.f32 1.442695, %v2286_v16  ;;  %v1889_v21 = vsub.f32 1.0, %v2955_v24  ;;  %v1886_v48 = vsub.f32 1.0, %v2957_v18  ;;  %v1548_v18 = vpop.permute.xlu1 %1547 }
 0x2d4   : > { %v2396_v22 = vmul.f32 1.442695, %v2291_v34  ;;  %2980 = vlog2.f32 %v1884_v41  ;;  %v1891_v56 = vsub.f32 1.0, %v2959_v55  ;;  %v1639_v26 = vsel %vm1327_vm7, %v5965_v20, %v5915_v40  ;;  %v7173_v20 = vld [vmem:[#allocation136_spill] sm:$0xff]  ;;  %v1568_v54 = vpop.permute.xlu0 %1567 }
 0x2d5   : > { %v2963_v8 = vpop.eup %2962  ;;  %2982 = vpow2.f32 %v2386_v61  ;;  %v6023_v17 = vmul.f32 %v4632_v50, %v1639_v26  ;;  %v1636_v10 = vsel %vm1327_vm7, %v1532_v27, %v5558_v0  ;;  %v1641_v9 = vsel %vm1327_vm7, %v1552_v37, %v1318_v23 }
 0x2d6   : > { %v2965_v43 = vpop.eup %2964  ;;  %v7171_v28 = vsel %vm4323_vm4, %v7169_v25, %v7170_v59  ;;  %v7175_v1 = vsel %vm4323_vm4, %v7173_v20, %v7174_v4  ;;  %2984 = vpow2.f32 %v2396_v22  ;;  %v1888_v27 = vsub.f32 1.0, %v2961_v7 }
 0x2d7   : > { %v1320_v40 = vsel %vm4579_vm8, %v7172_v19, %v7171_v28  ;;  %v1322_v0 = vsel %vm4579_vm8, %v7176_v60, %v7175_v1  ;;  %v6048_v37 = vmul.f32 %v5789_v46, %v5804_v47  ;;  %2986 = vlog2.f32 %v1889_v21 }
 0x2d8   : > { %v1893_v51 = vsub.f32 1.0, %v2963_v8  ;;  %v1812_v24 = vmul.f32 1.442695, %v6016_v42  ;;  %2988 = vlog2.f32 %v1886_v48  ;;  %v1890_v6 = vsub.f32 1.0, %v2965_v43 }
 0x2d9   : > { %v6052_v32 = vmul.f32 %v4632_v50, %v1636_v10  ;;  %v6055_v41 = vmul.f32 %v4632_v50, %v1641_v9  ;;  %v2967_v16 = vpop.eup %2966  ;;  %2990 = vlog2.f32 %v1891_v56  ;;  %v1822_v47 = vmul.f32 1.442695, %v6023_v17 }
 0x2da   : > { %v1638_v15 = vsel %vm1327_vm7, %v1540_v38, %v5595_v39  ;;  %v1643_v55 = vsel %vm1327_vm7, %v1560_v2, %v1320_v40  ;;  %v2969_v36 = vpop.eup %2968  ;;  %v2480_v45 = vmul.f32 %v5934_v62, %v2967_v16  ;;  %2992 = vlog2.f32 %v1888_v27 }
 0x2db   : > { %v6065_v30 = vmul.f32 %v4632_v50, %v1638_v15  ;;  %v6068_v58 = vmul.f32 %v4632_v50, %v1643_v55  ;;  %v2485_v23 = vmul.f32 %v5934_v62, %v2969_v36  ;;  %2994 = vlog2.f32 %v1893_v51 }
 0x2dc   : > { %v1640_v39 = vsel %vm1327_vm7, %v1548_v18, %v5891_v12  ;;  %v1645_v34 = vsel %vm1327_vm7, %v1568_v54, %v1322_v0  ;;  %v2971_v38 = vpop.eup %2970  ;;  %2544 = vst [vmem:[%s5428_s26 + $0x100] sm:$0xff] %v2480_v45  ;;  %v1960_v2 = vmul.f32 %v5789_v46, %v5853_v63  ;;  %v1957_v7 = vmul.f32 %v5789_v46, %v5869_v57 }
 0x2dd   : > { %2996 = vlog2.f32 %v1890_v6  ;;  %v1816_v61 = vmul.f32 1.442695, %v6052_v32  ;;  %v2973_v21 = vpop.eup %2972  ;;  %2549 = vst [vmem:[%s5428_s26 + $0x128] sm:$0xff] %v2485_v23  ;;  %v1895_v48 = vsub.f32 1.0, %v2971_v38  ;;  %v1826_v12 = vmul.f32 1.442695, %v6055_v41 }
 0x2de   : > { %2998 = vpow2.f32 %v1812_v24  ;;  %v6085_v22 = vmul.f32 %v4632_v50, %v1640_v39  ;;  %v2975_v56 = vpop.eup %2974  ;;  %v2482_v26 = vmul.f32 %v5934_v62, %v2973_v21  ;;  %v1820_v63 = vmul.f32 1.442695, %v6065_v30 }
 0x2df   : > { %3000 = vpow2.f32 %v1822_v47  ;;  %v6090_v57 = vmul.f32 %v4632_v50, %v1645_v34  ;;  %v2977_v8 = vpop.eup %2976  ;;  %v2059_v10 = vmul.f32 0.6931472, %v2975_v56  ;;  %v1962_v9 = vmul.f32 %v5789_v46, %v5872_v5 }
 0x2e0   : > { %3002 = vlog2.f32 %v1895_v48  ;;  %v1830_v43 = vmul.f32 1.442695, %v6068_v58  ;;  %v2979_v25 = vpop.eup %2978  ;;  %2546 = vst [vmem:[%s5428_s26 + $0x110] sm:$0xff] %v2482_v26  ;;  %v2069_v59 = vmul.f32 0.6931472, %v2977_v8  ;;  %v1959_v28 = vmul.f32 %v5789_v46, %v5898_v11 }
 0x2e1   : > { %v6100_v19 = vmul.f32 %v5789_v46, %v5902_v13  ;;  %3004 = vpow2.f32 %v1816_v61  ;;  %v2981_v40 = vpop.eup %2980  ;;  %v2487_v20 = vmul.f32 %v5934_v62, %v2979_v25  ;;  %v2154_v5 = vmul.f32 %v7127_v35, %v2059_v10 }
 0x2e2   : > { %3006 = vpow2.f32 %v1826_v12  ;;  %v1824_v4 = vmul.f32 1.442695, %v6085_v22  ;;  %v2983_v1 = vpop.eup %2982  ;;  %v2159_v60 = vmul.f32 %v7127_v35, %v2069_v59  ;;  %v2063_v0 = vmul.f32 0.6931472, %v2981_v40 }
 0x2e3   : > { %3008 = vpow2.f32 %v1820_v63  ;;  %v1834_v11 = vmul.f32 1.442695, %v6090_v57  ;;  %v2985_v27 = vpop.eup %2984  ;;  %2551 = vst [vmem:[%s5428_s26 + $0x138] sm:$0xff] %v2487_v20  ;;  %v2484_v13 = vmul.f32 %v5934_v62, %v2983_v1  ;;  %v2224_v51 = vsel %vm2185_vm9, 0.0, %v2154_v5 }
 0x2e4   : > { %v1961_v24 = vmul.f32 %v5789_v46, %v5905_v29  ;;  %3010 = vpow2.f32 %v1830_v43  ;;  %v2987_v6 = vpop.eup %2986  ;;  %v2489_v18 = vmul.f32 %v5934_v62, %v2985_v27  ;;  %v2288_v54 = vadd.f32 %v2224_v51, %v6048_v37  ;;  %v6121_v29 = vpop.permute.xlu1 %1555 }
 0x2e5   : > { %v2229_v16 = vsel %vm2185_vm9, 0.0, %v2159_v60  ;;  %v2156_v47 = vmul.f32 %v7127_v35, %v2063_v0  ;;  %v2989_v15 = vpop.eup %2988  ;;  %2548 = vst [vmem:[%s5428_s26 + $0x120] sm:$0xff] %v2484_v13  ;;  %v2073_v36 = vmul.f32 0.6931472, %v2987_v6  ;;  %v1966_v45 = vmul.f32 %v5789_v46, %v5952_v52 }
 0x2e6   : > { %v2293_v55 = vadd.f32 %v2229_v16, %v1960_v2  ;;  %3012 = vpow2.f32 %v1824_v4  ;;  %v2991_v23 = vpop.eup %2990  ;;  %2553 = vst [vmem:[%s5428_s26 + $0x148] sm:$0xff] %v2489_v18  ;;  %v2390_v39 = vmul.f32 1.442695, %v2288_v54  ;;  %v2067_v34 = vmul.f32 0.6931472, %v2989_v15 }
 0x2e7   : > { %v2226_v37 = vsel %vm2185_vm9, 0.0, %v2156_v47  ;;  %3014 = vpow2.f32 %v1834_v11  ;;  %v2993_v38 = vpop.eup %2992  ;;  %v2161_v2 = vmul.f32 %v7127_v35, %v2073_v36  ;;  %v2077_v48 = vmul.f32 0.6931472, %v2991_v23 }
 0x2e8   : > { %v2400_v61 = vmul.f32 1.442695, %v2293_v55  ;;  %v2290_v21 = vadd.f32 %v2226_v37, %v1957_v7  ;;  %v2995_v12 = vpop.eup %2994  ;;  %3016 = vpow2.f32 %v2390_v39  ;;  %v2158_v52 = vmul.f32 %v7127_v35, %v2067_v34  ;;  %v1564_v60 = vpop.permute.xlu1 %1563 }
 0x2e9   : > { %v2071_v56 = vmul.f32 0.6931472, %v2993_v38  ;;  %v1963_v26 = vmul.f32 %v5789_v46, %v5955_v14  ;;  %v2231_v10 = vsel %vm2185_vm9, 0.0, %v2161_v2  ;;  %v2163_v43 = vmul.f32 %v7127_v35, %v2077_v48  ;;  %v1576_v37 = vpop.permute.xlu0 %1575  ;;  %v7178_v38 = vld [vmem:[#allocation66_spill] sm:$0xff] }
 0x2ea   : > { %v2997_v63 = vpop.eup %2996  ;;  %3018 = vpow2.f32 %v2400_v61  ;;  %v2394_v8 = vmul.f32 1.442695, %v2290_v21  ;;  %v2295_v25 = vadd.f32 %v2231_v10, %v1962_v9  ;;  %v2228_v59 = vsel %vm2185_vm9, 0.0, %v2158_v52  ;;  %v7180_v21 = vld [vmem:[#allocation68_spill] sm:$0xff] }
 0x2eb   : > { %v2999_v7 = vpop.eup %2998  ;;  %v2160_v40 = vmul.f32 %v7127_v35, %v2071_v56  ;;  %v2081_v20 = vmul.f32 0.6931472, %v2995_v12  ;;  %v2292_v4 = vadd.f32 %v2228_v59, %v1959_v28  ;;  %v2233_v14 = vsel %vm2185_vm9, 0.0, %v2163_v43  ;;  %v7182_v59 = vld [vmem:[#allocation72_spill] sm:$0xff] }
 0x2ec   : > { %v3001_v5 = vpop.eup %3000  ;;  %3020 = vpow2.f32 %v2394_v8  ;;  %v2075_v1 = vmul.f32 0.6931472, %v2997_v63  ;;  %v2404_v11 = vmul.f32 1.442695, %v2295_v25  ;;  %v2297_v27 = vadd.f32 %v2233_v14, %v6100_v19  ;;  %v1572_v63 = vpop.permute.xlu1 %1571 }
 0x2ed   : > { %v3003_v0 = vpop.eup %3002  ;;  %v2230_v9 = vsel %vm2185_vm9, 0.0, %v2160_v40  ;;  %v2165_v13 = vmul.f32 %v7127_v35, %v2081_v20  ;;  %v2398_v6 = vmul.f32 1.442695, %v2292_v4  ;;  %v1892_v55 = vsub.f32 1.0, %v2999_v7  ;;  %v7184_v20 = vld [vmem:[#allocation71_spill] sm:$0xff]  ;;  %v1584_v3 = vpop.permute.xlu0 %1583 }
 0x2ee   : > { %v3005_v51 = vpop.eup %3004  ;;  %v2294_v18 = vadd.f32 %v2230_v9, %v1961_v24  ;;  %v2162_v54 = vmul.f32 %v7127_v35, %v2075_v1  ;;  %v2085_v28 = vmul.f32 0.6931472, %v3003_v0  ;;  %3022 = vpow2.f32 %v2404_v11  ;;  %v7177_v24 = vld [vmem:[#allocation12_spill] sm:$0xff]  ;;  %v7188_v1 = vld [vmem:[#allocation74_spill] sm:$0xff]  ;;  %v7190_v9 = vld [vmem:[#allocation69_spill] sm:$0xff] }
 0x2ef   : > { %v3007_v16 = vpop.eup %3006  ;;  %v2408_v47 = vmul.f32 1.442695, %v2297_v27  ;;  %v2235_v15 = vsel %vm2185_vm9, 0.0, %v2165_v13  ;;  %3024 = vpow2.f32 %v2398_v6  ;;  %v7179_v61 = vsel %vm4323_vm4, %v7177_v24, %v7178_v38  ;;  %v7189_v27 = vld [vmem:[#allocation137_spill] sm:$0xff] }
 0x2f0   : > { %v3009_v36 = vpop.eup %3008  ;;  %v2402_v19 = vmul.f32 1.442695, %v2294_v18  ;;  %v2299_v23 = vadd.f32 %v2235_v15, %v1966_v45  ;;  %v2232_v39 = vsel %vm2185_vm9, 0.0, %v2162_v54  ;;  %v1321_v2 = vsel %vm4579_vm8, %v7180_v21, %v7179_v61  ;;  %v7193_v18 = vld [vmem:[#allocation139_spill] sm:$0xff] }
 0x2f1   : > { %v3011_v34 = vpop.eup %3010  ;;  %3026 = vpow2.f32 %v2408_v47  ;;  %v2296_v48 = vadd.f32 %v2232_v39, %v1963_v26  ;;  %v2167_v12 = vmul.f32 %v7127_v35, %v2085_v28  ;;  %v1968_v52 = vmul.f32 %v5789_v46, %v5983_v44  ;;  %v7181_v26 = vld [vmem:[#allocation14_spill] sm:$0xff]  ;;  %v7194_v54 = vld [vmem:[#allocation11_spill] sm:$0xff]  ;;  %v7196_v47 = vld [vmem:[#allocation77_spill] sm:$0xff] }
 0x2f2   : > { %3028 = vpow2.f32 %v2402_v19  ;;  %v2412_v45 = vmul.f32 1.442695, %v2299_v23  ;;  %v1897_v56 = vsub.f32 1.0, %v3001_v5  ;;  %v1894_v7 = vsub.f32 1.0, %v3005_v51  ;;  %v7185_v44 = vld [vmem:[#allocation138_spill] sm:$0xff]  ;;  %v7186_v5 = vld [vmem:[#allocation76_spill] sm:$0xff] }
 0x2f3   : > { %v3013_v8 = vpop.eup %3012  ;;  %v2406_v10 = vmul.f32 1.442695, %v2296_v48  ;;  %v2237_v43 = vsel %vm2185_vm9, 0.0, %v2167_v12  ;;  %3030 = vlog2.f32 %v1892_v55  ;;  %v7183_v40 = vsel %vm4323_vm4, %v7181_v26, %v7182_v59  ;;  %v7192_v51 = vld [vmem:[#allocation75_spill] sm:$0xff]  ;;  %v1580_v12 = vpop.permute.xlu1 %1579 }
 0x2f4   : > { %v3015_v25 = vpop.eup %3014  ;;  %v1323_v4 = vsel %vm4579_vm8, %v7184_v20, %v7183_v40  ;;  %v7187_v14 = vsel %vm4323_vm4, %v7185_v44, %v7186_v5  ;;  %3032 = vpow2.f32 %v2412_v45  ;;  %v2301_v11 = vadd.f32 %v2237_v43, %v1968_v52 }
 0x2f5   : > { %v1325_v0 = vsel %vm4579_vm8, %v7188_v1, %v7187_v14  ;;  %v7191_v13 = vsel %vm4323_vm4, %v7189_v27, %v7190_v9  ;;  %v7195_v28 = vsel %vm4323_vm4, %v7193_v18, %v7194_v54  ;;  %3034 = vpow2.f32 %v2406_v10  ;;  %v3017_v19 = vpop.eup %3016 }
 0x2f6   : > { %v1324_v6 = vsel %vm4579_vm8, %v7192_v51, %v7191_v13  ;;  %v1326_v15 = vsel %vm4579_vm8, %v7196_v47, %v7195_v28  ;;  %v1899_v55 = vsub.f32 1.0, %v3007_v16  ;;  %v2416_v23 = vmul.f32 1.442695, %v2301_v11 }
 0x2f7   : > { %3036 = vlog2.f32 %v1897_v56  ;;  %v1896_v39 = vsub.f32 1.0, %v3009_v36  ;;  %v1642_v24 = vsel %vm1327_vm7, %v6121_v29, %v5928_v49  ;;  %v3019_v38 = vpop.eup %3018  ;;  %v2486_v61 = vmul.f32 %v5934_v62, %v3017_v19 }
 0x2f8   : > { %3038 = vlog2.f32 %v1894_v7  ;;  %v1901_v31 = vsub.f32 1.0, %v3011_v34  ;;  %v1647_v16 = vsel %vm1327_vm7, %v1576_v37, %v1324_v6  ;;  %v2491_v21 = vmul.f32 %v5934_v62, %v3019_v38 }
 0x2f9   : > { %3040 = vpow2.f32 %v2416_v23  ;;  %v1898_v48 = vsub.f32 1.0, %v3013_v8  ;;  %v1644_v36 = vsel %vm1327_vm7, %v1564_v60, %v1321_v2  ;;  %v3021_v49 = vpop.eup %3020  ;;  %2550 = vst [vmem:[%s5428_s26 + $0x130] sm:$0xff] %v2486_v61  ;;  %v1903_v29 = vsub.f32 1.0, %v3015_v25 }
 0x2fa   : > { %3042 = vlog2.f32 %v1899_v55  ;;  %v6204_v45 = vmul.f32 %v4632_v50, %v1642_v24  ;;  %v1649_v34 = vsel %vm1327_vm7, %v1584_v3, %v1326_v15  ;;  %2555 = vst [vmem:[%s5428_s26 + $0x158] sm:$0xff] %v2491_v21  ;;  %v2488_v37 = vmul.f32 %v5934_v62, %v3021_v49 }
 0x2fb   : > { %3044 = vlog2.f32 %v1896_v39  ;;  %v6211_v52 = vmul.f32 %v4632_v50, %v1647_v16  ;;  %v1646_v60 = vsel %vm1327_vm7, %v1572_v63, %v1323_v4  ;;  %v6216_v2 = vmul.f32 %v4632_v50, %v1644_v36  ;;  %v3023_v8 = vpop.eup %3022 }
 0x2fc   : > { %3046 = vlog2.f32 %v1901_v31  ;;  %v1648_v56 = vsel %vm1327_vm7, %v1580_v12, %v1325_v0  ;;  %2552 = vst [vmem:[%s5428_s26 + $0x140] sm:$0xff] %v2488_v37  ;;  %v6222_v10 = vmul.f32 %v4632_v50, %v1649_v34  ;;  %v3025_v43 = vpop.eup %3024  ;;  %v2493_v7 = vmul.f32 %v5934_v62, %v3023_v8 }
 0x2fd   : > { %3048 = vlog2.f32 %v1898_v48  ;;  %v1828_v63 = vmul.f32 1.442695, %v6204_v45  ;;  %v6227_v25 = vmul.f32 %v4632_v50, %v1646_v60  ;;  %v2490_v26 = vmul.f32 %v5934_v62, %v3025_v43 }
 0x2fe   : > { %3050 = vlog2.f32 %v1903_v29  ;;  %v3027_v33 = vpop.eup %3026  ;;  %v1838_v59 = vmul.f32 1.442695, %v6211_v52  ;;  %v6232_v40 = vmul.f32 %v4632_v50, %v1648_v56  ;;  %2557 = vst [vmem:[%s5428_s26 + $0x168] sm:$0xff] %v2493_v7  ;;  %v1832_v44 = vmul.f32 1.442695, %v6216_v2 }
 0x2ff   : > { %v3029_v20 = vpop.eup %3028  ;;  %v2495_v4 = vmul.f32 %v5934_v62, %v3027_v33  ;;  %2554 = vst [vmem:[%s5428_s26 + $0x150] sm:$0xff] %v2490_v26  ;;  %v1842_v1 = vmul.f32 1.442695, %v6222_v10  ;;  %3052 = vpow2.f32 %v1828_v63  ;;  %v1836_v50 = vmul.f32 1.442695, %v6227_v25 }
 0x300   : > { %v3031_v5 = vpop.eup %3030  ;;  %v2492_v14 = vmul.f32 %v5934_v62, %v3029_v20  ;;  %v1965_v13 = vmul.f32 %v5789_v46, %v6016_v42  ;;  %3054 = vpow2.f32 %v1838_v59  ;;  %v1840_v51 = vmul.f32 1.442695, %v6232_v40 }
 0x301   : > { %v3033_v0 = vpop.eup %3032  ;;  %2559 = vst [vmem:[%s5428_s26 + $0x178] sm:$0xff] %v2495_v4  ;;  %v2079_v11 = vmul.f32 0.6931472, %v3031_v5  ;;  %v1970_v28 = vmul.f32 %v5789_v46, %v6023_v17  ;;  %3056 = vpow2.f32 %v1832_v44  ;;  %v1967_v55 = vmul.f32 %v5789_v46, %v6052_v32 }
 0x302   : > { %v3035_v27 = vpop.eup %3034  ;;  %2556 = vst [vmem:[%s5428_s26 + $0x160] sm:$0xff] %v2492_v14  ;;  %v2497_v9 = vmul.f32 %v5934_v62, %v3033_v0  ;;  %v1972_v42 = vmul.f32 %v5789_v46, %v6055_v41  ;;  %3058 = vpow2.f32 %v1842_v1  ;;  %v1969_v17 = vmul.f32 %v5789_v46, %v6065_v30 }
 0x303   : > { %v2494_v18 = vmul.f32 %v5934_v62, %v3035_v27  ;;  %v2164_v54 = vmul.f32 %v7127_v35, %v2079_v11  ;;  %3060 = vpow2.f32 %v1836_v50  ;;  %v1974_v16 = vmul.f32 %v5789_v46, %v6068_v58 }
 0x304   : > { %v3037_v6 = vpop.eup %3036  ;;  %2561 = vst [vmem:[%s5428_s26 + $0x188] sm:$0xff] %v2497_v9  ;;  %3062 = vpow2.f32 %v1840_v51  ;;  %v1971_v21 = vmul.f32 %v5789_v46, %v6085_v22  ;;  %v1976_v49 = vmul.f32 %v5789_v46, %v6090_v57 }
 0x305   : > { %v3039_v47 = vpop.eup %3038  ;;  %v2089_v15 = vmul.f32 0.6931472, %v3037_v6  ;;  %2558 = vst [vmem:[%s5428_s26 + $0x170] sm:$0xff] %v2494_v18  ;;  %v2234_v23 = vsel %vm2185_vm9, 0.0, %v2164_v54 }
 0x306   : > { %v3041_v19 = vpop.eup %3040  ;;  %v2083_v39 = vmul.f32 0.6931472, %v3039_v47  ;;  %v2298_v38 = vadd.f32 %v2234_v23, %v1965_v13 }
 0x307   : > { %v3043_v24 = vpop.eup %3042  ;;  %v2499_v3 = vmul.f32 %v5934_v62, %v3041_v19  ;;  %v2169_v32 = vmul.f32 %v7127_v35, %v2089_v15 }
 0x308   : > { %v3045_v41 = vpop.eup %3044  ;;  %v2166_v61 = vmul.f32 %v7127_v35, %v2083_v39  ;;  %v2093_v31 = vmul.f32 0.6931472, %v3043_v24  ;;  %v2410_v30 = vmul.f32 1.442695, %v2298_v38 }
 0x309   : > { %v3047_v48 = vpop.eup %3046  ;;  %2563 = vst [vmem:[%s5428_s26 + $0x198] sm:$0xff] %v2499_v3  ;;  %v2239_v36 = vsel %vm2185_vm9, 0.0, %v2169_v32  ;;  %v2087_v12 = vmul.f32 0.6931472, %v3045_v41 }
 0x30a   : > { %v3049_v29 = vpop.eup %3048  ;;  %v2303_v34 = vadd.f32 %v2239_v36, %v1970_v28  ;;  %v2236_v37 = vsel %vm2185_vm9, 0.0, %v2166_v61  ;;  %v2171_v58 = vmul.f32 %v7127_v35, %v2093_v31  ;;  %v2097_v60 = vmul.f32 0.6931472, %v3047_v48 }
 0x30b   : > { %v3051_v56 = vpop.eup %3050  ;;  %3064 = vpow2.f32 %v2410_v30  ;;  %v2300_v22 = vadd.f32 %v2236_v37, %v1967_v55  ;;  %v2168_v8 = vmul.f32 %v7127_v35, %v2087_v12  ;;  %v2091_v43 = vmul.f32 0.6931472, %v3049_v29 }
 0x30c   : > { %v2420_v7 = vmul.f32 1.442695, %v2303_v34  ;;  %v2241_v63 = vsel %vm2185_vm9, 0.0, %v2171_v58  ;;  %v2173_v46 = vmul.f32 %v7127_v35, %v2097_v60  ;;  %v2101_v57 = vmul.f32 0.6931472, %v3051_v56  ;;  %v3053_v14 = vpop.eup %3052 }
 0x30d   : > { %v2414_v33 = vmul.f32 1.442695, %v2300_v22  ;;  %v2305_v26 = vadd.f32 %v2241_v63, %v1972_v42  ;;  %v2238_v59 = vsel %vm2185_vm9, 0.0, %v2168_v8  ;;  %v2170_v20 = vmul.f32 %v7127_v35, %v2091_v43  ;;  %v3055_v50 = vpop.eup %3054 }
 0x30e   : > { %3066 = vpow2.f32 %v2420_v7  ;;  %v2302_v4 = vadd.f32 %v2238_v59, %v1969_v17  ;;  %v2243_v44 = vsel %vm2185_vm9, 0.0, %v2173_v46  ;;  %v2175_v5 = vmul.f32 %v7127_v35, %v2101_v57  ;;  %v3057_v51 = vpop.eup %3056  ;;  %v3112_v7 = vld [vmem:[%s6400_s3] ss:$0 sm:$0xff] }
 0x30f   : > { %3068 = vpow2.f32 %v2414_v33  ;;  %v2424_v1 = vmul.f32 1.442695, %v2305_v26  ;;  %v2307_v0 = vadd.f32 %v2243_v44, %v1974_v16  ;;  %v2240_v11 = vsel %vm2185_vm9, 0.0, %v2170_v20  ;;  %v3059_v54 = vpop.eup %3058 }
 0x310   : > { %v2418_v27 = vmul.f32 1.442695, %v2302_v4  ;;  %v2304_v9 = vadd.f32 %v2240_v11, %v1971_v21  ;;  %v2245_v13 = vsel %vm2185_vm9, 0.0, %v2175_v5  ;;  %v1900_v47 = vsub.f32 1.0, %v3053_v14  ;;  %v3061_v15 = vpop.eup %3060 }
 0x311   : > { %3070 = vpow2.f32 %v2424_v1  ;;  %v2428_v6 = vmul.f32 1.442695, %v2307_v0  ;;  %v2309_v18 = vadd.f32 %v2245_v13, %v1976_v49  ;;  %v1905_v42 = vsub.f32 1.0, %v3055_v50  ;;  %v3063_v19 = vpop.eup %3062 }
 0x312   : > { %3072 = vpow2.f32 %v2418_v27  ;;  %v2422_v28 = vmul.f32 1.442695, %v2304_v9  ;;  %v1902_v23 = vsub.f32 1.0, %v3057_v51  ;;  %v1907_v39 = vsub.f32 1.0, %v3059_v54 }
 0x313   : > { %3074 = vpow2.f32 %v2428_v6  ;;  %v2432_v55 = vmul.f32 1.442695, %v2309_v18  ;;  %v1904_v17 = vsub.f32 1.0, %v3061_v15  ;;  %v1906_v24 = vsub.f32 1.0, %v3063_v19 }
 0x314   : > { %3076 = vpow2.f32 %v2422_v28  ;;  %v1973_v63 = vmul.f32 %v3112_v7, %v6204_v45  ;;  %v1978_v26 = vmul.f32 %v3112_v7, %v6211_v52  ;;  %v1975_v20 = vmul.f32 %v3112_v7, %v6216_v2 }
 0x315   : > { %3078 = vpow2.f32 %v2432_v55  ;;  %v1980_v1 = vmul.f32 %v3112_v7, %v6222_v10  ;;  %v1977_v9 = vmul.f32 %v3112_v7, %v6227_v25  ;;  %v1979_v15 = vmul.f32 %v3112_v7, %v6232_v40 }
 0x316   : > { %3080 = vlog2.f32 %v1900_v47 }
 0x317   : > { %3082 = vlog2.f32 %v1905_v42 }
 0x318   : > { %v3065_v3 = vpop.eup %3064  ;;  %3084 = vlog2.f32 %v1902_v23 }
 0x319   : > { %v2496_v38 = vmul.f32 %v5934_v62, %v3065_v3  ;;  %3086 = vlog2.f32 %v1907_v39 }
 0x31a   : > { %3088 = vlog2.f32 %v1904_v17 }
 0x31b   : > { %v3067_v32 = vpop.eup %3066  ;;  %2560 = vst [vmem:[%s5428_s26 + $0x180] sm:$0xff] %v2496_v38  ;;  %3090 = vlog2.f32 %v1906_v24 }
 0x31c   : > { %v3069_v41 = vpop.eup %3068  ;;  %v2501_v61 = vmul.f32 %v5934_v62, %v3067_v32 }
 0x31d   : > { %v2498_v31 = vmul.f32 %v5934_v62, %v3069_v41 }
 0x31e   : > { %v3071_v16 = vpop.eup %3070  ;;  %2565 = vst [vmem:[%s5428_s26 + $0x1a8] sm:$0xff] %v2501_v61 }
 0x31f   : > { %v3073_v21 = vpop.eup %3072  ;;  %2562 = vst [vmem:[%s5428_s26 + $0x190] sm:$0xff] %v2498_v31  ;;  %v2503_v48 = vmul.f32 %v5934_v62, %v3071_v16  ;;  %v3113_v16 = vld [vmem:[%s6399_s2] ss:$0 sm:$0xff] }
 0x320   : > { %v3075_v30 = vpop.eup %3074  ;;  %v2500_v36 = vmul.f32 %v5934_v62, %v3073_v21 }
 0x321   : > { %v3077_v12 = vpop.eup %3076  ;;  %2567 = vst [vmem:[%s5428_s26 + $0x1b8] sm:$0xff] %v2503_v48  ;;  %v2505_v49 = vmul.f32 %v5934_v62, %v3075_v30 }
 0x322   : > { %v3079_v29 = vpop.eup %3078  ;;  %2564 = vst [vmem:[%s5428_s26 + $0x1a0] sm:$0xff] %v2500_v36  ;;  %v2502_v34 = vmul.f32 %v5934_v62, %v3077_v12 }
 0x323   : > { %v3081_v37 = vpop.eup %3080  ;;  %2569 = vst [vmem:[%s5428_s26 + $0x1c8] sm:$0xff] %v2505_v49  ;;  %v2507_v58 = vmul.f32 %v5934_v62, %v3079_v29 }
 0x324   : > { %v3083_v60 = vpop.eup %3082  ;;  %2566 = vst [vmem:[%s5428_s26 + $0x1b0] sm:$0xff] %v2502_v34  ;;  %v2095_v56 = vmul.f32 0.6931472, %v3081_v37 }
 0x325   : > { %v3085_v22 = vpop.eup %3084  ;;  %2571 = vst [vmem:[%s5428_s26 + $0x1d8] sm:$0xff] %v2507_v58  ;;  %v2105_v8 = vmul.f32 0.6931472, %v3083_v60 }
 0x326   : > { %v3087_v43 = vpop.eup %3086  ;;  %v2172_v46 = vmul.f32 %v7127_v35, %v2095_v56  ;;  %v2099_v57 = vmul.f32 0.6931472, %v3085_v22 }
 0x327   : > { %v3089_v33 = vpop.eup %3088  ;;  %v2177_v59 = vmul.f32 %v7127_v35, %v2105_v8  ;;  %v2109_v4 = vmul.f32 0.6931472, %v3087_v43 }
 0x328   : > { %v3091_v44 = vpop.eup %3090  ;;  %v2242_v5 = vsel %vm2185_vm9, 0.0, %v2172_v46  ;;  %v2174_v14 = vmul.f32 %v7127_v35, %v2099_v57  ;;  %v2103_v45 = vmul.f32 0.6931472, %v3089_v33 }
 0x329   : > { %v2306_v0 = vadd.f32 %v2242_v5, %v1973_v63  ;;  %v2247_v11 = vsel %vm2185_vm9, 0.0, %v2177_v59  ;;  %v2179_v52 = vmul.f32 %v7127_v35, %v2109_v4  ;;  %v2107_v50 = vmul.f32 0.6931472, %v3091_v44 }
 0x32a   : > { %v2311_v27 = vadd.f32 %v2247_v11, %v1978_v26  ;;  %v2244_v2 = vsel %vm2185_vm9, 0.0, %v2174_v14  ;;  %v2176_v13 = vmul.f32 %v7127_v35, %v2103_v45 }
 0x32b   : > { %v2426_v51 = vmul.f32 1.442695, %v2306_v0  ;;  %v2308_v6 = vadd.f32 %v2244_v2, %v1975_v20  ;;  %v2249_v10 = vsel %vm2185_vm9, 0.0, %v2179_v52  ;;  %v2178_v18 = vmul.f32 %v7127_v35, %v2107_v50 }
 0x32c   : > { %v2436_v54 = vmul.f32 1.442695, %v2311_v27  ;;  %v2313_v28 = vadd.f32 %v2249_v10, %v1980_v1  ;;  %v2246_v47 = vsel %vm2185_vm9, 0.0, %v2176_v13 }
 0x32d   : > { %3092 = vpow2.f32 %v2426_v51  ;;  %v2430_v55 = vmul.f32 1.442695, %v2308_v6  ;;  %v2310_v42 = vadd.f32 %v2246_v47, %v1977_v9  ;;  %v2248_v25 = vsel %vm2185_vm9, 0.0, %v2178_v18 }
 0x32e   : > { %3094 = vpow2.f32 %v2436_v54  ;;  %v2440_v19 = vmul.f32 1.442695, %v2313_v28  ;;  %v2312_v23 = vadd.f32 %v2248_v25, %v1979_v15 }
 0x32f   : > { %3096 = vpow2.f32 %v2430_v55  ;;  %v2434_v35 = vmul.f32 1.442695, %v2310_v42 }
 0x330   : > { %3098 = vpow2.f32 %v2440_v19  ;;  %v2438_v39 = vmul.f32 1.442695, %v2312_v23 }
 0x331   : > { %3100 = vpow2.f32 %v2434_v35 }
 0x332   : > { %3102 = vpow2.f32 %v2438_v39 }
 0x33a   : > { %v3093_v40 = vpop.eup %3092 }
 0x33b   : > { %v3095_v17 = vpop.eup %3094  ;;  %v2504_v24 = vmul.f32 %v5934_v62, %v3093_v40 }
 0x33c   : > { %v3097_v53 = vpop.eup %3096  ;;  %v2509_v3 = vmul.f32 %v5934_v62, %v3095_v17 }
 0x33d   : > { %v3099_v38 = vpop.eup %3098  ;;  %2568 = vst [vmem:[%s5428_s26 + $0x1c0] sm:$0xff] %v2504_v24  ;;  %v2506_v32 = vmul.f32 %v5934_v62, %v3097_v53 }
 0x33e   : > { %v3101_v41 = vpop.eup %3100  ;;  %2573 = vst [vmem:[%s5428_s26 + $0x1e8] sm:$0xff] %v2509_v3  ;;  %v2511_v61 = vmul.f32 %v5934_v62, %v3099_v38 }
 0x33f   : > { %v3103_v31 = vpop.eup %3102  ;;  %2570 = vst [vmem:[%s5428_s26 + $0x1d0] sm:$0xff] %v2506_v32  ;;  %v2508_v21 = vmul.f32 %v3113_v16, %v3101_v41 }
 0x340   : > { %2575 = vst [vmem:[%s5428_s26 + $0x1f8] sm:$0xff] %v2511_v61  ;;  %v2510_v48 = vmul.f32 %v3113_v16, %v3103_v31 }
 0x341   : > { %2572 = vst [vmem:[%s5428_s26 + $0x1e0] sm:$0xff] %v2508_v21 }
 0x342   : > { %2574 = vst [vmem:[%s5428_s26 + $0x1f0] sm:$0xff] %v2510_v48 }
 0x343   : > { %3127 = shalt.err (!%p3124_p3)
}
 0x344   : > { %s3128_s17 = scalar_lea.hbm %s6348_s16, 8192  ;;  %s3132_s8 = scalar_lea.hbm %s6402_s5, 16384 }
 0x345   : > { %p3129_p4 = scmp.ne.s32.totalorder %s6348_s16, %s3128_s17  ;;  %p3133_p9 = scmp.lt.s32.totalorder %s6348_s16, %s6402_s5 }
 0x346   : > { %p3134_p10 = scmp.lt.s32.totalorder %s3132_s8, %s3128_s17 }
 0x347   : > { %p3130_p7 = pnand %p3129_p4, %p3254_p5 }
 0x348   : > { %p3135_p11 = por %p3134_p10, %p3133_p9 }
 0x349   : > { %p3131_p8 = pneg %p3130_p7 }
 0x34b   : > { %p3136_p12 = pnand %p3135_p11, %p3131_p8 }
 0x34d   : > { %3139 = shalt.err (!%p3136_p12)
}
 0x34e   : > { %s3181_s11 = smov 128   ;;  %s3182_s13 = smov 8  }
 0x34f   : > { %2667 = dma.vmem_to_hbm [thread:$0]  (%p3254_p5), %s6350_s12, 8192, %s6348_s16, %s6357_s18, %s3181_s11, %s3181_s11, %s3182_s13  }
 0x350 PF: > { %p2673_p13 = scmp.ge.s32.totalorder %s3174_s23, 2  ;;  %s2605_s14 = sand.u32 1, %s3162_s20  }
 0x351   : > { %s2606_s0 = scalar_lea.sflag [#allocation4], %s2605_s14 }
 0x352   : > { %p2670_p0 = pnand %p2673_p13, %p3258_p6 }
 0x354   : > { %p2671_p1 = pneg %p2670_p0 }
 0x356   : > { %3157 = dma.done.wait (%p2671_p1), %s2606_s0, 8192  }
 0x357   : > { %3159 = vsyncadd (%p2671_p1), %s2606_s0, 4294959104  ;;  %p16_p2 = scmp.ge.s32.totalorder %s3241_s25, 4   ;;  %s7197_s20 = smov %s3166_s21 }
 0x358   : > { %s7198_s21 = smov %s3170_s22  ;;  %s7199_s22 = smov %s3252_s28 }
 0x359   : > { %s7200_s23 = smov %s3241_s25  ;;  %18 = sbr.rel (!%p16_p2) target bundleno = 5 (0x5), region = 75 }
 0x35e   :  { %2611 = vsyncpa [#allocation4], 1 }
 0x35f   :  { %2613 = vsyncpa [#allocation4 + $0x1], 1 }

</bundles_post_ra>
